<compile_context>
chip_gen: v6e
topology: v6e:2x2x1
jax: 0.10.0
libtpu: 0.0.40
codegen_flags: <defaults>
</compile_context>

<pallas_src>
import functools

import jax
import jax.numpy as jnp
from jax.experimental import pallas as pl
from jax.experimental.pallas import tpu as pltpu


def _vals_kernel(x_ref, w_ref, b_ref, vals_ref, ssq_ref, acc_ref):
    """Pass 1: vals = cos(x @ W + b); ssq[i] = sum_j vals[i, j]^2."""
    j = pl.program_id(1)
    k = pl.program_id(2)

    @pl.when(k == 0)
    def _():
        acc_ref[...] = jnp.zeros_like(acc_ref)

    acc_ref[...] += jnp.dot(
        x_ref[...].astype(jnp.float32),
        w_ref[...].astype(jnp.float32),
        preferred_element_type=jnp.float32,
        precision=jax.lax.Precision.HIGHEST,
    )

    @pl.when(k == pl.num_programs(2) - 1)
    def _():
        # NOTE: the module's * sqrt(2/dim) is omitted on purpose — it cancels
        # exactly in the final normalization (psi = c*v / ||c*v|| = v / ||v||).
        v = jnp.cos(acc_ref[...] + b_ref[...].astype(jnp.float32))
        vals_ref[...] = v
        ssq = jnp.sum(v * v, axis=1, keepdims=True)          # (tm, 1)

        @pl.when(j == 0)
        def _():
            ssq_ref[...] = ssq

        @pl.when(j > 0)
        def _():
            ssq_ref[...] = ssq_ref[...] + ssq


def _normalize_kernel(vals_ref, ssq_ref, o_ref):
    """Pass 2: psi[:, j] = vals[:, j] * rsqrt(ssq[j])  (module's transposed
    (1, batch) broadcast: column j scaled by the norm of batch row j)."""
    o_ref[...] = vals_ref[...] * jax.lax.rsqrt(ssq_ref[...])


def _pick_tile(n, preferred):
    """`preferred` if it divides n (and fits), else fall back to the full dim."""
    return preferred if (n >= preferred and n % preferred == 0) else n


def qfeature_map_orf(x, rff_weights, offset, *, tm=256, tn=256, tk=256):
    batch, input_dim = x.shape
    kdim, dim = rff_weights.shape
    assert kdim == input_dim
    # The module's `vals / norms.unsqueeze(0)` divides output column j by the
    # norm of batch row j; that broadcast is only well-defined for batch == dim.
    assert batch == dim, "QFeatureMapORF's (1, batch) broadcast needs batch == dim"

    tm = _pick_tile(batch, tm)
    tn = _pick_tile(dim, tn)
    tk = _pick_tile(input_dim, tk)
    gm, gn, gk = batch // tm, dim // tn, input_dim // tk

    offset2d = offset.reshape(1, dim)
    f32 = jnp.float32

    cost1 = pl.CostEstimate(
        flops=2 * batch * input_dim * dim,
        transcendentals=batch * dim,                    # cos
        bytes_accessed=4 * (batch * input_dim + input_dim * dim
                            + dim + batch * dim + batch))

    vals, ssq = pl.pallas_call(
        _vals_kernel,
        out_shape=(jax.ShapeDtypeStruct((batch, dim), f32),
                   jax.ShapeDtypeStruct((batch, 1), f32)),
        grid=(gm, gn, gk),
        in_specs=[
            pl.BlockSpec((tm, tk), lambda i, j, k: (i, k)),    # x
            pl.BlockSpec((tk, tn), lambda i, j, k: (k, j)),    # W
            pl.BlockSpec((1, tn), lambda i, j, k: (0, j)),     # offset
        ],
        out_specs=(
            pl.BlockSpec((tm, tn), lambda i, j, k: (i, j)),    # cos(xW + b)
            pl.BlockSpec((tm, 1), lambda i, j, k: (i, 0)),     # row sum-of-squares
        ),
        scratch_shapes=[pltpu.VMEM((tm, tn), f32)],
        compiler_params=pltpu.CompilerParams(
            dimension_semantics=("parallel", "arbitrary", "arbitrary")),
        cost_estimate=cost1,
    )(x, rff_weights, offset2d)

    # Tiny reshape outside the kernel so pass 2 can broadcast the per-row
    # norms along lanes without an in-kernel sublane->lane shuffle.
    ssq_row = ssq.reshape(1, batch)

    cost2 = pl.CostEstimate(
        flops=2 * batch * dim,
        transcendentals=batch,                          # rsqrt
        bytes_accessed=4 * (2 * batch * dim + batch))

    psi = pl.pallas_call(
        _normalize_kernel,
        out_shape=jax.ShapeDtypeStruct((batch, dim), f32),
        grid=(gm, gn),
        in_specs=[
            pl.BlockSpec((tm, tn), lambda i, j: (i, j)),       # vals
            pl.BlockSpec((1, tn), lambda i, j: (0, j)),        # sum-sq per column
        ],
        out_specs=pl.BlockSpec((tm, tn), lambda i, j: (i, j)),
        compiler_params=pltpu.CompilerParams(
            dimension_semantics=("parallel", "parallel")),
        cost_estimate=cost2,
    )(vals, ssq_row)
    return psi


def make_orf_params(key, input_dim, dim, gamma):
    """Deterministic synthetic ORF parameters (mimics sklearn's ORF sampler):
    orthogonal random directions with chi(input_dim)-distributed lengths,
    scaled by sqrt(2*gamma); uniform random offset in [0, 2*pi)."""
    k_g, k_chi, k_off = jax.random.split(key, 3)
    n = max(input_dim, dim)
    g = jax.random.normal(k_g, (n, n), dtype=jnp.float32)
    q, _ = jnp.linalg.qr(g)
    chi = jnp.sqrt(jnp.sum(
        jax.random.normal(k_chi, (input_dim, dim), jnp.float32) ** 2, axis=0))
    weights = jnp.sqrt(2.0 * gamma) * q[:input_dim, :dim] * chi[None, :]
    offset = jax.random.uniform(k_off, (dim,), jnp.float32,
                                minval=0.0, maxval=2.0 * jnp.pi)
    return weights.astype(jnp.float32), offset


def _reference(x, w, b):
    """Faithful (scale + sqrt + divide) reference of the module's forward."""
    dim = w.shape[1]
    vals = jnp.cos(jnp.dot(x, w, precision=jax.lax.Precision.HIGHEST) + b)
    vals = vals * jnp.sqrt(2.0 / dim)
    norms = jnp.sqrt(jnp.sum(vals * vals, axis=1))
    return vals / norms[None, :]


if __name__ == "__main__":
    # batch == dim is required by the module's (1, batch) broadcast.
    batch, input_dim, dim = 256, 256, 256
    gamma = 1.0 / input_dim        # RBF-style 1/d scaling keeps |x @ W| modest

    key = jax.random.PRNGKey(0)
    k_x, k_p = jax.random.split(key)
    x = jax.random.normal(k_x, (batch, input_dim), dtype=jnp.float32)
    rff_weights, offset = make_orf_params(k_p, input_dim, dim, gamma)

    # 128-tiles at these shapes -> pass-1 grid (2, 2, 2), pass-2 grid (2, 2),
    # exercising the K accumulator and the cross-N sum-of-squares accumulation.
    run = jax.jit(functools.partial(qfeature_map_orf, tm=128, tn=128, tk=128))
    psi = jax.block_until_ready(run(x, rff_weights, offset))

    ref = _reference(x, rff_weights, offset[None, :])
    assert psi.shape == (batch, dim)
    err = float(jnp.max(jnp.abs(psi - ref)))
    assert jnp.allclose(psi, ref, atol=2e-5, rtol=2e-5), f"max abs err {err}"
    print("KERNEL_OK")
</pallas_src>

<mosaic_0001>
module attributes {stable_mosaic.version = 11 : i64} {
  func.func @_vals_kernel(%arg0: i32, %arg1: i32, %arg2: i32, %arg3: memref<128x128xf32, #tpu.memory_space<vmem>>, %arg4: memref<128x128xf32, #tpu.memory_space<vmem>>, %arg5: memref<1x128xf32, #tpu.memory_space<vmem>>, %arg6: memref<128x128xf32, #tpu.memory_space<vmem>>, %arg7: memref<128x1xf32, #tpu.memory_space<vmem>>, %arg8: memref<128x128xf32, #tpu.memory_space<vmem>>) attributes {dimension_semantics = [#tpu.dimension_semantics<parallel>, #tpu.dimension_semantics<arbitrary>, #tpu.dimension_semantics<arbitrary>], iteration_bounds = array<i64: 2, 2, 2>, scalar_prefetch = 0 : i64, scratch_operands = 1 : i64, tpu.core_type = #tpu.core_type<tc>, window_params = [{transform_indices = @transform_0, window_bounds = array<i64: 128, 128>}, {transform_indices = @transform_1, window_bounds = array<i64: 128, 128>}, {transform_indices = @transform_2, window_bounds = array<i64: 1, 128>}, {transform_indices = @transform_3, window_bounds = array<i64: 128, 128>}, {transform_indices = @transform_4, window_bounds = array<i64: 128, 1>}]} {
    %c0_i32 = arith.constant 0 : i32
    %0 = arith.cmpi eq, %arg2, %c0_i32 : i32
    %1 = arith.extui %0 : i1 to i32
    %c0_i32_0 = arith.constant 0 : i32
    %2 = arith.cmpi ne, %1, %c0_i32_0 : i32
    scf.if %2 {
      %cst_9 = arith.constant 0.000000e+00 : f32
      %12 = vector.broadcast %cst_9 : f32 to vector<128x128xf32>
      %c0_10 = arith.constant 0 : index
      %c0_11 = arith.constant 0 : index
      %13 = vector.load %arg8[%c0_10, %c0_11] : memref<128x128xf32, #tpu.memory_space<vmem>>, vector<128x128xf32>
      tpu.vector_store %arg8[%c0_10, %c0_11], %12 {strides = array<i32>} : memref<128x128xf32, #tpu.memory_space<vmem>>, vector<128x128xf32>,
    } else {
    }
    %c0 = arith.constant 0 : index
    %c0_1 = arith.constant 0 : index
    %3 = vector.load %arg8[%c0, %c0_1] : memref<128x128xf32, #tpu.memory_space<vmem>>, vector<128x128xf32>
    %c0_2 = arith.constant 0 : index
    %c0_3 = arith.constant 0 : index
    %4 = vector.load %arg3[%c0_2, %c0_3] : memref<128x128xf32, #tpu.memory_space<vmem>>, vector<128x128xf32>
    %c0_4 = arith.constant 0 : index
    %c0_5 = arith.constant 0 : index
    %5 = vector.load %arg4[%c0_4, %c0_5] : memref<128x128xf32, #tpu.memory_space<vmem>>, vector<128x128xf32>
    %cst = arith.constant dense<0.000000e+00> : vector<128x128xf32>
    %6 = tpu.matmul %4, %5, %cst {dimension_numbers = #tpu.dot_dimension_numbers<[1], [0], [0], [1], [0, 0, 1, 1], [], []>, precision = #tpu.contract_precision<fp32>} : vector<128x128xf32>, vector<128x128xf32>, vector<128x128xf32> -> vector<128x128xf32>
    %7 = arith.addf %3, %6 : vector<128x128xf32>
    %c0_6 = arith.constant 0 : index
    %c0_7 = arith.constant 0 : index
    %8 = vector.load %arg8[%c0_6, %c0_7] : memref<128x128xf32, #tpu.memory_space<vmem>>, vector<128x128xf32>
    tpu.vector_store %arg8[%c0_6, %c0_7], %7 {strides = array<i32>} : memref<128x128xf32, #tpu.memory_space<vmem>>, vector<128x128xf32>,
    %c1_i32 = arith.constant 1 : i32
    %9 = arith.cmpi eq, %arg2, %c1_i32 : i32
    %10 = arith.extui %9 : i1 to i32
    %c0_i32_8 = arith.constant 0 : i32
    %11 = arith.cmpi ne, %10, %c0_i32_8 : i32
    scf.if %11 {
      %c0_9 = arith.constant 0 : index
      %c0_10 = arith.constant 0 : index
      %12 = vector.load %arg8[%c0_9, %c0_10] : memref<128x128xf32, #tpu.memory_space<vmem>>, vector<128x128xf32>
      %c0_11 = arith.constant 0 : index
      %c0_12 = arith.constant 0 : index
      %13 = vector.load %arg5[%c0_11, %c0_12] : memref<1x128xf32, #tpu.memory_space<vmem>>, vector<1x128xf32>
      %14 = vector.broadcast %13 : vector<1x128xf32> to vector<128x128xf32>
      %15 = arith.addf %12, %14 : vector<128x128xf32>
      %16 = math.cos %15 : vector<128x128xf32>
      %c0_13 = arith.constant 0 : index
      %c0_14 = arith.constant 0 : index
      %17 = vector.load %arg6[%c0_13, %c0_14] : memref<128x128xf32, #tpu.memory_space<vmem>>, vector<128x128xf32>
      tpu.vector_store %arg6[%c0_13, %c0_14], %16 {strides = array<i32>} : memref<128x128xf32, #tpu.memory_space<vmem>>, vector<128x128xf32>,
      %18 = arith.mulf %16, %16 : vector<128x128xf32>
      %cst_15 = arith.constant dense<0.000000e+00> : vector<128xf32>
      %19 = vector.multi_reduction <add>, %18, %cst_15 [1] : vector<128x128xf32> to vector<128xf32>
      %20 = vector.shape_cast %19 : vector<128xf32> to vector<128x1xf32>
      %c0_i32_16 = arith.constant 0 : i32
      %21 = arith.cmpi eq, %arg1, %c0_i32_16 : i32
      %22 = arith.extui %21 : i1 to i32
      %c0_i32_17 = arith.constant 0 : i32
      %23 = arith.cmpi ne, %22, %c0_i32_17 : i32
      scf.if %23 {
        %c0_20 = arith.constant 0 : index
        %c0_21 = arith.constant 0 : index
        %27 = vector.load %arg7[%c0_20, %c0_21] : memref<128x1xf32, #tpu.memory_space<vmem>>, vector<128x1xf32>
        tpu.vector_store %arg7[%c0_20, %c0_21], %20 {strides = array<i32>} : memref<128x1xf32, #tpu.memory_space<vmem>>, vector<128x1xf32>,
      } else {
      }
      %c0_i32_18 = arith.constant 0 : i32
      %24 = arith.cmpi sgt, %arg1, %c0_i32_18 : i32
      %25 = arith.extui %24 : i1 to i32
      %c0_i32_19 = arith.constant 0 : i32
      %26 = arith.cmpi ne, %25, %c0_i32_19 : i32
      scf.if %26 {
        %c0_20 = arith.constant 0 : index
        %c0_21 = arith.constant 0 : index
        %27 = vector.load %arg7[%c0_20, %c0_21] : memref<128x1xf32, #tpu.memory_space<vmem>>, vector<128x1xf32>
        %28 = arith.addf %27, %20 : vector<128x1xf32>
        %c0_22 = arith.constant 0 : index
        %c0_23 = arith.constant 0 : index
        %29 = vector.load %arg7[%c0_22, %c0_23] : memref<128x1xf32, #tpu.memory_space<vmem>>, vector<128x1xf32>
        tpu.vector_store %arg7[%c0_22, %c0_23], %28 {strides = array<i32>} : memref<128x1xf32, #tpu.memory_space<vmem>>, vector<128x1xf32>,
      } else {
      }
    } else {
    }
    return
  }
  func.func @transform_0(%arg0: i32, %arg1: i32, %arg2: i32) -> (i32, i32) {
    %c0_i32 = arith.constant 0 : i32
    return %arg0, %arg2 : i32, i32
  }
  func.func @transform_1(%arg0: i32, %arg1: i32, %arg2: i32) -> (i32, i32) {
    %c0_i32 = arith.constant 0 : i32
    return %arg2, %arg1 : i32, i32
  }
  func.func @transform_2(%arg0: i32, %arg1: i32, %arg2: i32) -> (i32, i32) {
    %c0_i32 = arith.constant 0 : i32
    %c0_i32_0 = arith.constant 0 : i32
    return %c0_i32, %arg1 : i32, i32
  }
  func.func @transform_3(%arg0: i32, %arg1: i32, %arg2: i32) -> (i32, i32) {
    %c0_i32 = arith.constant 0 : i32
    return %arg0, %arg1 : i32, i32
  }
  func.func @transform_4(%arg0: i32, %arg1: i32, %arg2: i32) -> (i32, i32) {
    %c0_i32 = arith.constant 0 : i32
    %c0_i32_0 = arith.constant 0 : i32
    return %arg0, %c0_i32 : i32, i32
  }
}

module attributes {stable_mosaic.version = 11 : i64} {
  func.func @_normalize_kernel(%arg0: i32, %arg1: i32, %arg2: memref<128x128xf32, #tpu.memory_space<vmem>>, %arg3: memref<1x128xf32, #tpu.memory_space<vmem>>, %arg4: memref<128x128xf32, #tpu.memory_space<vmem>>) attributes {dimension_semantics = [#tpu.dimension_semantics<parallel>, #tpu.dimension_semantics<parallel>], iteration_bounds = array<i64: 2, 2>, scalar_prefetch = 0 : i64, scratch_operands = 0 : i64, tpu.core_type = #tpu.core_type<tc>, window_params = [{transform_indices = @transform_0, window_bounds = array<i64: 128, 128>}, {transform_indices = @transform_1, window_bounds = array<i64: 1, 128>}, {transform_indices = @transform_2, window_bounds = array<i64: 128, 128>}]} {
    %c0 = arith.constant 0 : index
    %c0_0 = arith.constant 0 : index
    %0 = vector.load %arg2[%c0, %c0_0] : memref<128x128xf32, #tpu.memory_space<vmem>>, vector<128x128xf32>
    %c0_1 = arith.constant 0 : index
    %c0_2 = arith.constant 0 : index
    %1 = vector.load %arg3[%c0_1, %c0_2] : memref<1x128xf32, #tpu.memory_space<vmem>>, vector<1x128xf32>
    %2 = math.rsqrt %1 : vector<1x128xf32>
    %3 = vector.broadcast %2 : vector<1x128xf32> to vector<128x128xf32>
    %4 = arith.mulf %0, %3 : vector<128x128xf32>
    %c0_3 = arith.constant 0 : index
    %c0_4 = arith.constant 0 : index
    %5 = vector.load %arg4[%c0_3, %c0_4] : memref<128x128xf32, #tpu.memory_space<vmem>>, vector<128x128xf32>
    tpu.vector_store %arg4[%c0_3, %c0_4], %4 {strides = array<i32>} : memref<128x128xf32, #tpu.memory_space<vmem>>, vector<128x128xf32>,
    return
  }
  func.func @transform_0(%arg0: i32, %arg1: i32) -> (i32, i32) {
    %c0_i32 = arith.constant 0 : i32
    return %arg0, %arg1 : i32, i32
  }
  func.func @transform_1(%arg0: i32, %arg1: i32) -> (i32, i32) {
    %c0_i32 = arith.constant 0 : i32
    %c0_i32_0 = arith.constant 0 : i32
    return %c0_i32, %arg1 : i32, i32
  }
  func.func @transform_2(%arg0: i32, %arg1: i32) -> (i32, i32) {
    %c0_i32 = arith.constant 0 : i32
    return %arg0, %arg1 : i32, i32
  }
}

</mosaic_0001>

<bundles_post_ra>
// kernel: qfeature_map_orf.3
= control target key start
LH: loop header
LB: loop body
LE: loop exit
PB: predicated region body
PF: predicated region fallthrough
CT: control target
= control target key end

     0   :  { %7 = vsyncpa [#allocation4], 0  ;;  %s839_s0 = inlined_call_operand.vmem [shape: f32[256,256], index: 0, kind: input, shape index: {}]   ;;  %s840_s1 = inlined_call_operand.vmem [shape: f32[1,256], index: 1, kind: input, shape index: {}]   ;;  %s841_s2 = inlined_call_operand.hbm [shape: f32[256,256], index: 2, kind: output, shape index: {}]  }
   0x1   :  { %9 = vsyncpa [#allocation4 + $0x1], 0  ;;  %s644_s9 = smov 0   ;;  %s646_s10 = smov 0  }
   0x2   :  { %s648_s11 = smov 0   ;;  %s650_s12 = smov 0  }
   0x3   :  { %s652_s13 = smov 0   ;;  %s654_s14 = smov 0  }
   0x4   :  { %s656_s15 = smov 0   ;;  %s658_s16 = smov 0  }
   0x5 LB: > { %s436_s17 = sadd.s32 4294967295, %s623_s16   ;;  %s437_s18 = sadd.s32 4294967294, %s623_s16   ;;  %s623_s16 = sphi %s658_s16, %s15_s16   ;;  %s619_s15 = sphi %s656_s15, %s851_s15   ;;  %s615_s14 = sphi %s654_s14, %s850_s14   ;;  %s611_s13 = sphi %s652_s13, %s849_s13   ;;  %s607_s12 = sphi %s650_s12, %s848_s12   ;;  %s603_s11 = sphi %s648_s11, %s847_s11   ;;  %s599_s10 = sphi %s646_s10, %s846_s10   ;;  %s595_s9 = sphi %s644_s9, %s845_s9  }
   0x6   : > { %s24_s19 = sadd.s32 1, %s615_s14  ;;  %s27_s20 = sadd.s32 1, %s619_s15 }
   0x7   : > { %p25_p0 = scmp.ge.s32.totalorder %s24_s19, 2  ;;  %p43_p1 = scmp.ne.s32.totalorder %s603_s11, %s599_s10 }
   0x8   : > { %p44_p2 = scmp.eq.s32.totalorder %s623_s16, 0  ;;  %p101_p5 = scmp.eq.s32.totalorder %s436_s17, 3 }
   0x9   : > { %s853_s19 = smov (%p25_p0, %s24_s19), 0  ;;  %s855_s20 = smov (!%p25_p0, %s27_s20), %s619_s15 }
   0xa   : > { %s32_s21 = ssub.s32 %s615_s14, %s853_s19  ;;  %p696_p3 = por %p44_p2, %p43_p1 }
   0xb   : > { %p29_p4 = scmp.ge.s32.totalorder %s855_s20, 2  ;;  %p106_p6 = scmp.ne.s32.totalorder %s599_s10, %s595_s9 }
   0xc   : > { %p107_p7 = scmp.eq.s32.totalorder %s437_s18, 3  ;;  %p704_p8 = por %p101_p5, %p43_p1 }
   0xd   : > { %s857_s20 = smov (%p29_p4, %s855_s20), 0  ;;  %s36_s27 = sadd.s32 1, %s603_s11 }
   0xe   : > { %p708_p9 = por %p107_p7, %p106_p6  ;;  %s31_s25 = ssub.s32 %s619_s15, %s857_s20 }
   0xf   : > { %s33_s26 = sor.u32 %s32_s21, %s31_s25  ;;  %p439_p11 = scmp.ge.s32.totalorder %s623_s16, 4 }
  0x10   : > { %p34_p10 = scmp.eq.s32.totalorder %s33_s26, 0 }
  0x11   : > { %123 = sbr.rel (%p439_p11) target bundleno = 36 (0x24), region = 16 }
  0x12   : > { %s716_s28 = scalar_select %p34_p10, %s603_s11, %s36_s27  }
  0x16   : > { %126 = sbr.rel (!%p696_p3) target bundleno = 36 (0x24), region = 20  ;;  %s128_s29 = sand.u32 (%p696_p3), 1, %s603_s11  }
  0x17   : > { %s453_s30 = sshll.u32 (%p696_p3), %s619_s15, 5  ;;  %s440_s3 = sshll.u32 (%p696_p3), %s128_s29, 7 }
  0x18   : > { %s133_s4 = sadd.s32 (%p696_p3), %s615_s14, %s453_s30  ;;  %s130_s17 = scalar_lea.vmem (%p696_p3), [#allocation2], %s440_s3 }
  0x19   : > { %s443_s5 = sshll.u32 (%p696_p3), %s133_s4, 3 }
  0x1a   : > { %s727_s8 = scalar_lea.vmem (%p696_p3), %s839_s0, %s443_s5 }
  0x1b   : > { %v194_v0 = vld [vmem:[%s727_s8] sm:$0xff]  ;;  %v196_v1 = vld [vmem:[%s727_s8 + $0x10] sm:$0xff] }
  0x1c   : > { %v198_v2 = vld [vmem:[%s727_s8 + $0x20] sm:$0xff]  ;;  %195 = vst [vmem:[%s130_s17] sm:$0xff] %v194_v0  ;;  %197 = vst [vmem:[%s130_s17 + $0x8] sm:$0xff] %v196_v1  ;;  %v200_v3 = vld [vmem:[%s727_s8 + $0x30] sm:$0xff] }
  0x1d   : > { %199 = vst [vmem:[%s130_s17 + $0x10] sm:$0xff] %v198_v2  ;;  %v202_v4 = vld [vmem:[%s727_s8 + $0x40] sm:$0xff]  ;;  %v204_v5 = vld [vmem:[%s727_s8 + $0x50] sm:$0xff]  ;;  %201 = vst [vmem:[%s130_s17 + $0x18] sm:$0xff] %v200_v3 }
  0x1e   : > { %203 = vst [vmem:[%s130_s17 + $0x20] sm:$0xff] %v202_v4  ;;  %205 = vst [vmem:[%s130_s17 + $0x28] sm:$0xff] %v204_v5  ;;  %v206_v6 = vld [vmem:[%s727_s8 + $0x60] sm:$0xff]  ;;  %v208_v7 = vld [vmem:[%s727_s8 + $0x70] sm:$0xff] }
  0x1f   : > { %v210_v8 = vld [vmem:[%s727_s8 + $0x80] sm:$0xff]  ;;  %207 = vst [vmem:[%s130_s17 + $0x30] sm:$0xff] %v206_v6  ;;  %209 = vst [vmem:[%s130_s17 + $0x38] sm:$0xff] %v208_v7  ;;  %v212_v9 = vld [vmem:[%s727_s8 + $0x90] sm:$0xff] }
  0x20   : > { %211 = vst [vmem:[%s130_s17 + $0x40] sm:$0xff] %v210_v8  ;;  %v214_v10 = vld [vmem:[%s727_s8 + $0xa0] sm:$0xff]  ;;  %v216_v11 = vld [vmem:[%s727_s8 + $0xb0] sm:$0xff]  ;;  %213 = vst [vmem:[%s130_s17 + $0x48] sm:$0xff] %v212_v9 }
  0x21   : > { %215 = vst [vmem:[%s130_s17 + $0x50] sm:$0xff] %v214_v10  ;;  %217 = vst [vmem:[%s130_s17 + $0x58] sm:$0xff] %v216_v11  ;;  %v218_v12 = vld [vmem:[%s727_s8 + $0xc0] sm:$0xff]  ;;  %v220_v13 = vld [vmem:[%s727_s8 + $0xd0] sm:$0xff] }
  0x22   : > { %v222_v14 = vld [vmem:[%s727_s8 + $0xe0] sm:$0xff]  ;;  %219 = vst [vmem:[%s130_s17 + $0x60] sm:$0xff] %v218_v12  ;;  %221 = vst [vmem:[%s130_s17 + $0x68] sm:$0xff] %v220_v13  ;;  %v224_v15 = vld [vmem:[%s727_s8 + $0xf0] sm:$0xff] }
  0x23   : > { %223 = vst [vmem:[%s130_s17 + $0x70] sm:$0xff] %v222_v14  ;;  %225 = vst [vmem:[%s130_s17 + $0x78] sm:$0xff] %v224_v15 }
  0x24 PF: > { %p444_p12 = scmp.ge.s32.totalorder %s623_s16, 1  ;;  %p236_p13 = scmp.lt.s32.totalorder %s623_s16, 5 }
  0x26   : > { %p237_p0 = pnand %p444_p12, %p236_p13 }
  0x27   : > { %p268_p1 = scmp.lt.s32.totalorder (!%p237_p0), %s607_s12, 1  ;;  %s243_s26 = sand.u32 (!%p237_p0), 1, %s599_s10  }
  0x28   : > { %240 = sbr.rel (%p237_p0) target bundleno = 89 (0x59), region = 62  ;;  %s445_s27 = sshll.u32 (!%p237_p0), %s243_s26, 7 }
  0x29   : > { %s454_s29 = sshll.u32 (!%p237_p0), %s611_s13, 5  ;;  %s245_s30 = scalar_lea.vmem (!%p237_p0), [#allocation2], %s445_s27 }
  0x2a   : > { %s757_s3 = sadd.s32 (!%p237_p0), %s607_s12, %s454_s29  ;;  %s759_s4 = scalar_lea.vmem (!%p237_p0), [#allocation3], %s445_s27 }
  0x2b   : > { %s344_s13 = sshll.u32 (!%p237_p0), %s759_s4, 4  ;;  %s788_s8 = scalar_lea.sflag (!%p237_p0), [#allocation4], %s243_s26  ;;  %s763_s13 = int_to_ptr.vmem [resolvable:$true] %s344_s13 }
  0x2c   : > { %s531_s17 = scalar_lea.vmem (!%p237_p0), %s763_s13, 2048 }
  0x2d   : > { %s269_s18 = scalar_select %p268_p1, %s607_s12, 1  ;;  %v291_v17 = vlaneseq  ;;  %v272_v20 = vld [vmem:[%s245_s30] sm:$0xff]  ;;  %v273_v21 = vld [vmem:[%s245_s30 + $0x8] sm:$0xff]  ;;  %v274_v22 = vld [vmem:[%s245_s30 + $0x10] sm:$0xff] }
  0x2e   : > { %v275_v23 = vld [vmem:[%s245_s30 + $0x18] sm:$0xff]  ;;  %v276_v25 = vld [vmem:[%s245_s30 + $0x20] sm:$0xff]  ;;  %v277_v26 = vld [vmem:[%s245_s30 + $0x28] sm:$0xff]  ;;  %s450_s12 = sshll.u32 %s757_s3, 7  ;;  %p532_p2 = scmp.ne.s32.totalorder %s763_s13, %s531_s17 }
  0x2f   : > { %s270_s25 = scalar_lea.vmem %s840_s1, %s269_s18  ;;  %v292_v18 = vshrl.u32 %v291_v17, 7  ;;  %v278_v27 = vld [vmem:[%s245_s30 + $0x30] sm:$0xff]  ;;  %v279_v29 = vld [vmem:[%s245_s30 + $0x38] sm:$0xff]  ;;  %v280_v30 = vld [vmem:[%s245_s30 + $0x40] sm:$0xff]  ;;  %s772_s7 = scalar_lea.hbm %s841_s2, %s450_s12 }
  0x30   : > { %v288_v16 = vld [vmem:[%s270_s25] sm:$0x1]  ;;  %v281_v31 = vld [vmem:[%s245_s30 + $0x48] sm:$0xff]  ;;  %v282_v32 = vld [vmem:[%s245_s30 + $0x50] sm:$0xff]  ;;  %p533_p3 = pnand %p532_p2, %p704_p8  ;;  %s625_s18 = smov [#allocation3]  }
  0x31   : > { %529 = vrsqrt.f32 %v288_v16  ;;  %v293_v19 = vsub.s32 0, %v292_v18  ;;  %v283_v33 = vld [vmem:[%s245_s30 + $0x58] sm:$0xff]  ;;  %v284_v34 = vld [vmem:[%s245_s30 + $0x60] sm:$0xff]  ;;  %v285_v39 = vld [vmem:[%s245_s30 + $0x68] sm:$0xff]  ;;  %s535_s21 = sshll.u32 %s625_s18, 4  ;;  %s536_s21 = int_to_ptr.vmem [resolvable:$false] %s535_s21 }
  0x32   : > { %v286_v40 = vld [vmem:[%s245_s30 + $0x70] sm:$0xff]  ;;  %v287_v41 = vld [vmem:[%s245_s30 + $0x78] sm:$0xff]  ;;  %p534_p4 = pneg %p533_p3  ;;  %s537_s22 = scalar_lea.vmem %s536_s21, 4096 }
  0x33   : > { %p538_p5 = scmp.lt.s32.totalorder %s763_s13, %s536_s21  ;;  %p539_p6 = scmp.lt.s32.totalorder %s537_s22, %s531_s17 }
  0x35   : > { %p540_p7 = por %p539_p6, %p538_p5 }
  0x37   : > { %p541_p10 = pnand %p540_p7, %p534_p4 }
  0x3e   : > { %v530_v24 = vpop.eup %529 }
  0x3f   : > { %v294_v28 = vrot.slane %v530_v24, %v293_v19 }
  0x41   : > { %v296_v35 = vmul.f32 %v294_v28, %v272_v20  ;;  %v297_v36 = vmul.f32 %v294_v28, %v273_v21  ;;  %v298_v37 = vmul.f32 %v294_v28, %v274_v22  ;;  %v299_v38 = vmul.f32 %v294_v28, %v275_v23 }
  0x42   : > { %v300_v42 = vmul.f32 %v294_v28, %v276_v25  ;;  %v301_v43 = vmul.f32 %v294_v28, %v277_v26  ;;  %v302_v44 = vmul.f32 %v294_v28, %v278_v27  ;;  %v303_v45 = vmul.f32 %v294_v28, %v279_v29 }
  0x43   : > { %312 = vst [vmem:[%s759_s4] sm:$0xff] %v296_v35  ;;  %313 = vst [vmem:[%s759_s4 + $0x8] sm:$0xff] %v297_v36  ;;  %v304_v46 = vmul.f32 %v294_v28, %v280_v30  ;;  %v305_v47 = vmul.f32 %v294_v28, %v281_v31  ;;  %v306_v48 = vmul.f32 %v294_v28, %v282_v32 }
  0x44   : > { %314 = vst [vmem:[%s759_s4 + $0x10] sm:$0xff] %v298_v37  ;;  %315 = vst [vmem:[%s759_s4 + $0x18] sm:$0xff] %v299_v38  ;;  %v307_v49 = vmul.f32 %v294_v28, %v283_v33  ;;  %v308_v50 = vmul.f32 %v294_v28, %v284_v34  ;;  %v309_v51 = vmul.f32 %v294_v28, %v285_v39 }
  0x45   : > { %316 = vst [vmem:[%s759_s4 + $0x20] sm:$0xff] %v300_v42  ;;  %317 = vst [vmem:[%s759_s4 + $0x28] sm:$0xff] %v301_v43  ;;  %v310_v52 = vmul.f32 %v294_v28, %v286_v40  ;;  %v311_v53 = vmul.f32 %v294_v28, %v287_v41 }
  0x46   : > { %318 = vst [vmem:[%s759_s4 + $0x30] sm:$0xff] %v302_v44  ;;  %319 = vst [vmem:[%s759_s4 + $0x38] sm:$0xff] %v303_v45 }
  0x47   : > { %320 = vst [vmem:[%s759_s4 + $0x40] sm:$0xff] %v304_v46  ;;  %321 = vst [vmem:[%s759_s4 + $0x48] sm:$0xff] %v305_v47 }
  0x48   : > { %322 = vst [vmem:[%s759_s4 + $0x50] sm:$0xff] %v306_v48  ;;  %323 = vst [vmem:[%s759_s4 + $0x58] sm:$0xff] %v307_v49 }
  0x49   : > { %324 = vst [vmem:[%s759_s4 + $0x60] sm:$0xff] %v308_v50  ;;  %325 = vst [vmem:[%s759_s4 + $0x68] sm:$0xff] %v309_v51 }
  0x4a   : > { %326 = vst [vmem:[%s759_s4 + $0x70] sm:$0xff] %v310_v52  ;;  %327 = vst [vmem:[%s759_s4 + $0x78] sm:$0xff] %v311_v53 }
  0x4b   : > { %544 = shalt.err (!%p541_p10)
}
  0x4c   : > { %s545_s25 = scalar_lea.hbm %s772_s7, 2048  ;;  %s549_s29 = scalar_lea.hbm %s841_s2, 8192 }
  0x4d   : > { %p546_p11 = scmp.ne.s32.totalorder %s772_s7, %s545_s25  ;;  %p550_p0 = scmp.lt.s32.totalorder %s772_s7, %s841_s2 }
  0x4e   : > { %p551_p1 = scmp.lt.s32.totalorder %s549_s29, %s545_s25 }
  0x4f   : > { %p547_p12 = pnand %p546_p11, %p704_p8 }
  0x50   : > { %p552_p2 = por %p551_p1, %p550_p0 }
  0x51   : > { %p548_p13 = pneg %p547_p12 }
  0x53   : > { %p553_p3 = pnand %p552_p2, %p548_p13 }
  0x55   : > { %556 = shalt.err (!%p553_p3)
}
  0x56   : > { %s626_s4 = smov 128   ;;  %s627_s12 = smov 256  }
  0x57   : > { %s628_s5 = smov 8  }
  0x58   : > { %455 = dma.vmem_to_hbm [thread:$0]  (%p704_p8), %s763_s13, 2048, %s772_s7, %s788_s8, %s626_s4, %s627_s12, %s628_s5  }
  0x59 PF: > { %p461_p4 = scmp.ge.s32.totalorder %s623_s16, 2  ;;  %s359_s6 = sand.u32 1, %s595_s9  }
  0x5a   : > { %s360_s17 = scalar_lea.sflag [#allocation4], %s359_s6 }
  0x5b   : > { %p458_p5 = pnand %p461_p4, %p708_p9 }
  0x5d   : > { %p459_p6 = pneg %p458_p5 }
  0x5f   : > { %590 = dma.done.wait (%p459_p6), %s360_s17, 2048  }
  0x60   : > { %592 = vsyncadd (%p459_p6), %s360_s17, 4294965248  ;;  %s15_s16 = sadd.s32 1, %s623_s16   ;;  %s845_s9 = smov %s599_s10 }
  0x61   : > { %p12_p7 = scmp.ge.s32.totalorder %s15_s16, 6   ;;  %s846_s10 = smov %s603_s11 }
  0x62   : > { %s847_s11 = smov %s716_s28  ;;  %s848_s12 = smov %s615_s14 }
  0x63   : > { %s849_s13 = smov %s619_s15  ;;  %s850_s14 = smov %s853_s19 }
  0x64   : > { %s851_s15 = smov %s857_s20  ;;  %14 = sbr.rel (!%p12_p7) target bundleno = 5 (0x5), region = 109 }
  0x69   :  { %365 = vsyncpa [#allocation4], 1 }
  0x6a   :  { %367 = vsyncpa [#allocation4 + $0x1], 1 }

// kernel: qfeature_map_orf.2
= control target key start
LH: loop header
LB: loop body
LE: loop exit
PB: predicated region body
PF: predicated region fallthrough
CT: control target
= control target key end

     0   :  { %s7364_s0 = inlined_call_operand.hbm [shape: f32[256,256], index: 0, kind: input, shape index: {}]   ;;  %s7365_s1 = inlined_call_operand.hbm [shape: f32[256,256], index: 1, kind: input, shape index: {}]   ;;  %s7366_s2 = inlined_call_operand.vmem [shape: f32[1,256], index: 2, kind: input, shape index: {}]   ;;  %s7367_s3 = inlined_call_operand.vmem [shape: f32[256,256], index: 3, kind: output, shape index: {0}]   ;;  %s7368_s4 = inlined_call_operand.vmem [shape: f32[256,1], index: 4, kind: output, shape index: {1}]  }
   0x1   :  { %7418 = sst [smem:[#allocation35_spill]] %s7364_s0 }
   0x2   :  { %7419 = sst [smem:[#allocation36_spill]] %s7366_s2 }
   0x3   :  { %7420 = sst [smem:[#allocation37_spill]] %s7367_s3 }
   0x4   :  { %7421 = sst [smem:[#allocation38_spill]] %s7368_s4 }
   0x5   :  { %10 = vsyncpa [#allocation4], 0 }
   0x6   :  { %12 = vsyncpa [#allocation4 + $0x1], 0 }
   0x7   :  { %13 = vsyncpa [#allocation6], 0 }
   0x8   :  { %15 = vsyncpa [#allocation6 + $0x1], 0  ;;  %s4900_s15 = smov 0   ;;  %s4902_s16 = smov 0  }
   0x9   :  { %s4904_s17 = smov 0   ;;  %s4906_s18 = smov 0  }
   0xa   :  { %s4908_s19 = smov 0   ;;  %s4910_s20 = smov 0  }
   0xb   :  { %s4912_s21 = smov 0   ;;  %s4914_s22 = smov 0  }
   0xc   :  { %s4916_s23 = smov 0   ;;  %s4918_s24 = smov 0  }
   0xd   :  { %s4920_s25 = smov 0   ;;  %s4922_s26 = smov 0  }
   0xe   :  { %s4924_s27 = smov 0   ;;  %s4926_s28 = smov 0  }
   0xf   :  { %s4928_s29 = smov 0  }
  0x10 LB: > { %7422 = sst [smem:[#allocation10_spill]] %s4837_s23  ;;  %s33_s30 = sadd.s32 1, %s4849_s26  ;;  %s4861_s29 = sphi %s4928_s29, %s21_s29   ;;  %s4857_s28 = sphi %s4926_s28, %s7570_s28   ;;  %s4853_s27 = sphi %s4924_s27, %s7583_s27   ;;  %s4849_s26 = sphi %s4922_s26, %s7582_s26   ;;  %s4845_s25 = sphi %s4920_s25, %s7567_s25   ;;  %s4841_s24 = sphi %s4918_s24, %s7581_s24   ;;  %s4837_s23 = sphi %s4916_s23, %s7580_s23   ;;  %s4833_s22 = sphi %s4914_s22, %s7579_s22   ;;  %s4829_s21 = sphi %s4912_s21, %s7578_s21   ;;  %s4825_s20 = sphi %s4910_s20, %s7577_s20   ;;  %s4821_s19 = sphi %s4908_s19, %s7576_s19   ;;  %s4817_s18 = sphi %s4906_s18, %s7575_s18   ;;  %s4813_s17 = sphi %s4904_s17, %s7574_s17   ;;  %s4809_s16 = sphi %s4902_s16, %s7573_s16   ;;  %s4805_s15 = sphi %s4900_s15, %s7572_s15  }
  0x11   : > { %7423 = sst [smem:[#allocation11_spill]] %s4845_s25  ;;  %s7369_s5 = sadd.s32 4294967295, %s4861_s29  }
  0x12   : > { %7424 = sst [smem:[#allocation12_spill]] %s4857_s28  ;;  %p4975_p0 = scmp.ge.s32.totalorder %s33_s30, 2 }
  0x13   : > { %p56_p1 = scmp.ne.s32.totalorder %s4833_s22, %s4829_s21  ;;  %p7371_p2 = scmp.eq.s32.totalorder %s4861_s29, 0 }
  0x14   : > { %s7585_s30 = smov (%p4975_p0, %s33_s30), 0  ;;  %p62_p3 = scmp.ne.s32.totalorder %s4829_s21, %s4825_s20 }
  0x15   : > { %7426 = sst [smem:[#allocation13_spill]] %s7585_s30  ;;  %p4991_p4 = scmp.eq.s32.totalorder %s7369_s5, 0 }
  0x16   : > { %s4997_s10 = ssub.s32 %s4849_s26, %s7585_s30  ;;  %p58_p5 = por %p7371_p2, %p56_p1 }
  0x17   : > { %p5003_p6 = por %p4991_p4, %p62_p3  ;;  %p4482_p7 = scmp.lt.s32.totalorder %s4861_s29, 8 }
  0x18   : > { %s194_s12 = sand.u32 1, %s4833_s22   ;;  %s3876_s14 = sshll.u32 %s4857_s28, 5 }
  0x19   : > { %s3787_s13 = sshll.u32 %s194_s12, 7  ;;  %s204_s20 = sadd.s32 %s4849_s26, %s3876_s14 }
  0x1a   : > { %s198_s8 = scalar_lea.vmem [#allocation3], %s3787_s13  ;;  %s3790_s5 = sshll.u32 %s204_s20, 7 }
  0x1b   : > { %s207_s7 = sshll.u32 %s198_s8, 4  ;;  %s7429_s0 = sld [smem:[#allocation35_spill]]  ;;  %s208_s7 = int_to_ptr.vmem [resolvable:$true] %s207_s7 }
  0x1c   : > { %p5016_p8 = pnand %p4482_p7, %p58_p5  ;;  %s195_s2 = scalar_lea.sflag [#allocation4], %s194_s12 }
  0x1d   : > { %s4692_s25 = scalar_lea.vmem %s208_s7, 2048  ;;  %s4863_s8 = smov [#allocation3]  }
  0x1e   : > { %p4681_p9 = pneg %p5016_p8  ;;  %p4693_p10 = scmp.ne.s32.totalorder %s208_s7, %s4692_s25 }
  0x1f   : > { %s4697_s13 = sshll.u32 %s4863_s8, 4  ;;  %s4698_s13 = int_to_ptr.vmem [resolvable:$false] %s4697_s13 }
  0x20   : > { %p4695_p11 = pnand %p4693_p10, %p4681_p9  ;;  %s4699_s14 = scalar_lea.vmem %s4698_s13, 4096 }
  0x21   : > { %s206_s30 = scalar_lea.hbm %s7429_s0, %s3790_s5  ;;  %p4700_p13 = scmp.lt.s32.totalorder %s208_s7, %s4698_s13 }
  0x22   : > { %p4696_p12 = pneg %p4695_p11  ;;  %p4701_p1 = scmp.lt.s32.totalorder %s4699_s14, %s4692_s25 }
  0x24   : > { %p4702_p3 = por %p4701_p1, %p4700_p13 }
  0x26   : > { %p4703_p2 = pnand %p4702_p3, %p4696_p12 }
  0x28   : > { %4706 = shalt.err (!%p4703_p2)
}
  0x29   : > { %s7372_s3 = smov 256   ;;  %s7373_s23 = smov 128  }
  0x2a   : > { %s7374_s25 = smov 8   ;;  %p3795_p2 = scmp.ge.s32.totalorder %s4861_s29, 1 }
  0x2b   : > { %4478 = dma.hbm_to_vmem [thread:$0]  (!%p5016_p8), %s206_s30, 2048, %s208_s7, %s195_s2, %s7372_s3, %s7373_s23, %s7374_s25  }
  0x2c   : > { %p244_p5 = scmp.lt.s32.totalorder %s4861_s29, 9  ;;  %s7431_s5 = sadd.s32 4294967295, %s4861_s29  }
  0x2d   : > { %p5031_p9 = scmp.eq.s32.totalorder %s7431_s5, 7  ;;  %s36_s4 = sadd.s32 1, %s4853_s27 }
  0x2e   : > { %p5035_p10 = pnand %p3795_p2, %p244_p5  ;;  %s7587_s4 = smov (!%p4975_p0, %s36_s4), %s4853_s27 }
  0x2f   : > { %s77_s2 = sadd.s32 1, %s4821_s19  ;;  %p38_p8 = scmp.ge.s32.totalorder %s7587_s4, 2 }
  0x30   : > { %p90_p11 = scmp.ne.s32.totalorder %s4817_s18, %s4813_s17  ;;  %p84_p12 = scmp.ne.s32.totalorder %s4821_s19, %s4817_s18 }
  0x31   : > { %s131_s30 = sadd.s32 1, %s4809_s16  ;;  %s7589_s4 = smov (%p38_p8, %s7587_s4), 0 }
  0x32   : > { %7434 = sst [smem:[#allocation14_spill]] %s7589_s4  ;;  %s7435_s7 = sadd.s32 1, %s4857_s28 }
  0x33   : > { %s7591_s7 = smov (!%p38_p8, %s7435_s7), %s4857_s28  ;;  %s73_s8 = ssub.s32 %s4853_s27, %s7589_s4 }
  0x34   : > { %p5058_p0 = por %p90_p11, %p4991_p4  ;;  %p42_p13 = scmp.ge.s32.totalorder %s7591_s7, 2 }
  0x35   : > { %s74_s17 = sor.u32 %s73_s8, %s4997_s10  ;;  %p141_p3 = scmp.ne.s32.totalorder %s4809_s16, %s4805_s15 }
  0x36   : > { %p75_p1 = scmp.eq.s32.totalorder %s74_s17, 0  ;;  %s7593_s7 = smov (%p42_p13, %s7591_s7), 0 }
  0x37   : > { %7437 = sst [smem:[#allocation15_spill]] %s7593_s7  ;;  %s44_s9 = ssub.s32 %s4857_s28, %s7593_s7 }
  0x38   : > { %s5068_s13 = scalar_select %p75_p1, %s4821_s19, %s77_s2  }
  0x39   : > { %p5074_p4 = por %p5031_p9, %p141_p3  ;;  %s46_s5 = sor.u32 %s4997_s10, %s44_s9 }
  0x3a   : > { %7438 = sst [smem:[#allocation16_spill]] %s5068_s13  ;;  %s128_s3 = sor.u32 %s73_s8, %s44_s9 }
  0x3b   : > { %s7439_s14 = scalar_select %p5074_p4, 1, 0 }
  0x3c   : > { %p47_p2 = scmp.eq.s32.totalorder %s46_s5, 0  ;;  %p129_p5 = scmp.eq.s32.totalorder %s128_s3, 0 }
  0x3d   : > { %7440 = sst [smem:[#allocation17_spill]] %s7439_s14  ;;  %s217_s23 = sand.u32 1, %s4821_s19  }
  0x3e   : > { %s3877_s17 = sshll.u32 %s4849_s26, 5  ;;  %s7441_s25 = sadd.s32 1, %s4833_s22 }
  0x3f   : > { %s5084_s0 = scalar_select %p47_p2, %s4833_s22, %s7441_s25  }
  0x40   : > { %s5087_s4 = scalar_select %p129_p5, %s4809_s16, %s131_s30  }
  0x41   : > { %p7442_p8 = scmp.eq.s32.totalorder %s4861_s29, 0  ;;  %s3791_s12 = sshll.u32 %s217_s23, 7 }
  0x42   : > { %s227_s2 = sadd.s32 %s4853_s27, %s3877_s17  ;;  %s221_s28 = scalar_lea.vmem [#allocation5], %s3791_s12 }
  0x43   : > { %p86_p11 = por %p84_p12, %p7442_p8  ;;  %s3794_s7 = sshll.u32 %s227_s2, 7 }
  0x44   : > { %s230_s13 = sshll.u32 %s221_s28, 4  ;;  %s229_s8 = scalar_lea.hbm %s7365_s1, %s3794_s7  ;;  %s231_s13 = int_to_ptr.vmem [resolvable:$true] %s230_s13 }
  0x45   : > { %p5100_p9 = pnand %p4482_p7, %p86_p11  ;;  %s218_s25 = scalar_lea.sflag [#allocation6], %s217_s23 }
  0x46   : > { %s4720_s30 = scalar_lea.vmem %s231_s13, 2048  ;;  %s4867_s9 = smov [#allocation5]  }
  0x47   : > { %p4709_p13 = pneg %p5100_p9  ;;  %p4721_p12 = scmp.ne.s32.totalorder %s231_s13, %s4720_s30 }
  0x48   : > { %s4725_s28 = sshll.u32 %s4867_s9, 4  ;;  %s4726_s28 = int_to_ptr.vmem [resolvable:$false] %s4725_s28 }
  0x49   : > { %p4723_p1 = pnand %p4721_p12, %p4709_p13  ;;  %s4727_s5 = scalar_lea.vmem %s4726_s28, 4096 }
  0x4a   : > { %p4728_p2 = scmp.lt.s32.totalorder %s231_s13, %s4726_s28  ;;  %p4729_p5 = scmp.lt.s32.totalorder %s4727_s5, %s4720_s30 }
  0x4b   : > { %p4724_p3 = pneg %p4723_p1 }
  0x4c   : > { %p4730_p8 = por %p4729_p5, %p4728_p2 }
  0x4e   : > { %p4731_p4 = pnand %p4730_p8, %p4724_p3 }
  0x50   : > { %4734 = shalt.err (!%p4731_p4)
}
  0x51   : > { %s7444_s7 = smov 8   ;;  %s7445_s14 = smov 128  }
  0x52   : > { %s7446_s23 = smov 256   ;;  %248 = sbr.rel (%p5035_p10) target bundleno = 1119 (0x45f), region = 32 }
  0x53   : > { %4481 = dma.hbm_to_vmem [thread:$0]  (!%p5100_p9), %s229_s8, 2048, %s231_s13, %s218_s25, %s7446_s23, %s7445_s14, %s7444_s7  }
  0x57   : > { %s250_s17 = sand.u32 1, %s4829_s21  }
  0x58   : > { %s3796_s12 = sshll.u32 %s250_s17, 7  ;;  %s251_s2 = scalar_lea.sflag [#allocation4], %s250_s17 }
  0x59   : > { %s5114_s10 = scalar_lea.vmem [#allocation3], %s3796_s12 }
  0x5a   : > { %4796 = dma.done.wait (%p5003_p6), %s251_s2, 2048  }
  0x5b   : > { %4798 = vsyncadd (%p5003_p6), %s251_s2, 4294965248  ;;  %s259_s3 = sand.u32 1, %s4817_s18  }
  0x5c   : > { %s3797_s30 = sshll.u32 %s259_s3, 7  ;;  %s260_s13 = scalar_lea.sflag [#allocation6], %s259_s3 }
  0x5d   : > { %s5121_s8 = scalar_lea.vmem [#allocation5], %s3797_s30 }
  0x5e   : > { %4800 = dma.done.wait (%p5058_p0), %s260_s13, 2048  }
  0x5f   : > { %4802 = vsyncadd (%p5058_p0), %s260_s13, 4294965248  ;;  %s7447_s20 = sld [smem:[#allocation11_spill]]  ;;  %s290_s25 = sand.u32 1, %s4805_s15  }
  0x60   : > { %p302_p7 = scmp.lt.s32.totalorder %s4841_s24, 1  ;;  %s3798_s11 = sshll.u32 %s290_s25, 7 }
  0x61   : > { %s7448_s14 = sld [smem:[#allocation36_spill]]  ;;  %s5141_s30 = scalar_lea.vmem [#allocation7], %s3798_s11 }
  0x62   : > { %s303_s28 = scalar_select %p302_p7, %s4841_s24, 1 }
  0x63   : > { %s7449_s2 = sld [smem:[#allocation38_spill]] }
  0x64   : > { %s7450_s15 = sld [smem:[#allocation10_spill]] }
  0x65   : > { %s3799_s9 = sshll.u32 %s7447_s20, 4 }
  0x66   : > { %p307_p6 = scmp.lt.s32.totalorder %s3799_s9, 31 }
  0x67   : > { %s5134_s23 = scalar_lea.vmem %s7448_s14, %s303_s28 }
  0x68   : > { %s7595_s9 = smov (!%p307_p6, %s3799_s9), 31 }
  0x69   : > { %s3800_s17 = sshll.u32 %s7595_s9, 3 }
  0x6a   : > { %s5139_s3 = scalar_lea.vmem %s7449_s2, %s3800_s17  ;;  %p3801_p10 = scmp.ne.s32.totalorder %s7450_s15, 0 }
  0x6c   : > { %315 = sbr.rel (%p3801_p10) target bundleno = 122 (0x7a), region = 44 }
  0x71   : > { %v4868_v0 = vmov 0.0  }
  0x72   : > { %316 = vst [vmem:[#allocation2 + $0x30] sm:$0xff] %v4868_v0  ;;  %317 = vst [vmem:[#allocation2] sm:$0xff] %v4868_v0 }
  0x73   : > { %318 = vst [vmem:[#allocation2 + $0x58] sm:$0xff] %v4868_v0  ;;  %319 = vst [vmem:[#allocation2 + $0x18] sm:$0xff] %v4868_v0 }
  0x74   : > { %320 = vst [vmem:[#allocation2 + $0x50] sm:$0xff] %v4868_v0  ;;  %321 = vst [vmem:[#allocation2 + $0x68] sm:$0xff] %v4868_v0 }
  0x75   : > { %322 = vst [vmem:[#allocation2 + $0x8] sm:$0xff] %v4868_v0  ;;  %323 = vst [vmem:[#allocation2 + $0x48] sm:$0xff] %v4868_v0 }
  0x76   : > { %324 = vst [vmem:[#allocation2 + $0x40] sm:$0xff] %v4868_v0  ;;  %325 = vst [vmem:[#allocation2 + $0x20] sm:$0xff] %v4868_v0 }
  0x77   : > { %326 = vst [vmem:[#allocation2 + $0x10] sm:$0xff] %v4868_v0  ;;  %327 = vst [vmem:[#allocation2 + $0x38] sm:$0xff] %v4868_v0 }
  0x78   : > { %328 = vst [vmem:[#allocation2 + $0x60] sm:$0xff] %v4868_v0  ;;  %329 = vst [vmem:[#allocation2 + $0x70] sm:$0xff] %v4868_v0 }
  0x79   : > { %330 = vst [vmem:[#allocation2 + $0x78] sm:$0xff] %v4868_v0  ;;  %331 = vst [vmem:[#allocation2 + $0x28] sm:$0xff] %v4868_v0 }
  0x7a PF: > { %v379_v1 = vld [vmem:[%s5121_s8 + $0x78] sm:$0xff]  ;;  %v378_v2 = vld [vmem:[%s5121_s8 + $0x70] sm:$0xff]  ;;  %v377_v3 = vld [vmem:[%s5121_s8 + $0x68] sm:$0xff] }
  0x7b   : > { %v5147_v4 = vand.u32 4294901760, %v379_v1  ;;  %v5149_v5 = vand.u32 4294901760, %v378_v2  ;;  %v5151_v6 = vand.u32 4294901760, %v377_v3  ;;  %v376_v7 = vld [vmem:[%s5121_s8 + $0x60] sm:$0xff]  ;;  %v375_v8 = vld [vmem:[%s5121_s8 + $0x58] sm:$0xff]  ;;  %v374_v9 = vld [vmem:[%s5121_s8 + $0x50] sm:$0xff] }
  0x7c   : > { %v5156_v10 = vand.u32 4294901760, %v376_v7  ;;  %v5158_v11 = vand.u32 4294901760, %v375_v8  ;;  %v5160_v12 = vand.u32 4294901760, %v374_v9  ;;  %v373_v13 = vld [vmem:[%s5121_s8 + $0x48] sm:$0xff]  ;;  %v372_v14 = vld [vmem:[%s5121_s8 + $0x40] sm:$0xff]  ;;  %v371_v19 = vld [vmem:[%s5121_s8 + $0x38] sm:$0xff] }
  0x7d   : > { %4071 = vmatprep.subr.mxu0 %v5147_v4  ;;  %v5166_v15 = vsub.f32 %v379_v1, %v5147_v4  ;;  %v5169_v16 = vsub.f32 %v378_v2, %v5149_v5  ;;  %v5171_v17 = vand.u32 4294901760, %v373_v13  ;;  %v5174_v18 = vsub.f32 %v377_v3, %v5151_v6  ;;  %v370_v26 = vld [vmem:[%s5121_s8 + $0x30] sm:$0xff]  ;;  %v369_v36 = vld [vmem:[%s5121_s8 + $0x28] sm:$0xff]  ;;  %v368_v41 = vld [vmem:[%s5121_s8 + $0x20] sm:$0xff] }
  0x7e   : > { %4072 = vmatpush3.msra.mxu0 %v5147_v4  ;;  %v5179_v20 = vsub.f32 %v376_v7, %v5156_v10  ;;  %v5182_v21 = vsub.f32 %v375_v8, %v5158_v11  ;;  %v5194_v25 = vand.u32 4294901760, %v372_v14  ;;  %v5201_v28 = vand.u32 4294901760, %v371_v19  ;;  %v348_v48 = vld [vmem:[%s5114_s10] sm:$0xff]  ;;  %v349_v50 = vld [vmem:[%s5114_s10 + $0x8] sm:$0xff]  ;;  %v367_v54 = vld [vmem:[%s5121_s8 + $0x18] sm:$0xff] }
  0x7f   : > { %4073 = vmatprep.subr.mxu0 %v5149_v5  ;;  %v5186_v22 = vand.u32 4294901760, %v5166_v15  ;;  %v5189_v23 = vand.u32 4294901760, %v5169_v16  ;;  %v5192_v24 = vand.u32 4294901760, %v5174_v18  ;;  %v5207_v30 = vsub.f32 %v374_v9, %v5160_v12  ;;  %v366_v60 = vld [vmem:[%s5121_s8 + $0x10] sm:$0xff]  ;;  %v365_v7 = vld [vmem:[%s5121_s8 + $0x8] sm:$0xff] }
  0x80   : > { %4074 = vmatpush3.msra.mxu0 %v5149_v5  ;;  %v5199_v27 = vand.u32 4294901760, %v5179_v20  ;;  %v5204_v29 = vand.u32 4294901760, %v5182_v21  ;;  %v5217_v34 = vsub.f32 %v373_v13, %v5171_v17  ;;  %v5220_v35 = vand.u32 4294901760, %v370_v26  ;;  %v350_v0 = vld [vmem:[%s5114_s10 + $0x10] sm:$0xff] }
  0x81   : > { %7451 = vst [vmem:[#allocation18_spill] sm:$0xff] %v5189_v23  ;;  %7452 = vst [vmem:[#allocation19_spill] sm:$0xff] %v5192_v24  ;;  %4075 = vmatprep.subr.mxu0 %v5151_v6  ;;  %v625_v31 = vsub.f32 %v5166_v15, %v5186_v22  ;;  %v632_v32 = vsub.f32 %v5169_v16, %v5189_v23  ;;  %v639_v33 = vsub.f32 %v5174_v18, %v5192_v24  ;;  %v357_v23 = vld [vmem:[%s5114_s10 + $0x48] sm:$0xff] }
  0x82   : > { %7453 = vst [vmem:[#allocation20_spill] sm:$0xff] %v5199_v27  ;;  %7454 = vst [vmem:[#allocation21_spill] sm:$0xff] %v5204_v29  ;;  %4076 = vmatpush3.msra.mxu0 %v5151_v6  ;;  %v646_v39 = vsub.f32 %v5179_v20, %v5199_v27  ;;  %v5227_v40 = vand.u32 4294901760, %v5207_v30  ;;  %v5232_v42 = vand.u32 4294901760, %v5217_v34  ;;  %v5235_v43 = vsub.f32 %v372_v14, %v5194_v25 }
  0x83   : > { %4077 = vmatprep.subr.mxu0 %v5156_v10  ;;  %v626_v37 = vand.u32 4294901760, %v625_v31  ;;  %v633_v38 = vand.u32 4294901760, %v632_v32  ;;  %v640_v44 = vand.u32 4294901760, %v639_v33  ;;  %v653_v45 = vsub.f32 %v5182_v21, %v5204_v29  ;;  %v364_v32 = vld [vmem:[%s5121_s8] sm:$0xff] }
  0x84   : > { %7455 = vst [vmem:[#allocation22_spill] sm:$0xff] %v5227_v40  ;;  %4078 = vmatpush3.msra.mxu0 %v5156_v10  ;;  %7456 = vst [vmem:[#allocation23_spill] sm:$0xff] %v5232_v42  ;;  %v5240_v46 = vand.u32 4294901760, %v369_v36  ;;  %v5243_v47 = vsub.f32 %v371_v19, %v5201_v28  ;;  %v5247_v49 = vand.u32 4294901760, %v368_v41  ;;  %v647_v51 = vand.u32 4294901760, %v646_v39  ;;  %v351_v19 = vld [vmem:[%s5114_s10 + $0x18] sm:$0xff] }
  0x85   : > { %4079 = vmatprep.subr.mxu0 %v5158_v11  ;;  %4127 = vmatprep.subr.mxu1 %v626_v37  ;;  %v660_v52 = vsub.f32 %v5207_v30, %v5227_v40  ;;  %v5254_v53 = vand.u32 4294901760, %v5235_v43  ;;  %v5258_v55 = vsub.f32 %v370_v26, %v5220_v35  ;;  %v667_v56 = vsub.f32 %v5217_v34, %v5232_v42 }
  0x86   : > { %4080 = vmatpush3.msra.mxu0 %v5158_v11  ;;  %4128 = vmatpush3.msra.mxu1 %v626_v37  ;;  %v5263_v57 = vand.u32 4294901760, %v348_v48  ;;  %v654_v58 = vand.u32 4294901760, %v653_v45  ;;  %v5267_v59 = vand.u32 4294901760, %v5243_v47  ;;  %v5271_v61 = vsub.f32 %v369_v36, %v5240_v46 }
  0x87   : > { %4081 = vmatprep.subr.mxu0 %v5160_v12  ;;  %4129 = vmatprep.subr.mxu1 %v633_v38  ;;  %7457 = vst [vmem:[#allocation24_spill] sm:$0xff] %v5254_v53  ;;  %v5273_v62 = vand.u32 4294901760, %v349_v50  ;;  %v5276_v63 = vand.u32 4294901760, %v367_v54  ;;  %v661_v1 = vand.u32 4294901760, %v660_v52  ;;  %v674_v2 = vsub.f32 %v5235_v43, %v5254_v53 }
  0x88   : > { %4082 = vmatpush3.msra.mxu0 %v5160_v12  ;;  %4130 = vmatpush3.msra.mxu1 %v633_v38  ;;  %7458 = vst [vmem:[#allocation25_spill] sm:$0xff] %v5267_v59  ;;  %v5283_v3 = vand.u32 4294901760, %v5258_v55  ;;  %v5287_v8 = vsub.f32 %v368_v41, %v5247_v49  ;;  %v668_v9 = vand.u32 4294901760, %v667_v56  ;;  %v5290_v13 = vand.u32 4294901760, %v366_v60 }
  0x89   : > { %4083 = vmatprep.subr.mxu0 %v5171_v17  ;;  %4131 = vmatprep.subr.mxu1 %v640_v44  ;;  %v5293_v14 = vsub.f32 %v348_v48, %v5263_v57  ;;  %v681_v26 = vsub.f32 %v5243_v47, %v5267_v59  ;;  %v5300_v31 = vand.u32 4294901760, %v5271_v61  ;;  %v5304_v33 = vsub.f32 %v349_v50, %v5273_v62  ;;  %v352_v48 = vld [vmem:[%s5114_s10 + $0x20] sm:$0xff] }
  0x8a   : > { %4084 = vmatpush3.msra.mxu0 %v5171_v17  ;;  %4132 = vmatpush3.msra.mxu1 %v640_v44  ;;  %7459 = vst [vmem:[#allocation26_spill] sm:$0xff] %v5283_v3  ;;  %v5306_v36 = vand.u32 4294901760, %v350_v0  ;;  %v5309_v37 = vand.u32 4294901760, %v365_v7  ;;  %v5312_v38 = vsub.f32 %v367_v54, %v5276_v63  ;;  %v675_v39 = vand.u32 4294901760, %v674_v2 }
  0x8b   : > { %4085 = vmatprep.subr.mxu0 %v5194_v25  ;;  %4133 = vmatprep.subr.mxu1 %v647_v51  ;;  %7460 = vst [vmem:[#allocation27_spill] sm:$0xff] %v5300_v31  ;;  %v688_v41 = vsub.f32 %v5258_v55, %v5283_v3  ;;  %v5318_v44 = vand.u32 4294901760, %v5287_v8  ;;  %v5320_v45 = vand.u32 4294901760, %v351_v19  ;;  %v5324_v50 = vand.u32 4294901760, %v364_v32 }
  0x8c   : > { %4086 = vmatpush3.msra.mxu0 %v5194_v25  ;;  %4134 = vmatpush3.msra.mxu1 %v647_v51  ;;  %7461 = vst [vmem:[#allocation28_spill] sm:$0xff] %v5309_v37  ;;  %v5328_v52 = vsub.f32 %v366_v60, %v5290_v13  ;;  %v682_v54 = vand.u32 4294901760, %v681_v26  ;;  %v695_v56 = vsub.f32 %v5271_v61, %v5300_v31  ;;  %v5340_v51 = vand.u32 4294901760, %v5312_v38 }
  0x8d   : > { %4087 = vmatprep.subr.mxu0 %v5201_v28  ;;  %4135 = vmatprep.subr.mxu1 %v654_v58  ;;  %7462 = vst [vmem:[#allocation29_spill] sm:$0xff] %v5318_v44  ;;  %v5335_v2 = vsub.f32 %v350_v0, %v5306_v36  ;;  %v5343_v60 = vsub.f32 %v365_v7, %v5309_v37  ;;  %v5345_v3 = vand.u32 4294901760, %v352_v48  ;;  %v689_v26 = vand.u32 4294901760, %v688_v41 }
  0x8e   : > { %4088 = vmatpush3.msra.mxu0 %v5201_v28  ;;  %4136 = vmatpush3.msra.mxu1 %v654_v58  ;;  %7464 = vst [vmem:[#allocation31_spill] sm:$0xff] %v5340_v51  ;;  %v702_v0 = vsub.f32 %v5287_v8, %v5318_v44  ;;  %v5351_v58 = vsub.f32 %v351_v19, %v5320_v45  ;;  %v5358_v31 = vand.u32 4294901760, %v5328_v52  ;;  %v696_v41 = vand.u32 4294901760, %v695_v56 }
  0x8f   : > { %4089 = vmatprep.subr.mxu0 %v5220_v35  ;;  %4137 = vmatprep.subr.mxu1 %v661_v1  ;;  %7463 = vst [vmem:[#allocation30_spill] sm:$0xff] %v5335_v2  ;;  %v7467_v19 = vand.u32 4294901760, %v5304_v33  ;;  %v5368_v53 = vsub.f32 %v364_v32, %v5324_v50  ;;  %v709_v42 = vsub.f32 %v5312_v38, %v5340_v51  ;;  %v5375_v40 = vand.u32 4294901760, %v5343_v60 }
  0x90   : > { %4090 = vmatpush3.msra.mxu0 %v5220_v35  ;;  %4138 = vmatpush3.msra.mxu1 %v661_v1  ;;  %v353_v1 = vld [vmem:[%s5114_s10 + $0x28] sm:$0xff]  ;;  %7466 = vst [vmem:[#allocation32_spill] sm:$0xff] %v5358_v31  ;;  %v5378_v56 = vsub.f32 %v352_v48, %v5345_v3  ;;  %v716_v51 = vsub.f32 %v5328_v52, %v5358_v31  ;;  %v7469_v32 = vand.u32 4294901760, %v5335_v2 }
  0x91   : > { %4091 = vmatprep.subr.mxu0 %v5240_v46  ;;  %4139 = vmatprep.subr.mxu1 %v668_v9  ;;  %v5360_v59 = vand.u32 4294901760, %v353_v1  ;;  %v474_v44 = vsub.f32 %v5304_v33, %v7467_v19  ;;  %7468 = vst [vmem:[#allocation33_spill] sm:$0xff] %v5375_v40  ;;  %v703_v19 = vand.u32 4294901760, %v702_v0 }
  0x92   : > { %4092 = vmatpush3.msra.mxu0 %v5240_v46  ;;  %4140 = vmatpush3.msra.mxu1 %v668_v9  ;;  %v7465_v9 = vand.u32 4294901760, %v5293_v14  ;;  %v484_v27 = vsub.f32 %v5335_v2, %v7469_v32  ;;  %v356_v2 = vld [vmem:[%s5114_s10 + $0x40] sm:$0xff] }
  0x93   : > { %4093 = vmatprep.subr.mxu0 %v5247_v49  ;;  %4141 = vmatprep.subr.mxu1 %v675_v39  ;;  %v5387_v29 = vsub.f32 %v353_v1, %v5360_v59  ;;  %v475_v0 = vand.u32 4294901760, %v474_v44  ;;  %v723_v1 = vsub.f32 %v5343_v60, %v5375_v40  ;;  %v7471_v44 = vand.u32 4294901760, %v5351_v58 }
  0x94   : > { %4094 = vmatpush3.msra.mxu0 %v5247_v49  ;;  %4142 = vmatpush3.msra.mxu1 %v675_v39  ;;  %v464_v7 = vsub.f32 %v5293_v14, %v7465_v9  ;;  %v354_v9 = vld [vmem:[%s5114_s10 + $0x30] sm:$0xff]  ;;  %v355_v39 = vld [vmem:[%s5114_s10 + $0x38] sm:$0xff]  ;;  %v485_v31 = vand.u32 4294901760, %v484_v27 }
  0x95   : > { %4095 = vmatprep.subr.mxu0 %v5276_v63  ;;  %4143 = vmatprep.subr.mxu1 %v682_v54  ;;  %v5389_v48 = vand.u32 4294901760, %v354_v9  ;;  %v5402_v24 = vand.u32 4294901760, %v355_v39  ;;  %v494_v32 = vsub.f32 %v5351_v58, %v7471_v44  ;;  %v724_v44 = vand.u32 4294901760, %v723_v1 }
  0x96   : > { %4096 = vmatpush3.msra.mxu0 %v5276_v63  ;;  %4144 = vmatpush3.msra.mxu1 %v682_v54  ;;  %v465_v54 = vand.u32 4294901760, %v464_v7  ;;  %v710_v7 = vand.u32 4294901760, %v709_v42  ;;  %v717_v42 = vand.u32 4294901760, %v716_v51 }
  0x97   : > { %4097 = vmatprep.subr.mxu0 %v5290_v13  ;;  %4145 = vmatprep.subr.mxu1 %v689_v26  ;;  %v5412_v40 = vsub.f32 %v354_v9, %v5389_v48  ;;  %v5424_v9 = vand.u32 4294901760, %v356_v2  ;;  %v495_v27 = vand.u32 4294901760, %v494_v32 }
  0x98   : > { %4098 = vmatpush3.msra.mxu0 %v5290_v13  ;;  %4146 = vmatpush3.msra.mxu1 %v689_v26  ;;  %v5396_v26 = vand.u32 4294901760, %v5368_v53 }
  0x99   : > { %4099 = vmatprep.subr.mxu0 %v5309_v37  ;;  %4147 = vmatprep.subr.mxu1 %v696_v41  ;;  %v7416_v1 = vand.u32 4294901760, %v5412_v40  ;;  %v5438_v32 = vsub.f32 %v356_v2, %v5424_v9 }
  0x9a   : > { %7470 = vst [vmem:[#allocation34_spill] sm:$0xff] %v5396_v26  ;;  %4100 = vmatpush3.msra.mxu0 %v5309_v37  ;;  %4148 = vmatpush3.msra.mxu1 %v696_v41  ;;  %v730_v37 = vsub.f32 %v5368_v53, %v5396_v26  ;;  %v5422_v41 = vsub.f32 %v355_v39, %v5402_v24  ;;  %v358_v26 = vld [vmem:[%s5114_s10 + $0x50] sm:$0xff] }
  0x9b   : > { %4101 = vmatprep.subr.mxu0 %v5324_v50  ;;  %4149 = vmatprep.subr.mxu1 %v703_v19  ;;  %v7413_v2 = vand.u32 4294901760, %v5438_v32 }
  0x9c   : > { %4102 = vmatpush3.msra.mxu0 %v5324_v50  ;;  %4103 = vmatprep.mubr.f32.mxu0 %v465_v54  ;;  %v7472_v54 = vand.u32 4294901760, %v5378_v56  ;;  %v731_v39 = vand.u32 4294901760, %v730_v37 }
  0x9d   : > { %4150 = vmatpush3.msra.mxu1 %v703_v19  ;;  %4104 = vmatmul.mubr.f32.vlgmr.msra.gmra.mxu0 %v475_v0  ;;  %v7473_v19 = vand.u32 4294901760, %v5387_v29 }
  0x9e   : > { %4151 = vmatprep.subr.mxu1 %v710_v7  ;;  %4183 = vmatprep.subr.mxu0 %v5166_v15  ;;  %v504_v51 = vsub.f32 %v5378_v56, %v7472_v54  ;;  %v5432_v54 = vand.u32 4294901760, %v357_v23 }
  0x9f   : > { %4152 = vmatpush3.msra.mxu1 %v710_v7  ;;  %4184 = vmatpush3.msra.mxu0 %v5166_v15  ;;  %v514_v0 = vsub.f32 %v5387_v29, %v7473_v19  ;;  %v7414_v7 = vand.u32 4294901760, %v5422_v41  ;;  %v359_v19 = vld [vmem:[%s5114_s10 + $0x58] sm:$0xff] }
  0xa0   : > { %4153 = vmatprep.subr.mxu1 %v717_v42  ;;  %4185 = vmatprep.subr.mxu0 %v5169_v16  ;;  %v505_v15 = vand.u32 4294901760, %v504_v51  ;;  %v5447_v37 = vsub.f32 %v357_v23, %v5432_v54  ;;  %v360_v23 = vld [vmem:[%s5114_s10 + $0x60] sm:$0xff] }
  0xa1   : > { %4106 = vmatprep.mubr.f32.mxu0 %v485_v31  ;;  %4154 = vmatpush3.msra.mxu1 %v717_v42  ;;  %v515_v31 = vand.u32 4294901760, %v514_v0  ;;  %v5449_v42 = vand.u32 4294901760, %v358_v26 }
  0xa2   : > { %4186 = vmatpush3.msra.mxu0 %v5169_v16  ;;  %4155 = vmatprep.subr.mxu1 %v724_v44  ;;  %v524_v16 = vsub.f32 %v5412_v40, %v7416_v1 }
  0xa3   : > { %4107 = vmatmul.mubr.f32.gmra.mxu0 %v495_v27  ;;  %4187 = vmatprep.subr.mxu0 %v5174_v18  ;;  %v7415_v27 = vand.u32 4294901760, %v5447_v37  ;;  %v5464_v0 = vsub.f32 %v358_v26, %v5449_v42  ;;  %v5477_v26 = vand.u32 4294901760, %v360_v23 }
  0xa4   : > { %4156 = vmatpush3.msra.mxu1 %v724_v44  ;;  %4188 = vmatpush3.msra.mxu0 %v5174_v18  ;;  %v534_v18 = vsub.f32 %v5422_v41, %v7414_v7  ;;  %v5456_v44 = vand.u32 4294901760, %v359_v19  ;;  %v525_v51 = vand.u32 4294901760, %v524_v16 }
  0xa5   : > { %4157 = vmatprep.subr.mxu1 %v731_v39  ;;  %4189 = vmatprep.subr.mxu0 %v5179_v20  ;;  %v7417_v16 = vand.u32 4294901760, %v5464_v0  ;;  %v5494_v7 = vsub.f32 %v360_v23, %v5477_v26 }
  0xa6   : > { %4109 = vmatprep.mubr.f32.mxu0 %v505_v15  ;;  %4158 = vmatpush3.msra.mxu1 %v731_v39  ;;  %v361_v39 = vld [vmem:[%s5114_s10 + $0x68] sm:$0xff]  ;;  %v544_v15 = vsub.f32 %v5438_v32, %v7413_v2 }
  0xa7   : > { %4159 = vmatprep.mubr.f32.mxu1 %v5263_v57  ;;  %4190 = vmatpush3.msra.mxu0 %v5179_v20  ;;  %v535_v20 = vand.u32 4294901760, %v534_v18  ;;  %v5486_v18 = vand.u32 4294901760, %v361_v39  ;;  %v583_v23 = vand.u32 4294901760, %v5494_v7 }
  0xa8   : > { %4110 = vmatmul.mubr.f32.gmra.mxu0 %v515_v31  ;;  %4160 = vmatmul.mubr.f32.vlgmr.msra.gmra.mxu1 %v5273_v62  ;;  %v5475_v31 = vsub.f32 %v359_v19, %v5456_v44  ;;  %v362_v19 = vld [vmem:[%s5114_s10 + $0x70] sm:$0xff]  ;;  %v545_v2 = vand.u32 4294901760, %v544_v15 }
  0xa9   : > { %4191 = vmatprep.subr.mxu0 %v5182_v21  ;;  %4239 = vmatprep.subr.mxu1 %v5147_v4  ;;  %v5505_v15 = vsub.f32 %v361_v39, %v5486_v18  ;;  %v5507_v1 = vand.u32 4294901760, %v362_v19 }
  0xaa   : > { %4192 = vmatpush3.msra.mxu0 %v5182_v21  ;;  %4240 = vmatpush3.msra.mxu1 %v5147_v4  ;;  %v554_v21 = vsub.f32 %v5447_v37, %v7415_v27  ;;  %v363_v27 = vld [vmem:[%s5114_s10 + $0x78] sm:$0xff]  ;;  %s7530_s10 = sld [smem:[#allocation10_spill]] }
  0xab   : > { %4193 = vmatprep.subr.mxu0 %v5207_v30  ;;  %4241 = vmatprep.subr.mxu1 %v5149_v5 }
  0xac   : > { %4112 = vmatprep.mubr.f32.mxu0 %v525_v51  ;;  %4162 = vmatprep.mubr.f32.mxu1 %v5306_v36  ;;  %v573_v51 = vand.u32 4294901760, %v5475_v31 }
  0xad   : > { %4194 = vmatpush3.msra.mxu0 %v5207_v30  ;;  %4242 = vmatpush3.msra.mxu1 %v5149_v5  ;;  %v555_v30 = vand.u32 4294901760, %v554_v21  ;;  %v5516_v21 = vand.u32 4294901760, %v363_v27 }
  0xae   : > { %4113 = vmatmul.mubr.f32.gmra.mxu0 %v535_v20  ;;  %4163 = vmatmul.mubr.f32.gmra.mxu1 %v5320_v45  ;;  %v564_v20 = vsub.f32 %v5464_v0, %v7417_v16  ;;  %v5523_v16 = vsub.f32 %v362_v19, %v5507_v1 }
  0xaf   : > { %4195 = vmatprep.subr.mxu0 %v5217_v34  ;;  %4243 = vmatprep.subr.mxu1 %v5151_v6 }
  0xb0   : > { %4196 = vmatpush3.msra.mxu0 %v5217_v34  ;;  %4244 = vmatpush3.msra.mxu1 %v5151_v6  ;;  %v574_v34 = vsub.f32 %v5475_v31, %v573_v51  ;;  %v565_v39 = vand.u32 4294901760, %v564_v20  ;;  %v5533_v20 = vsub.f32 %v363_v27, %v5516_v21  ;;  %v603_v19 = vand.u32 4294901760, %v5523_v16  ;;  %p3802_p0 = scmp.ne.s32.totalorder %s7530_s10, 1 }
  0xb1   : > { %4197 = vmatprep.subr.mxu0 %v5235_v43  ;;  %4245 = vmatprep.subr.mxu1 %v5156_v10  ;;  %p3868_p4 = scmp.ne.s32.totalorder (!%p3802_p0), %s4841_s24, 0 }
  0xb2   : > { %4115 = vmatprep.mubr.f32.mxu0 %v545_v2  ;;  %4165 = vmatprep.mubr.f32.mxu1 %v5345_v3  ;;  %v593_v2 = vand.u32 4294901760, %v5505_v15 }
  0xb3   : > { %4198 = vmatpush3.msra.mxu0 %v5235_v43  ;;  %4246 = vmatpush3.msra.mxu1 %v5156_v10  ;;  %v575_v43 = vand.u32 4294901760, %v574_v34  ;;  %v613_v34 = vand.u32 4294901760, %v5533_v20 }
  0xb4   : > { %4116 = vmatmul.mubr.f32.gmra.mxu0 %v555_v30  ;;  %4166 = vmatmul.mubr.f32.gmra.mxu1 %v5360_v59  ;;  %v584_v30 = vsub.f32 %v5494_v7, %v583_v23 }
  0xb5   : > { %4199 = vmatprep.subr.mxu0 %v5243_v47  ;;  %4247 = vmatprep.subr.mxu1 %v5158_v11 }
  0xb6   : > { %4200 = vmatpush3.msra.mxu0 %v5243_v47  ;;  %4248 = vmatpush3.msra.mxu1 %v5158_v11  ;;  %v594_v47 = vsub.f32 %v5505_v15, %v593_v2  ;;  %v585_v27 = vand.u32 4294901760, %v584_v30 }
  0xb7   : > { %4201 = vmatprep.subr.mxu0 %v5258_v55  ;;  %4249 = vmatprep.subr.mxu1 %v5160_v12 }
  0xb8   : > { %4118 = vmatprep.mubr.f32.mxu0 %v565_v39  ;;  %4168 = vmatprep.mubr.f32.mxu1 %v5389_v48  ;;  %v595_v39 = vand.u32 4294901760, %v594_v47  ;;  %v7480_v47 = vand.u32 4294901760, %v5304_v33 }
  0xb9   : > { %4202 = vmatpush3.msra.mxu0 %v5258_v55  ;;  %4250 = vmatpush3.msra.mxu1 %v5160_v12  ;;  %v604_v55 = vsub.f32 %v5523_v16, %v603_v19 }
  0xba   : > { %4119 = vmatmul.mubr.f32.gmra.mxu0 %v575_v43  ;;  %4169 = vmatmul.mubr.f32.gmra.mxu1 %v5402_v24  ;;  %v614_v43 = vsub.f32 %v5533_v20, %v613_v34 }
  0xbb   : > { %4203 = vmatprep.subr.mxu0 %v5271_v61  ;;  %4251 = vmatprep.subr.mxu1 %v5171_v17 }
  0xbc   : > { %4204 = vmatpush3.msra.mxu0 %v5271_v61  ;;  %4252 = vmatpush3.msra.mxu1 %v5171_v17  ;;  %v605_v61 = vand.u32 4294901760, %v604_v55  ;;  %v615_v30 = vand.u32 4294901760, %v614_v43  ;;  %v7485_v55 = vld [vmem:[#allocation23_spill] sm:$0xff]  ;;  %v7489_v43 = vld [vmem:[#allocation25_spill] sm:$0xff] }
  0xbd   : > { %4205 = vmatprep.subr.mxu0 %v5287_v8  ;;  %4253 = vmatprep.subr.mxu1 %v5194_v25 }
  0xbe   : > { %4121 = vmatprep.mubr.f32.mxu0 %v585_v27  ;;  %4171 = vmatprep.mubr.f32.mxu1 %v5424_v9  ;;  %v7481_v27 = vld [vmem:[#allocation21_spill] sm:$0xff] }
  0xbf   : > { %4206 = vmatpush3.msra.mxu0 %v5287_v8  ;;  %4254 = vmatpush3.msra.mxu1 %v5194_v25  ;;  %v7474_v8 = vld [vmem:[#allocation18_spill] sm:$0xff] }
  0xc0   : > { %4122 = vmatmul.mubr.f32.gmra.mxu0 %v595_v39  ;;  %4172 = vmatmul.mubr.f32.gmra.mxu1 %v5432_v54  ;;  %v7482_v39 = vld [vmem:[#allocation22_spill] sm:$0xff] }
  0xc1   : > { %4207 = vmatprep.subr.mxu0 %v5312_v38  ;;  %4255 = vmatprep.subr.mxu1 %v5201_v28 }
  0xc2   : > { %4208 = vmatpush3.msra.mxu0 %v5312_v38  ;;  %4256 = vmatpush3.msra.mxu1 %v5201_v28  ;;  %v7476_v38 = vld [vmem:[#allocation28_spill] sm:$0xff] }
  0xc3   : > { %4209 = vmatprep.subr.mxu0 %v5328_v52  ;;  %4257 = vmatprep.subr.mxu1 %v5220_v35 }
  0xc4   : > { %4124 = vmatprep.mubr.f32.mxu0 %v605_v61  ;;  %4174 = vmatprep.mubr.f32.mxu1 %v5449_v42 }
  0xc5   : > { %4210 = vmatpush3.msra.mxu0 %v5328_v52  ;;  %4258 = vmatpush3.msra.mxu1 %v5220_v35  ;;  %v7477_v52 = vld [vmem:[#allocation19_spill] sm:$0xff] }
  0xc6   : > { %4125 = vmatmul.mubr.f32.gmra.mxu0 %v615_v30  ;;  %4175 = vmatmul.mubr.f32.gmra.mxu1 %v5456_v44 }
  0xc7   : > { %4211 = vmatprep.subr.mxu0 %v5343_v60  ;;  %4259 = vmatprep.subr.mxu1 %v5240_v46 }
  0xc8   : > { %4212 = vmatpush3.msra.mxu0 %v5343_v60  ;;  %4260 = vmatpush3.msra.mxu1 %v5240_v46  ;;  %v7479_v60 = vand.u32 4294901760, %v5293_v14 }
  0xc9   : > { %4213 = vmatprep.subr.mxu0 %v5368_v53  ;;  %4261 = vmatprep.subr.mxu1 %v5247_v49 }
  0xca   : > { %4177 = vmatprep.mubr.f32.mxu1 %v5477_v26  ;;  %4214 = vmatpush3.msra.mxu0 %v5368_v53  ;;  %v7475_v53 = vld [vmem:[#allocation30_spill] sm:$0xff] }
  0xcb   : > { %4215 = vmatprep.mubr.f32.mxu0 %v5293_v14  ;;  %4262 = vmatpush3.msra.mxu1 %v5247_v49  ;;  %v7483_v14 = vand.u32 4294901760, %v7475_v53 }
  0xcc   : > { %4178 = vmatmul.mubr.f32.gmra.mxu1 %v5486_v18  ;;  %4216 = vmatmul.mubr.f32.vlgmr.msra.gmra.mxu0 %v5304_v33  ;;  %v7484_v33 = vand.u32 4294901760, %v5351_v58 }
  0xcd   : > { %4263 = vmatprep.subr.mxu1 %v5276_v63  ;;  %4295 = vmatprep.subr.mxu0 %v5186_v22 }
  0xce   : > { %4264 = vmatpush3.msra.mxu1 %v5276_v63  ;;  %4296 = vmatpush3.msra.mxu0 %v5186_v22  ;;  %v7478_v22 = vld [vmem:[#allocation20_spill] sm:$0xff] }
  0xcf   : > { %4265 = vmatprep.subr.mxu1 %v5290_v13  ;;  %4297 = vmatprep.subr.mxu0 %v7474_v8 }
  0xd0   : > { %4180 = vmatprep.mubr.f32.mxu1 %v5507_v1  ;;  %4218 = vmatprep.mubr.f32.mxu0 %v7475_v53 }
  0xd1   : > { %4266 = vmatpush3.msra.mxu1 %v5290_v13  ;;  %4298 = vmatpush3.msra.mxu0 %v7474_v8 }
  0xd2   : > { %4181 = vmatmul.mubr.f32.gmra.mxu1 %v5516_v21  ;;  %4219 = vmatmul.mubr.f32.gmra.mxu0 %v5351_v58  ;;  %v7488_v58 = vand.u32 4294901760, %v5387_v29 }
  0xd3   : > { %4267 = vmatprep.subr.mxu1 %v7476_v38  ;;  %4299 = vmatprep.subr.mxu0 %v7477_v52 }
  0xd4   : > { %4268 = vmatpush3.msra.mxu1 %v7476_v38  ;;  %4300 = vmatpush3.msra.mxu0 %v7477_v52 }
  0xd5   : > { %4269 = vmatprep.subr.mxu1 %v5324_v50  ;;  %4301 = vmatprep.subr.mxu0 %v7478_v22 }
  0xd6   : > { %4221 = vmatprep.mubr.f32.mxu0 %v5378_v56  ;;  %4270 = vmatpush3.msra.mxu1 %v5324_v50 }
  0xd7   : > { %4271 = vmatprep.mubr.f32.mxu1 %v7479_v60  ;;  %4302 = vmatpush3.msra.mxu0 %v7478_v22 }
  0xd8   : > { %4222 = vmatmul.mubr.f32.gmra.mxu0 %v5387_v29  ;;  %4272 = vmatmul.mubr.f32.vlgmr.msra.gmra.mxu1 %v7480_v47  ;;  %v7492_v29 = vand.u32 4294901760, %v5422_v41 }
  0xd9   : > { %4303 = vmatprep.subr.mxu0 %v7481_v27  ;;  %4351 = vmatprep.subr.mxu1 %v5147_v4 }
  0xda   : > { %4304 = vmatpush3.msra.mxu0 %v7481_v27  ;;  %4352 = vmatpush3.msra.mxu1 %v5147_v4  ;;  %v7486_v4 = vld [vmem:[#allocation24_spill] sm:$0xff] }
  0xdb   : > { %4305 = vmatprep.subr.mxu0 %v7482_v39  ;;  %4353 = vmatprep.subr.mxu1 %v5149_v5 }
  0xdc   : > { %4224 = vmatprep.mubr.f32.mxu0 %v5412_v40  ;;  %4274 = vmatprep.mubr.f32.mxu1 %v7483_v14 }
  0xdd   : > { %4306 = vmatpush3.msra.mxu0 %v7482_v39  ;;  %4354 = vmatpush3.msra.mxu1 %v5149_v5  ;;  %v7487_v5 = vand.u32 4294901760, %v5378_v56  ;;  %v7493_v56 = vld [vmem:[#allocation27_spill] sm:$0xff] }
  0xde   : > { %4225 = vmatmul.mubr.f32.gmra.mxu0 %v5422_v41  ;;  %4275 = vmatmul.mubr.f32.gmra.mxu1 %v7484_v33  ;;  %v7497_v41 = vld [vmem:[#allocation31_spill] sm:$0xff] }
  0xdf   : > { %4307 = vmatprep.subr.mxu0 %v7485_v55  ;;  %4355 = vmatprep.subr.mxu1 %v5151_v6 }
  0xe0   : > { %4308 = vmatpush3.msra.mxu0 %v7485_v55  ;;  %4356 = vmatpush3.msra.mxu1 %v5151_v6  ;;  %v7490_v6 = vld [vmem:[#allocation26_spill] sm:$0xff] }
  0xe1   : > { %4309 = vmatprep.subr.mxu0 %v7486_v4  ;;  %4357 = vmatprep.subr.mxu1 %v5156_v10 }
  0xe2   : > { %4227 = vmatprep.mubr.f32.mxu0 %v5438_v32  ;;  %4277 = vmatprep.mubr.f32.mxu1 %v7487_v5 }
  0xe3   : > { %4310 = vmatpush3.msra.mxu0 %v7486_v4  ;;  %4358 = vmatpush3.msra.mxu1 %v5156_v10  ;;  %v7491_v10 = vand.u32 4294901760, %v5412_v40  ;;  %v7496_v40 = vand.u32 4294901760, %v5447_v37 }
  0xe4   : > { %4228 = vmatmul.mubr.f32.gmra.mxu0 %v5447_v37  ;;  %4278 = vmatmul.mubr.f32.gmra.mxu1 %v7488_v58 }
  0xe5   : > { %4311 = vmatprep.subr.mxu0 %v7489_v43  ;;  %4359 = vmatprep.subr.mxu1 %v5158_v11 }
  0xe6   : > { %4312 = vmatpush3.msra.mxu0 %v7489_v43  ;;  %4360 = vmatpush3.msra.mxu1 %v5158_v11  ;;  %v7494_v11 = vld [vmem:[#allocation29_spill] sm:$0xff] }
  0xe7   : > { %4313 = vmatprep.subr.mxu0 %v7490_v6  ;;  %4361 = vmatprep.subr.mxu1 %v5160_v12 }
  0xe8   : > { %4230 = vmatprep.mubr.f32.mxu0 %v5464_v0  ;;  %4280 = vmatprep.mubr.f32.mxu1 %v7491_v10 }
  0xe9   : > { %4314 = vmatpush3.msra.mxu0 %v7490_v6  ;;  %4362 = vmatpush3.msra.mxu1 %v5160_v12  ;;  %v7495_v12 = vand.u32 4294901760, %v5438_v32  ;;  %v7500_v32 = vld [vmem:[#allocation33_spill] sm:$0xff] }
  0xea   : > { %4231 = vmatmul.mubr.f32.gmra.mxu0 %v5475_v31  ;;  %4281 = vmatmul.mubr.f32.gmra.mxu1 %v7492_v29 }
  0xeb   : > { %4315 = vmatprep.subr.mxu0 %v7493_v56  ;;  %4363 = vmatprep.subr.mxu1 %v5171_v17 }
  0xec   : > { %4316 = vmatpush3.msra.mxu0 %v7493_v56  ;;  %4364 = vmatpush3.msra.mxu1 %v5171_v17  ;;  %v7498_v17 = vld [vmem:[#allocation32_spill] sm:$0xff] }
  0xed   : > { %4317 = vmatprep.subr.mxu0 %v7494_v11  ;;  %4365 = vmatprep.subr.mxu1 %v5194_v25 }
  0xee   : > { %4233 = vmatprep.mubr.f32.mxu0 %v5494_v7  ;;  %4283 = vmatprep.mubr.f32.mxu1 %v7495_v12 }
  0xef   : > { %4318 = vmatpush3.msra.mxu0 %v7494_v11  ;;  %4366 = vmatpush3.msra.mxu1 %v5194_v25  ;;  %v7499_v25 = vand.u32 4294901760, %v5464_v0 }
  0xf0   : > { %4234 = vmatmul.mubr.f32.gmra.mxu0 %v5505_v15  ;;  %4284 = vmatmul.mubr.f32.gmra.mxu1 %v7496_v40 }
  0xf1   : > { %4319 = vmatprep.subr.mxu0 %v7497_v41  ;;  %4367 = vmatprep.subr.mxu1 %v5201_v28 }
  0xf2   : > { %4320 = vmatpush3.msra.mxu0 %v7497_v41  ;;  %4368 = vmatpush3.msra.mxu1 %v5201_v28  ;;  %v7501_v28 = vld [vmem:[#allocation34_spill] sm:$0xff] }
  0xf3   : > { %4321 = vmatprep.subr.mxu0 %v7498_v17  ;;  %4369 = vmatprep.subr.mxu1 %v5220_v35 }
  0xf4   : > { %4236 = vmatprep.mubr.f32.mxu0 %v5523_v16  ;;  %4286 = vmatprep.mubr.f32.mxu1 %v7499_v25 }
  0xf5   : > { %4322 = vmatpush3.msra.mxu0 %v7498_v17  ;;  %4370 = vmatpush3.msra.mxu1 %v5220_v35 }
  0xf6   : > { %4237 = vmatmul.mubr.f32.gmra.mxu0 %v5533_v20  ;;  %4287 = vmatmul.mubr.f32.gmra.mxu1 %v573_v51 }
  0xf7   : > { %4323 = vmatprep.subr.mxu0 %v7500_v32  ;;  %4371 = vmatprep.subr.mxu1 %v5240_v46 }
  0xf8   : > { %4324 = vmatpush3.msra.mxu0 %v7500_v32  ;;  %4372 = vmatpush3.msra.mxu1 %v5240_v46 }
  0xf9   : > { %4325 = vmatprep.subr.mxu0 %v7501_v28  ;;  %4373 = vmatprep.subr.mxu1 %v5247_v49 }
  0xfa   : > { %4289 = vmatprep.mubr.f32.mxu1 %v583_v23  ;;  %4326 = vmatpush3.msra.mxu0 %v7501_v28 }
  0xfb   : > { %4327 = vmatprep.mubr.f32.mxu0 %v5263_v57  ;;  %4374 = vmatpush3.msra.mxu1 %v5247_v49 }
  0xfc   : > { %4290 = vmatmul.mubr.f32.gmra.mxu1 %v593_v2  ;;  %4328 = vmatmul.mubr.f32.vlgmr.msra.gmra.mxu0 %v5273_v62 }
  0xfd   : > { %4375 = vmatprep.subr.mxu1 %v5276_v63  ;;  %4292 = vmatprep.mubr.f32.mxu1 %v603_v19 }
  0xfe   : > { %4376 = vmatpush3.msra.mxu1 %v5276_v63  ;;  %4330 = vmatprep.mubr.f32.mxu0 %v5306_v36 }
  0xff   : > { %4377 = vmatprep.subr.mxu1 %v5290_v13 }
 0x100   : > { %4378 = vmatpush3.msra.mxu1 %v5290_v13  ;;  %4331 = vmatmul.mubr.f32.gmra.mxu0 %v5320_v45 }
 0x101   : > { %4293 = vmatmul.mubr.f32.gmra.mxu1 %v613_v34  ;;  %4379 = vmatprep.subr.mxu1 %v7476_v38 }
 0x102   : > { %4380 = vmatpush3.msra.mxu1 %v7476_v38  ;;  %4333 = vmatprep.mubr.f32.mxu0 %v5345_v3 }
 0x103   : > { %4381 = vmatprep.subr.mxu1 %v5324_v50  ;;  %4383 = vmatprep.mubr.f32.mxu1 %v5263_v57 }
 0x104   : > { %4382 = vmatpush3.msra.mxu1 %v5324_v50  ;;  %4334 = vmatmul.mubr.f32.gmra.mxu0 %v5360_v59 }
 0x105   : > { %4384 = vmatmul.mubr.f32.vlgmr.msra.gmra.mxu1 %v5273_v62  ;;  %4336 = vmatprep.mubr.f32.mxu0 %v5389_v48 }
 0x106   : > { %4386 = vmatprep.mubr.f32.mxu1 %v5306_v36 }
 0x108   : > { %4337 = vmatmul.mubr.f32.gmra.mxu0 %v5402_v24 }
 0x109   : > { %4387 = vmatmul.mubr.f32.gmra.mxu1 %v5320_v45  ;;  %4339 = vmatprep.mubr.f32.mxu0 %v5424_v9 }
 0x10a   : > { %4389 = vmatprep.mubr.f32.mxu1 %v5345_v3 }
 0x10c   : > { %4340 = vmatmul.mubr.f32.gmra.mxu0 %v5432_v54 }
 0x10d   : > { %4390 = vmatmul.mubr.f32.gmra.mxu1 %v5360_v59  ;;  %4342 = vmatprep.mubr.f32.mxu0 %v5449_v42 }
 0x10e   : > { %4392 = vmatprep.mubr.f32.mxu1 %v5389_v48 }
 0x110   : > { %4343 = vmatmul.mubr.f32.gmra.mxu0 %v5456_v44 }
 0x111   : > { %4393 = vmatmul.mubr.f32.gmra.mxu1 %v5402_v24  ;;  %4345 = vmatprep.mubr.f32.mxu0 %v5477_v26 }
 0x112   : > { %4395 = vmatprep.mubr.f32.mxu1 %v5424_v9 }
 0x114   : > { %4346 = vmatmul.mubr.f32.gmra.mxu0 %v5486_v18 }
 0x115   : > { %4396 = vmatmul.mubr.f32.gmra.mxu1 %v5432_v54  ;;  %4348 = vmatprep.mubr.f32.mxu0 %v5507_v1 }
 0x116   : > { %4398 = vmatprep.mubr.f32.mxu1 %v5449_v42 }
 0x118   : > { %4349 = vmatmul.mubr.f32.gmra.mxu0 %v5516_v21 }
 0x119   : > { %4399 = vmatmul.mubr.f32.gmra.mxu1 %v5456_v44 }
 0x11a   : > { %4401 = vmatprep.mubr.f32.mxu1 %v5477_v26 }
 0x11d   : > { %4402 = vmatmul.mubr.f32.gmra.mxu1 %v5486_v18 }
 0x11e   : > { %4404 = vmatprep.mubr.f32.mxu1 %v5507_v1 }
 0x121   : > { %4405 = vmatmul.mubr.f32.gmra.mxu1 %v5516_v21 }
 0x15d   : > { %v4105_v24 = vpop.f32.mrf.mxu0 }
 0x15f   : > { %v5736_v35 = vpop.f32.mrf.mxu0 }
 0x163   : > { %v5738_v46 = vpop.f32.mrf.mxu0 }
 0x165   : > { %v5740_v49 = vpop.f32.mrf.mxu0 }
 0x168   : > { %v5742_v57 = vpop.f32.mrf.mxu0  ;;  %v4161_v59 = vpop.f32.mrf.mxu1 }
 0x169   : > { %v775_v32 = vadd.f32 %v4161_v59, %v4105_v24 }
 0x16a   : > { %v5744_v62 = vpop.f32.mrf.mxu0  ;;  %v768_v63 = vpop.f32.mrf.mxu1 }
 0x16e   : > { %v5746_v3 = vpop.f32.mrf.mxu0  ;;  %v4164_v13 = vpop.f32.mrf.mxu1 }
 0x170   : > { %v5748_v36 = vpop.f32.mrf.mxu0  ;;  %v5750_v45 = vpop.f32.mrf.mxu1 }
 0x174   : > { %v5752_v50 = vpop.f32.mrf.mxu0  ;;  %v5754_v48 = vpop.f32.mrf.mxu1 }
 0x176   : > { %v5756_v9 = vpop.f32.mrf.mxu0  ;;  %v5758_v1 = vpop.f32.mrf.mxu1 }
 0x17a   : > { %v5760_v54 = vpop.f32.mrf.mxu0  ;;  %v5762_v7 = vpop.f32.mrf.mxu1 }
 0x17c   : > { %v5764_v37 = vpop.f32.mrf.mxu0  ;;  %v5766_v42 = vpop.f32.mrf.mxu1 }
 0x180   : > { %v5768_v44 = vpop.f32.mrf.mxu0  ;;  %v5770_v0 = vpop.f32.mrf.mxu1 }
 0x182   : > { %v5772_v31 = vpop.f32.mrf.mxu0  ;;  %v5774_v26 = vpop.f32.mrf.mxu1 }
 0x183   : > { %7502 = vst [vmem:[#allocation18_spill] sm:$0xff] %v5772_v31 }
 0x186   : > { %v5776_v16 = vpop.f32.mrf.mxu0  ;;  %v5778_v18 = vpop.f32.mrf.mxu1 }
 0x187   : > { %7503 = vst [vmem:[#allocation30_spill] sm:$0xff] %v5776_v16 }
 0x188   : > { %v5780_v51 = vpop.f32.mrf.mxu0  ;;  %v5782_v15 = vpop.f32.mrf.mxu1 }
 0x189   : > { %7504 = vst [vmem:[#allocation28_spill] sm:$0xff] %v5780_v51  ;;  %v769_v51 = vadd.f32 %v768_v63, %v5736_v35  ;;  %v799_v35 = vadd.f32 %v5754_v48, %v5742_v57  ;;  %v333_v63 = vld [vmem:[#allocation2] sm:$0xff]  ;;  %v811_v57 = vadd.f32 %v5762_v7, %v5746_v3 }
 0x18c   : > { %v5784_v23 = vpop.f32.mrf.mxu1  ;;  %v4217_v21 = vpop.f32.mrf.mxu0 }
 0x18e   : > { %v5786_v2 = vpop.f32.mrf.mxu1  ;;  %v962_v20 = vpop.f32.mrf.mxu0 }
 0x18f   : > { %7505 = vst [vmem:[#allocation19_spill] sm:$0xff] %v5786_v2 }
 0x192   : > { %v5788_v19 = vpop.f32.mrf.mxu1  ;;  %v4220_v34 = vpop.f32.mrf.mxu0 }
 0x193   : > { %7506 = vst [vmem:[#allocation20_spill] sm:$0xff] %v5788_v19 }
 0x194   : > { %v5790_v61 = vpop.f32.mrf.mxu1  ;;  %v976_v30 = vpop.f32.mrf.mxu0 }
 0x195   : > { %7507 = vst [vmem:[#allocation21_spill] sm:$0xff] %v5790_v61 }
 0x198   : > { %v4223_v8 = vpop.f32.mrf.mxu0  ;;  %v4273_v53 = vpop.f32.mrf.mxu1 }
 0x19a   : > { %v990_v38 = vpop.f32.mrf.mxu0  ;;  %v1156_v52 = vpop.f32.mrf.mxu1 }
 0x19e   : > { %v5792_v22 = vpop.f32.mrf.mxu0  ;;  %v4276_v60 = vpop.f32.mrf.mxu1 }
 0x1a0   : > { %v5794_v47 = vpop.f32.mrf.mxu0  ;;  %v1172_v27 = vpop.f32.mrf.mxu1 }
 0x1a4   : > { %v5796_v39 = vpop.f32.mrf.mxu0  ;;  %v4279_v14 = vpop.f32.mrf.mxu1 }
 0x1a6   : > { %v5798_v33 = vpop.f32.mrf.mxu0  ;;  %v5800_v55 = vpop.f32.mrf.mxu1 }
 0x1aa   : > { %v5802_v4 = vpop.f32.mrf.mxu0  ;;  %v5804_v5 = vpop.f32.mrf.mxu1 }
 0x1ac   : > { %v5806_v58 = vpop.f32.mrf.mxu0  ;;  %v5808_v43 = vpop.f32.mrf.mxu1 }
 0x1b0   : > { %v5810_v6 = vpop.f32.mrf.mxu0  ;;  %v5812_v10 = vpop.f32.mrf.mxu1 }
 0x1b1   : > { %7508 = vst [vmem:[#allocation22_spill] sm:$0xff] %v5810_v6  ;;  %v963_v6 = vadd.f32 %v962_v20, %v769_v51  ;;  %v793_v20 = vadd.f32 %v5758_v1, %v5744_v62  ;;  %v805_v1 = vadd.f32 %v5766_v42, %v5748_v36 }
 0x1b2   : > { %v5814_v29 = vpop.f32.mrf.mxu0  ;;  %v5816_v56 = vpop.f32.mrf.mxu1 }
 0x1b3   : > { %7509 = vst [vmem:[#allocation23_spill] sm:$0xff] %v5814_v29  ;;  %v970_v29 = vadd.f32 %v4217_v21, %v775_v32  ;;  %v1157_v59 = vadd.f32 %v1156_v52, %v963_v6  ;;  %v991_v48 = vadd.f32 %v990_v38, %v793_v20  ;;  %v339_v20 = vld [vmem:[#allocation2 + $0x48] sm:$0xff] }
 0x1b5   : > { %v1165_v2 = vadd.f32 %v4273_v53, %v970_v29  ;;  %v998_v53 = vadd.f32 %v4223_v8, %v799_v35  ;;  %v332_v29 = vld [vmem:[#allocation2 + $0x30] sm:$0xff] }
 0x1b6   : > { %v5818_v11 = vpop.f32.mrf.mxu0  ;;  %v5820_v12 = vpop.f32.mrf.mxu1 }
 0x1b7   : > { %7510 = vst [vmem:[#allocation24_spill] sm:$0xff] %v5818_v11  ;;  %v787_v11 = vadd.f32 %v4164_v13, %v5738_v46 }
 0x1b8   : > { %v5822_v40 = vpop.f32.mrf.mxu0  ;;  %v5824_v41 = vpop.f32.mrf.mxu1 }
 0x1b9   : > { %7511 = vst [vmem:[#allocation25_spill] sm:$0xff] %v5822_v40  ;;  %7512 = vst [vmem:[#allocation26_spill] sm:$0xff] %v5824_v41  ;;  %v984_v24 = vadd.f32 %v4220_v34, %v787_v11 }
 0x1bc   : > { %v5826_v17 = vpop.f32.mrf.mxu1  ;;  %v4329_v25 = vpop.f32.mrf.mxu0 }
 0x1bd   : > { %7513 = vst [vmem:[#allocation27_spill] sm:$0xff] %v5826_v17  ;;  %v781_v17 = vadd.f32 %v5750_v45, %v5740_v49 }
 0x1be   : > { %v5828_v28 = vpop.f32.mrf.mxu1  ;;  %v1395_v61 = vpop.f32.mrf.mxu0 }
 0x1bf   : > { %7514 = vst [vmem:[#allocation29_spill] sm:$0xff] %v5828_v28  ;;  %v1402_v28 = vadd.f32 %v4329_v25, %v1165_v2  ;;  %v977_v32 = vadd.f32 %v976_v30, %v781_v17  ;;  %v1396_v46 = vadd.f32 %v1395_v61, %v1157_v59  ;;  %v335_v30 = vld [vmem:[#allocation2 + $0x18] sm:$0xff]  ;;  %v1197_v61 = vadd.f32 %v4279_v14, %v998_v53 }
 0x1c0   : > { %v4332_v19 = vpop.f32.mrf.mxu0  ;;  %v823_v14 = vadd.f32 %v5770_v0, %v5752_v50 }
 0x1c1   : > { %v5831_v16 = vpop.f32.mrf.mxu1  ;;  %v1173_v45 = vadd.f32 %v1172_v27, %v977_v32  ;;  %v1189_v27 = vadd.f32 %v5800_v55, %v991_v48  ;;  %v817_v55 = vadd.f32 %v5774_v26, %v5756_v9  ;;  %v341_v48 = vld [vmem:[#allocation2 + $0x20] sm:$0xff] }
 0x1c2   : > { %7515 = vst [vmem:[#allocation31_spill] sm:$0xff] %v5831_v16  ;;  %v1407_v40 = vpop.f32.mrf.mxu0  ;;  %v1181_v16 = vadd.f32 %v4276_v60, %v984_v24  ;;  %v337_v24 = vld [vmem:[#allocation2 + $0x68] sm:$0xff] }
 0x1c3   : > { %v5834_v31 = vpop.f32.mrf.mxu1  ;;  %v1408_v11 = vadd.f32 %v1407_v40, %v1173_v45  ;;  %v1005_v40 = vadd.f32 %v5794_v47, %v805_v1  ;;  %v340_v1 = vld [vmem:[#allocation2 + $0x40] sm:$0xff] }
 0x1c4   : > { %v4335_v41 = vpop.f32.mrf.mxu0  ;;  %v1414_v34 = vadd.f32 %v4332_v19, %v1181_v16  ;;  %v1012_v16 = vadd.f32 %v5792_v22, %v811_v57  ;;  %v334_v19 = vld [vmem:[#allocation2 + $0x58] sm:$0xff] }
 0x1c5   : > { %v4385_v21 = vpop.f32.mrf.mxu1  ;;  %v1205_v50 = vadd.f32 %v5808_v43, %v1005_v40  ;;  %v829_v43 = vadd.f32 %v5782_v15, %v5764_v37  ;;  %v7523_v40 = vld [vmem:[#allocation27_spill] sm:$0xff] }
 0x1c6   : > { %v1579_v13 = vadd.f32 %v4385_v21, %v1402_v28  ;;  %v1419_v51 = vpop.f32.mrf.mxu0  ;;  %v1426_v28 = vadd.f32 %v4335_v41, %v1197_v61  ;;  %v1213_v36 = vadd.f32 %v5804_v5, %v1012_v16  ;;  %v1026_v41 = vadd.f32 %v5796_v39, %v823_v14  ;;  %v336_v21 = vld [vmem:[#allocation2 + $0x50] sm:$0xff]  ;;  %v7516_v61 = vld [vmem:[#allocation18_spill] sm:$0xff] }
 0x1c7   : > { %v1572_v49 = vpop.f32.mrf.mxu1  ;;  %v1420_v42 = vadd.f32 %v1419_v51, %v1189_v27  ;;  %v835_v5 = vadd.f32 %v5778_v18, %v5760_v54  ;;  %v1019_v51 = vadd.f32 %v5798_v33, %v817_v55  ;;  %v1033_v57 = vadd.f32 %v5806_v58, %v829_v43  ;;  %v7520_v27 = vld [vmem:[#allocation30_spill] sm:$0xff]  ;;  %v7526_v55 = vld [vmem:[#allocation24_spill] sm:$0xff] }
 0x1c8   : > { %v1667_v2 = vadd.f32 %v1579_v13, %v333_v63  ;;  %v1573_v52 = vadd.f32 %v1572_v49, %v1396_v46  ;;  %v4338_v6 = vpop.f32.mrf.mxu0  ;;  %v1229_v9 = vadd.f32 %v5812_v10, %v1026_v41  ;;  %v847_v10 = vadd.f32 %v5784_v23, %v5768_v44 }
 0x1c9   : > { %v4388_v60 = vpop.f32.mrf.mxu1  ;;  %v1438_v0 = vadd.f32 %v4338_v6, %v1213_v36  ;;  %v1040_v45 = vadd.f32 %v5802_v4, %v835_v5  ;;  %v1221_v54 = vadd.f32 %v5816_v56, %v1019_v51  ;;  %v7517_v56 = vld [vmem:[#allocation19_spill] sm:$0xff]  ;;  %v7528_v51 = vld [vmem:[#allocation25_spill] sm:$0xff] }
 0x1ca   : > { %1683 = vst [vmem:[#allocation2] sm:$0xff] %v1667_v2  ;;  %v1666_v17 = vadd.f32 %v1573_v52, %v332_v29  ;;  %v1591_v25 = vadd.f32 %v4388_v60, %v1414_v34  ;;  %v1431_v62 = vpop.f32.mrf.mxu0  ;;  %v338_v34 = vld [vmem:[#allocation2 + $0x8] sm:$0xff] }
 0x1cb   : > { %v1584_v8 = vpop.f32.mrf.mxu1  ;;  %v1432_v26 = vadd.f32 %v1431_v62, %v1205_v50  ;;  %v1245_v37 = vadd.f32 %v5820_v12, %v1040_v45  ;;  %v7521_v12 = vld [vmem:[#allocation20_spill] sm:$0xff] }
 0x1cc   : > { %1682 = vst [vmem:[#allocation2 + $0x30] sm:$0xff] %v1666_v17  ;;  %v1669_v3 = vadd.f32 %v1591_v25, %v335_v30  ;;  %v1585_v7 = vadd.f32 %v1584_v8, %v1408_v11  ;;  %v4341_v38 = vpop.f32.mrf.mxu0  ;;  %v841_v11 = vadd.f32 %v7517_v56, %v7516_v61  ;;  %v7518_v17 = vld [vmem:[#allocation22_spill] sm:$0xff] }
 0x1cd   : > { %v4391_v59 = vpop.f32.mrf.mxu1  ;;  %v1450_v18 = vadd.f32 %v4341_v38, %v1229_v9  ;;  %v1054_v25 = vadd.f32 %v7518_v17, %v847_v10  ;;  %v343_v38 = vld [vmem:[#allocation2 + $0x38] sm:$0xff] }
 0x1ce   : > { %1685 = vst [vmem:[#allocation2 + $0x18] sm:$0xff] %v1669_v3  ;;  %v1668_v22 = vadd.f32 %v1585_v7, %v334_v19  ;;  %v1603_v35 = vadd.f32 %v4391_v59, %v1426_v28  ;;  %v1443_v63 = vpop.f32.mrf.mxu0  ;;  %v7519_v19 = vld [vmem:[#allocation26_spill] sm:$0xff]  ;;  %v859_v28 = vadd.f32 %v7521_v12, %v7520_v27  ;;  %v7522_v3 = vld [vmem:[#allocation23_spill] sm:$0xff] }
 0x1cf   : > { %v1596_v32 = vpop.f32.mrf.mxu1  ;;  %v1444_v15 = vadd.f32 %v1443_v63, %v1221_v54  ;;  %v1237_v44 = vadd.f32 %v7519_v19, %v1033_v57  ;;  %v1047_v7 = vadd.f32 %v7522_v3, %v841_v11 }
 0x1d0   : > { %1684 = vst [vmem:[#allocation2 + $0x58] sm:$0xff] %v1668_v22  ;;  %v1671_v47 = vadd.f32 %v1603_v35, %v337_v24  ;;  %v1597_v46 = vadd.f32 %v1596_v32, %v1420_v42  ;;  %v4344_v13 = vpop.f32.mrf.mxu0  ;;  %v1261_v24 = vadd.f32 %v7523_v40, %v1054_v25  ;;  %v7524_v22 = vld [vmem:[#allocation28_spill] sm:$0xff]  ;;  %v7525_v35 = vld [vmem:[#allocation21_spill] sm:$0xff]  ;;  %v1068_v41 = vadd.f32 %v7526_v55, %v859_v28 }
 0x1d1   : > { %v4394_v53 = vpop.f32.mrf.mxu1  ;;  %v1462_v23 = vadd.f32 %v4344_v13, %v1245_v37  ;;  %v853_v63 = vadd.f32 %v7525_v35, %v7524_v22  ;;  %v342_v32 = vld [vmem:[#allocation2 + $0x10] sm:$0xff]  ;;  %v346_v37 = vld [vmem:[#allocation2 + $0x78] sm:$0xff] }
 0x1d2   : > { %1687 = vst [vmem:[#allocation2 + $0x68] sm:$0xff] %v1671_v47  ;;  %v1670_v39 = vadd.f32 %v1597_v46, %v336_v21  ;;  %v1615_v29 = vadd.f32 %v4394_v53, %v1438_v0  ;;  %v1455_v49 = vpop.f32.mrf.mxu0  ;;  %v7527_v0 = vld [vmem:[#allocation29_spill] sm:$0xff]  ;;  %v345_v53 = vld [vmem:[#allocation2 + $0x70] sm:$0xff] }
 0x1d3   : > { %v1608_v2 = vpop.f32.mrf.mxu1  ;;  %v1456_v59 = vadd.f32 %v1455_v49, %v1237_v44  ;;  %v1253_v47 = vadd.f32 %v7527_v0, %v1047_v7 }
 0x1d4   : > { %1686 = vst [vmem:[#allocation2 + $0x50] sm:$0xff] %v1670_v39  ;;  %v1673_v33 = vadd.f32 %v1615_v29, %v339_v20  ;;  %v1609_v52 = vadd.f32 %v1608_v2, %v1432_v26  ;;  %v4347_v6 = vpop.f32.mrf.mxu0  ;;  %v1061_v20 = vadd.f32 %v7528_v51, %v853_v63  ;;  %v7529_v26 = vld [vmem:[#allocation31_spill] sm:$0xff] }
 0x1d5   : > { %v4397_v30 = vpop.f32.mrf.mxu1  ;;  %v1474_v46 = vadd.f32 %v4347_v6, %v1261_v24  ;;  %v1277_v39 = vadd.f32 %v7529_v26, %v1068_v41  ;;  %v347_v6 = vld [vmem:[#allocation2 + $0x28] sm:$0xff] }
 0x1d6   : > { %1689 = vst [vmem:[#allocation2 + $0x48] sm:$0xff] %v1673_v33  ;;  %v1672_v4 = vadd.f32 %v1609_v52, %v338_v34  ;;  %v1627_v60 = vadd.f32 %v4397_v30, %v1450_v18  ;;  %v1467_v62 = vpop.f32.mrf.mxu0  ;;  %v344_v34 = vld [vmem:[#allocation2 + $0x60] sm:$0xff]  ;;  %v1269_v54 = vadd.f32 %v5834_v31, %v1061_v20 }
 0x1d7   : > { %v1620_v16 = vpop.f32.mrf.mxu1  ;;  %v1468_v29 = vadd.f32 %v1467_v62, %v1253_v47 }
 0x1d8   : > { %1688 = vst [vmem:[#allocation2 + $0x8] sm:$0xff] %v1672_v4  ;;  %v1675_v58 = vadd.f32 %v1627_v60, %v341_v48  ;;  %v1621_v8 = vadd.f32 %v1620_v16, %v1444_v15  ;;  %v4350_v21 = vpop.f32.mrf.mxu0 }
 0x1d9   : > { %v4400_v14 = vpop.f32.mrf.mxu1  ;;  %v1486_v18 = vadd.f32 %v4350_v21, %v1277_v39 }
 0x1da   : > { %1691 = vst [vmem:[#allocation2 + $0x20] sm:$0xff] %v1675_v58  ;;  %v1674_v36 = vadd.f32 %v1621_v8, %v340_v1  ;;  %v1639_v42 = vadd.f32 %v4400_v14, %v1462_v23  ;;  %v1479_v45 = vpop.f32.mrf.mxu0 }
 0x1db   : > { %v1632_v50 = vpop.f32.mrf.mxu1  ;;  %v1480_v57 = vadd.f32 %v1479_v45, %v1269_v54 }
 0x1dc   : > { %1690 = vst [vmem:[#allocation2 + $0x40] sm:$0xff] %v1674_v36  ;;  %v1677_v13 = vadd.f32 %v1639_v42, %v343_v38  ;;  %v1633_v5 = vadd.f32 %v1632_v50, %v1456_v59 }
 0x1dd   : > { %v4403_v9 = vpop.f32.mrf.mxu1 }
 0x1de   : > { %1693 = vst [vmem:[#allocation2 + $0x38] sm:$0xff] %v1677_v13  ;;  %v1676_v49 = vadd.f32 %v1633_v5, %v342_v32  ;;  %v1651_v43 = vadd.f32 %v4403_v9, %v1474_v46 }
 0x1df   : > { %v1644_v2 = vpop.f32.mrf.mxu1 }
 0x1e0   : > { %1692 = vst [vmem:[#allocation2 + $0x10] sm:$0xff] %v1676_v49  ;;  %v1679_v33 = vadd.f32 %v1651_v43, %v345_v53  ;;  %v1645_v52 = vadd.f32 %v1644_v2, %v1468_v29 }
 0x1e1   : > { %v4406_v10 = vpop.f32.mrf.mxu1 }
 0x1e2   : > { %1695 = vst [vmem:[#allocation2 + $0x70] sm:$0xff] %v1679_v33  ;;  %v1678_v48 = vadd.f32 %v1645_v52, %v344_v34  ;;  %v1663_v30 = vadd.f32 %v4406_v10, %v1486_v18 }
 0x1e3   : > { %v1656_v15 = vpop.f32.mrf.mxu1 }
 0x1e4   : > { %1694 = vst [vmem:[#allocation2 + $0x60] sm:$0xff] %v1678_v48  ;;  %v1681_v4 = vadd.f32 %v1663_v30, %v347_v6  ;;  %v1657_v60 = vadd.f32 %v1656_v15, %v1480_v57  ;;  %1701 = sbr.rel (%p3802_p0) target bundleno = 1094 (0x446), region = 48 }
 0x1e6   : > { %1697 = vst [vmem:[#allocation2 + $0x28] sm:$0xff] %v1681_v4  ;;  %v1680_v61 = vadd.f32 %v1657_v60, %v346_v37 }
 0x1e8   : > { %1696 = vst [vmem:[#allocation2 + $0x78] sm:$0xff] %v1680_v61 }
 0x1e9   : > { %v1704_v31 = vld [vmem:[#allocation2 + $0x58] sm:$0xff]  ;;  %v5885_v56 = vld [vmem:[%s5134_s23] ss:$0 sm:$0xff]  ;;  %v1702_v11 = vld [vmem:[#allocation2 + $0x30] sm:$0xff]  ;;  %v4869_v47 = vmov 683565275  }
 0x1ea   : > { %v5888_v17 = vadd.f32 %v5885_v56, %v1704_v31  ;;  %v5891_v25 = vadd.f32 %v5885_v56, %v1702_v11  ;;  %v1705_v62 = vld [vmem:[#allocation2 + $0x18] sm:$0xff]  ;;  %v4870_v13 = vmov 2475754826   ;;  %v4871_v51 = vmov 2131351028  }
 0x1eb   : > { %v5898_v58 = vadd.f32 %v5885_v56, %v1705_v62  ;;  %v4872_v53 = vmov 2102212464   ;;  %v4873_v26 = vmov 920167782   ;;  %v4874_v54 = vmov 1326507024  }
 0x1ec   : > { %v1947_v1 = vand.u32 2147483647, %v5888_v17  ;;  %v1950_v16 = vand.u32 2139095040, %v5888_v17  ;;  %v1741_v19 = vand.u32 2147483647, %v5891_v25  ;;  %v1744_v44 = vand.u32 2139095040, %v5891_v25 }
 0x1ed   : > { %v2053_v7 = vand.u32 2139095040, %v5898_v58  ;;  %v2050_v55 = vand.u32 2147483647, %v5898_v58  ;;  %vm1949_vm13 = vcmp.lt.s32.totalorder %v5888_v17, 0 }
 0x1ee   : > { %v1951_v23 = vshrl.u32 %v1950_v16, 23  ;;  %v1954_v8 = vand.u32 8388607, %v1947_v1  ;;  %v1745_v27 = vshrl.u32 %v1744_v44, 23  ;;  %v1748_v12 = vand.u32 8388607, %v1741_v19 }
 0x1ef   : > { %v2054_v59 = vshrl.u32 %v2053_v7, 23 }
 0x1f0   : > { %v3812_v28 = vadd.s32 4294967169, %v1951_v23  ;;  %v3804_v3 = vadd.s32 4294967169, %v1745_v27  ;;  %v1955_v14 = vor.u32 8388608, %v1954_v8  ;;  %v1749_v40 = vor.u32 8388608, %v1748_v12 }
 0x1f1   : > { %v3816_v42 = vadd.s32 4294967169, %v2054_v59 }
 0x1f2   : > { %v1957_v38 = vadd.s32 1, %v3812_v28  ;;  %v1751_v24 = vadd.s32 1, %v3804_v3  ;;  %v5906_v41 = vshll.u32 %v1955_v14, 8  ;;  %v5910_v50 = vshll.u32 %v1749_v40, 8 }
 0x1f3   : > { %v5917_v29 = vadd.s32 1, %v3816_v42 }
 0x1f4   : > { %vm1958_vm0 = vcmp.gt.s32.totalorder %v1957_v38, 0  ;;  %vm1752_vm1 = vcmp.gt.s32.totalorder %v1751_v24, 0 }
 0x1f5   : > { %v1959_v36 = vsel %vm1958_vm0, %v1957_v38, 0  ;;  %v1753_v63 = vsel %vm1752_vm1, %v1751_v24, 0  ;;  %vm2061_vm11 = vcmp.gt.s32.totalorder %v5917_v29, 0 }
 0x1f6   : > { %v1960_v22 = vshrl.u32 %v1959_v36, 5  ;;  %v1961_v35 = vand.u32 31, %v1959_v36  ;;  %v5908_v21 = vshrl.u32 %v1753_v63, 5  ;;  %v1755_v32 = vand.u32 31, %v1753_v63 }
 0x1f8   : > { %v1962_v0 = vsub.s32 32, %v1961_v35  ;;  %v1964_v46 = vshll.u32 %v4869_v47, %v1961_v35  ;;  %v1967_v5 = vshll.u32 %v4870_v13, %v1961_v35  ;;  %v1970_v20 = vshll.u32 %v4871_v51, %v1961_v35 }
 0x1f9   : > { %v1973_v9 = vshll.u32 %v4872_v53, %v1961_v35  ;;  %v1976_v39 = vshll.u32 %v4873_v26, %v1961_v35  ;;  %vm1979_vm2 = vcmp.lt.s32.totalorder %v1960_v22, 1  ;;  %vm1980_vm3 = vcmp.lt.s32.totalorder %v1960_v22, 2 }
 0x1fa   : > { %v1963_v49 = vshrl.u32 %v4869_v47, %v1962_v0  ;;  %v1965_v43 = vshrl.u32 %v4870_v13, %v1962_v0  ;;  %v1968_v45 = vshrl.u32 %v4871_v51, %v1962_v0  ;;  %v1971_v34 = vshrl.u32 %v4872_v53, %v1962_v0 }
 0x1fb   : > { %v1974_v2 = vshrl.u32 %v4873_v26, %v1962_v0  ;;  %v1977_v18 = vshrl.u32 %v4874_v54, %v1962_v0  ;;  %vm1982_vm4 = vcmp.lt.s32.totalorder %v1960_v22, 4  ;;  %v1756_v10 = vsub.s32 32, %v1755_v32 }
 0x1fc   : > { %v1966_v33 = vor.u32 %v1965_v43, %v1964_v46  ;;  %v1969_v52 = vor.u32 %v1968_v45, %v1967_v5  ;;  %v1972_v6 = vor.u32 %v1971_v34, %v1970_v20  ;;  %vm1981_vm5 = vcmp.lt.s32.totalorder %v1960_v22, 3 }
 0x1fd   : > { %v1975_v57 = vor.u32 %v1974_v2, %v1973_v9  ;;  %v1978_v48 = vor.u32 %v1977_v18, %v1976_v39  ;;  %v1758_v30 = vshll.u32 %v4869_v47, %v1755_v32  ;;  %v1761_v62 = vshll.u32 %v4870_v13, %v1755_v32 }
 0x1fe   : > { %v1983_v37 = vsel %vm1979_vm2, %v1963_v49, %v1966_v33  ;;  %v1984_v15 = vsel %vm1982_vm4, %v1972_v6, 2102212464  ;;  %v1987_v4 = vsel %vm1979_vm2, %v1966_v33, %v1969_v52  ;;  %v1991_v60 = vsel %vm1979_vm2, %v1969_v52, %v1972_v6 }
 0x1ff   : > { %v1985_v61 = vsel %vm1981_vm5, %v1969_v52, %v1984_v15  ;;  %v1988_v31 = vsel %vm1982_vm4, %v1975_v57, 920167782  ;;  %v1992_v11 = vsel %vm1982_vm4, %v1978_v48, 1326507024  ;;  %v1757_v23 = vshrl.u32 %v4869_v47, %v1756_v10 }
 0x200   : > { %v1989_v16 = vsel %vm1981_vm5, %v1972_v6, %v1988_v31  ;;  %v1993_v44 = vsel %vm1981_vm5, %v1975_v57, %v1992_v11  ;;  %v1759_v8 = vshrl.u32 %v4870_v13, %v1756_v10  ;;  %v1986_v27 = vsel %vm1980_vm3, %v1983_v37, %v1985_v61 }
 0x201   : > { %v1990_v12 = vsel %vm1980_vm3, %v1987_v4, %v1989_v16  ;;  %v1994_v28 = vsel %vm1980_vm3, %v1991_v60, %v1993_v44  ;;  %v1762_v3 = vshrl.u32 %v4871_v51, %v1756_v10  ;;  %v1764_v36 = vshll.u32 %v4871_v51, %v1755_v32  ;;  %v1703_v4 = vld [vmem:[#allocation2] sm:$0xff] }
 0x202   : > { %v5937_v7 = vmul.u32.u64.low %v5906_v41, %v1994_v28  ;;  %v5938_v38 = vmul.u32.u64.high %v5906_v41, %v1994_v28, %v5937_v7  ;;  %v5941_v14 = vmul.u32.u64.low %v5906_v41, %v1990_v12  ;;  %v5942_v40 = vmul.u32.u64.high %v5906_v41, %v1990_v12, %v5941_v14 }
 0x203   : > { %v1760_v24 = vor.u32 %v1759_v8, %v1758_v30  ;;  %v1763_v59 = vor.u32 %v1762_v3, %v1761_v62  ;;  %v1765_v42 = vshrl.u32 %v4872_v53, %v1756_v10  ;;  %v1767_v22 = vshll.u32 %v4872_v53, %v1755_v32 }
 0x204   : > { %v1768_v35 = vshrl.u32 %v4873_v26, %v1756_v10  ;;  %v1770_v63 = vshll.u32 %v4873_v26, %v1755_v32  ;;  %v1771_v0 = vshrl.u32 %v4874_v54, %v1756_v10  ;;  %v2002_v46 = vmul.u32 %v5906_v41, %v1986_v27 }
 0x205   : > { %v1766_v5 = vor.u32 %v1765_v42, %v1764_v36  ;;  %vm1773_vm6 = vcmp.lt.s32.totalorder %v5908_v21, 1  ;;  %vm1774_vm7 = vcmp.lt.s32.totalorder %v5908_v21, 2  ;;  %vm2004_vm8 = vc.u32 %v5938_v38, %v5941_v14 }
 0x206   : > { %v2005_v20 = vadd.s32 1, %v5942_v40  ;;  %v1769_v9 = vor.u32 %v1768_v35, %v1767_v22  ;;  %vm1775_vm9 = vcmp.lt.s32.totalorder %v5908_v21, 3  ;;  %v1772_v39 = vor.u32 %v1771_v0, %v1770_v63 }
 0x207   : > { %vm1776_vm10 = vcmp.lt.s32.totalorder %v5908_v21, 4  ;;  %v1777_v32 = vsel %vm1773_vm6, %v1757_v23, %v1760_v24  ;;  %v1781_v49 = vsel %vm1773_vm6, %v1760_v24, %v1763_v59  ;;  %v1785_v34 = vsel %vm1773_vm6, %v1763_v59, %v1766_v5 }
 0x208   : > { %v2006_v41 = vsel %vm2004_vm8, %v2005_v20, %v5942_v40  ;;  %v1778_v43 = vsel %vm1776_vm10, %v1766_v5, 2102212464  ;;  %v1782_v45 = vsel %vm1776_vm10, %v1769_v9, 920167782  ;;  %v1786_v52 = vsel %vm1776_vm10, %v1772_v39, 1326507024 }
 0x209   : > { %v2007_v2 = vadd.s32 %v2006_v41, %v2002_v46  ;;  %v1779_v18 = vsel %vm1775_vm9, %v1763_v59, %v1778_v43  ;;  %v1783_v33 = vsel %vm1775_vm9, %v1766_v5, %v1782_v45  ;;  %v1787_v57 = vsel %vm1775_vm9, %v1769_v9, %v1786_v52 }
 0x20a   : > { %v1780_v6 = vsel %vm1774_vm7, %v1777_v32, %v1779_v18  ;;  %v1784_v10 = vsel %vm1774_vm7, %v1781_v49, %v1783_v33  ;;  %v1788_v30 = vsel %vm1774_vm7, %v1785_v34, %v1787_v57  ;;  %v2062_v31 = vsel %vm2061_vm11, %v5917_v29, 0 }
 0x20b   : > { %v2008_v48 = vadd.s32 536870912, %v2007_v2  ;;  %v5968_v37 = vmul.u32.u64.low %v5910_v50, %v1784_v10  ;;  %v5969_v15 = vmul.u32.u64.high %v5910_v50, %v1784_v10, %v5968_v37  ;;  %v2064_v62 = vand.u32 31, %v2062_v31 }
 0x20c   : > { %v5973_v60 = vmul.u32.u64.low %v5910_v50, %v1788_v30  ;;  %v5974_v61 = vmul.u32.u64.high %v5910_v50, %v1788_v30, %v5973_v60  ;;  %v1796_v16 = vmul.u32 %v5910_v50, %v1780_v6  ;;  %v2057_v21 = vand.u32 8388607, %v2050_v55 }
 0x20d   : > { %v5977_v11 = vshrl.u32 %v2008_v48, 30  ;;  %v5983_v44 = vadd.f32 %v5885_v56, %v1703_v4  ;;  %v1799_v8 = vadd.s32 1, %v5969_v15  ;;  %v2065_v27 = vsub.s32 32, %v2064_v62 }
 0x20e   : > { %vm1798_vm12 = vc.u32 %v5974_v61, %v5968_v37  ;;  %v2058_v50 = vor.u32 8388608, %v2057_v21  ;;  %v2067_v3 = vshll.u32 %v4869_v47, %v2064_v62  ;;  %v2070_v59 = vshll.u32 %v4870_v13, %v2064_v62 }
 0x20f   : > { %v2010_v23 = vshll.u32 %v5977_v11, 30  ;;  %v1800_v12 = vsel %vm1798_vm12, %v1799_v8, %v5969_v15  ;;  %v1847_v7 = vand.u32 2139095040, %v5983_v44  ;;  %v2068_v24 = vshrl.u32 %v4870_v13, %v2065_v27 }
 0x210   : > { %v1801_v28 = vadd.s32 %v1800_v12, %v1796_v16  ;;  %v2071_v36 = vshrl.u32 %v4871_v51, %v2065_v27  ;;  %v2076_v22 = vshll.u32 %v4872_v53, %v2064_v62  ;;  %v1844_v35 = vand.u32 2147483647, %v5983_v44 }
 0x211   : > { %v5989_v29 = vsub.s32 %v2007_v2, %v2010_v23  ;;  %v2063_v0 = vshrl.u32 %v2062_v31, 5  ;;  %v2073_v46 = vshll.u32 %v4871_v51, %v2064_v62  ;;  %v2074_v5 = vshrl.u32 %v4872_v53, %v2065_v27 }
 0x212   : > { %v1802_v42 = vadd.s32 536870912, %v1801_v28  ;;  %v2077_v9 = vshrl.u32 %v4873_v26, %v2065_v27  ;;  %v6006_v39 = vshll.u32 %v2058_v50, 8  ;;  %v1848_v32 = vshrl.u32 %v1847_v7, 23 }
 0x213   : > { %v2013_v40 = vsub.s32 0, %v5989_v29  ;;  %v2003_v49 = vadd.s32 %v5941_v14, %v5938_v38  ;;  %v2069_v43 = vor.u32 %v2068_v24, %v2067_v3  ;;  %v2072_v45 = vor.u32 %v2071_v36, %v2070_v59 }
 0x214   : > { %v6003_v20 = vshrl.u32 %v1802_v42, 30  ;;  %v2078_v2 = vor.u32 %v2077_v9, %v2076_v22  ;;  %v2079_v18 = vshll.u32 %v4873_v26, %v2064_v62  ;;  %v2080_v33 = vshrl.u32 %v4874_v54, %v2065_v27 }
 0x215   : > { %v3813_v63 = vmin.u32 %v2013_v40, %v5989_v29  ;;  %v2075_v6 = vor.u32 %v2074_v5, %v2073_v46  ;;  %vm2082_vm14 = vcmp.lt.s32.totalorder %v2063_v0, 1  ;;  %vm2085_vm15 = vcmp.lt.s32.totalorder %v2063_v0, 4 }
 0x216   : > { %v1804_v34 = vshll.u32 %v6003_v20, 30  ;;  %v2033_v10 = vsub.s32 4, %v5977_v11  ;;  %v2066_v38 = vshrl.u32 %v4869_v47, %v2065_v27  ;;  %vm2084_vm0 = vcmp.lt.s32.totalorder %v2063_v0, 3 }
 0x217   : > { %v2015_v41 = vclz %v3813_v63  ;;  %vm2083_vm2 = vcmp.lt.s32.totalorder %v2063_v0, 2  ;;  %v2087_v14 = vsel %vm2085_vm15, %v2075_v6, 2102212464  ;;  %v2091_v48 = vsel %vm2085_vm15, %v2078_v2, 920167782 }
 0x218   : > { %v6015_v57 = vsub.s32 %v1801_v28, %v1804_v34  ;;  %v2081_v4 = vor.u32 %v2080_v33, %v2079_v18  ;;  %v2090_v60 = vsel %vm2082_vm14, %v2069_v43, %v2072_v45  ;;  %vm6024_vm3 = vcmp.le.f32.partialorder %v1947_v1, 0.7853982 }
 0x219   : > { %v3814_v52 = vadd.s32 4294967294, %v2015_v41  ;;  %v2092_v23 = vsel %vm2084_vm0, %v2075_v6, %v2091_v48  ;;  %v2086_v27 = vsel %vm2082_vm14, %v2066_v38, %v2069_v43  ;;  %v2088_v12 = vsel %vm2084_vm0, %v2072_v45, %v2087_v14 }
 0x21a   : > { %v1807_v15 = vsub.s32 0, %v6015_v57  ;;  %v3808_v28 = vadd.s32 4294967169, %v1848_v32  ;;  %v2093_v1 = vsel %vm2083_vm2, %v2090_v60, %v2092_v23  ;;  %v2094_v7 = vsel %vm2082_vm14, %v2072_v45, %v2075_v6 }
 0x21b   : > { %vm3815_vm1 = vcmp.lt.s32.totalorder %v3814_v52, 0  ;;  %v2095_v24 = vsel %vm2085_vm15, %v2081_v4, 1326507024  ;;  %v2034_v22 = vsel %vm1949_vm13, %v2033_v10, %v5977_v11  ;;  %v2089_v5 = vsel %vm2083_vm2, %v2086_v27, %v2088_v12 }
 0x21c   : > { %v2018_v30 = vsel %vm3815_vm1, 0, %v3814_v52  ;;  %v3805_v8 = vmin.u32 %v1807_v15, %v6015_v57  ;;  %v2096_v63 = vsel %vm2084_vm0, %v2078_v2, %v2095_v24  ;;  %v1854_v32 = vadd.s32 1, %v3808_v28  ;;  %v1707_v52 = vld [vmem:[#allocation2 + $0x68] sm:$0xff] }
 0x21d   : > { %v2019_v62 = vsub.s32 32, %v2018_v30  ;;  %v2020_v16 = vshll.u32 %v5989_v29, %v2018_v30  ;;  %v2023_v21 = vsub.s32 4294967266, %v2018_v30  ;;  %v2097_v9 = vsel %vm2083_vm2, %v2094_v7, %v2096_v63 }
 0x21e   : > { %v1809_v40 = vclz %v3805_v8  ;;  %v6037_v29 = vmul.u32.u64.low %v6006_v39, %v2093_v1  ;;  %v6038_v59 = vmul.u32.u64.high %v6006_v39, %v2093_v1, %v6037_v29  ;;  %v1797_v34 = vadd.s32 %v5968_v37, %v5974_v61 }
 0x21f   : > { %v2021_v50 = vshrl.u32 %v2003_v49, %v2019_v62  ;;  %v2024_v3 = vadd.s32 127, %v2023_v21  ;;  %v6048_v43 = vmul.u32.u64.low %v6006_v39, %v2097_v9  ;;  %v6049_v45 = vmul.u32.u64.high %v6006_v39, %v2097_v9, %v6048_v43 }
 0x220   : > { %v3806_v46 = vadd.s32 4294967294, %v1809_v40  ;;  %v2108_v11 = vadd.s32 1, %v6038_v59  ;;  %vm1855_vm5 = vcmp.gt.s32.totalorder %v1854_v32, 0  ;;  %v2105_v33 = vmul.u32 %v6006_v39, %v2089_v5 }
 0x221   : > { %v2022_v36 = vor.u32 %v2021_v50, %v2020_v16  ;;  %v2025_v42 = vshll.u32 %v2024_v3, 23  ;;  %v1856_v0 = vsel %vm1855_vm5, %v1854_v32, 0  ;;  %v2036_v6 = vsel %vm6024_vm3, 0, %v2034_v22 }
 0x222   : > { %vm3807_vm4 = vcmp.lt.s32.totalorder %v3806_v46, 0  ;;  %vm2107_vm6 = vc.u32 %v6049_v45, %v6037_v29  ;;  %v1851_v37 = vand.u32 8388607, %v1844_v35  ;;  %v1858_v61 = vand.u32 31, %v1856_v0 }
 0x223   : > { %v2026_v49 = vor.u32 4788187, %v2025_v42  ;;  %v2029_v41 = vcvt.s32.f32 %v2022_v36  ;;  %v1812_v18 = vsel %vm3807_vm4, 0, %v3806_v46  ;;  %v2109_v39 = vsel %vm2107_vm6, %v2108_v11, %v6038_v59 }
 0x224   : > { %v1813_v10 = vsub.s32 32, %v1812_v18  ;;  %v1814_v38 = vshll.u32 %v6015_v57, %v1812_v18  ;;  %v1817_v14 = vsub.s32 4294967266, %v1812_v18  ;;  %v6064_v4 = vadd.f32 %v5885_v56, %v1707_v52 }
 0x225   : > { %v2027_v2 = vand.u32 2147483647, %v2026_v49  ;;  %v6066_v62 = vand.u32 3, %v2036_v6  ;;  %vm1743_vm7 = vcmp.lt.s32.totalorder %v5891_v25, 0  ;;  %v2110_v57 = vadd.s32 %v2109_v39, %v2105_v33 }
 0x226   : > { %v1815_v30 = vshrl.u32 %v1797_v34, %v1813_v10  ;;  %v1818_v15 = vadd.s32 127, %v1817_v14  ;;  %v1859_v16 = vsub.s32 32, %v1858_v61  ;;  %vm6071_vm8 = vcmp.le.f32.partialorder %v1741_v19, 0.7853982 }
 0x227   : > { %v2030_v48 = vmul.f32 %v2029_v41, %v2027_v2  ;;  %v6075_v27 = vshrl.u32 %v1856_v0, 5  ;;  %v1861_v12 = vshll.u32 %v4869_v47, %v1858_v61  ;;  %v2111_v50 = vadd.s32 536870912, %v2110_v57 }
 0x228   : > { %v1816_v23 = vor.u32 %v1815_v30, %v1814_v38  ;;  %v1819_v8 = vshll.u32 %v1818_v15, 23  ;;  %v1862_v3 = vshrl.u32 %v4870_v13, %v1859_v16  ;;  %v1864_v1 = vshll.u32 %v4870_v13, %v1858_v61 }
 0x229   : > { %v2031_v60 = vxor.u32 2147483648, %v2030_v48  ;;  %v1865_v24 = vshrl.u32 %v4871_v51, %v1859_v16  ;;  %v6086_v59 = vshrl.u32 %v2111_v50, 30  ;;  %v1867_v36 = vshll.u32 %v4871_v51, %v1858_v61 }
 0x22a   : > { %v1820_v7 = vor.u32 4788187, %v1819_v8  ;;  %v1823_v40 = vcvt.s32.f32 %v1816_v23  ;;  %v1868_v42 = vshrl.u32 %v4872_v53, %v1859_v16  ;;  %v1852_v63 = vor.u32 8388608, %v1851_v37 }
 0x22b   : > { %v2032_v28 = vsel %vm1949_vm13, %v2031_v60, %v2030_v48  ;;  %v1870_v46 = vshll.u32 %v4872_v53, %v1858_v61  ;;  %v1827_v5 = vsub.s32 4, %v6003_v20  ;;  %v2113_v31 = vshll.u32 %v6086_v59, 30 }
 0x22c   : > { %v2035_v19 = vsel %vm6024_vm3, %v5888_v17, %v2032_v28  ;;  %v1821_v22 = vand.u32 2147483647, %v1820_v7  ;;  %v1863_v9 = vor.u32 %v1862_v3, %v1861_v12  ;;  %v1871_v32 = vshrl.u32 %v4873_v26, %v1859_v16 }
 0x22d   : > { %4613 = vcosq.f32 %v2035_v19  ;;  %v1866_v41 = vor.u32 %v1865_v24, %v1864_v1  ;;  %v1873_v43 = vshll.u32 %v4873_v26, %v1858_v61  ;;  %v1874_v34 = vshrl.u32 %v4874_v54, %v1859_v16 }
 0x22e   : > { %4615 = vsinq.f32 %v2035_v19  ;;  %v1824_v49 = vmul.f32 %v1823_v40, %v1821_v22  ;;  %v6096_v11 = vsub.s32 %v2110_v57, %v2113_v31  ;;  %v1869_v2 = vor.u32 %v1868_v42, %v1867_v36 }
 0x22f   : > { %v1872_v18 = vor.u32 %v1871_v32, %v1870_v46  ;;  %vm1876_vm9 = vcmp.lt.s32.totalorder %v6075_v27, 1  ;;  %v1860_v0 = vshrl.u32 %v4869_v47, %v1859_v16  ;;  %vm1879_vm10 = vcmp.lt.s32.totalorder %v6075_v27, 4 }
 0x230   : > { %v1825_v33 = vxor.u32 2147483648, %v1824_v49  ;;  %v6101_v52 = vshll.u32 %v1852_v63, 8  ;;  %v2116_v6 = vsub.s32 0, %v6096_v11  ;;  %vm1877_vm11 = vcmp.lt.s32.totalorder %v6075_v27, 2 }
 0x231   : > { %vm1878_vm12 = vcmp.lt.s32.totalorder %v6075_v27, 3  ;;  %v1881_v10 = vsel %vm1879_vm10, %v1869_v2, 2102212464  ;;  %vm2041_vm13 = vcmp.lt.s32.totalorder %v6066_v62, 2  ;;  %v1875_v14 = vor.u32 %v1874_v34, %v1873_v43 }
 0x232   : > { %v1826_v38 = vsel %vm1743_vm7, %v1825_v33, %v1824_v49  ;;  %v1884_v48 = vsel %vm1876_vm9, %v1863_v9, %v1866_v41  ;;  %v1885_v37 = vsel %vm1879_vm10, %v1872_v18, 920167782  ;;  %vm2039_vm14 = vweird.f32 %v5888_v17 }
 0x233   : > { %vm2042_vm15 = vcmp.eq.s32.totalorder %v6066_v62, 0  ;;  %v1828_v61 = vsel %vm1743_vm7, %v1827_v5, %v6003_v20  ;;  %v1829_v30 = vsel %vm6071_vm8, %v5891_v25, %v1826_v38  ;;  %v3817_v15 = vmin.u32 %v2116_v6, %v6096_v11 }
 0x234   : > { %4617 = vcosq.f32 %v1829_v30  ;;  %v1880_v39 = vsel %vm1876_vm9, %v1860_v0, %v1863_v9  ;;  %v1882_v60 = vsel %vm1878_vm12, %v1866_v41, %v1881_v10  ;;  %v1886_v57 = vsel %vm1878_vm12, %v1869_v2, %v1885_v37 }
 0x235   : > { %4619 = vsinq.f32 %v1829_v30  ;;  %vm2052_vm0 = vcmp.lt.s32.totalorder %v5898_v58, 0  ;;  %v2118_v20 = vclz %v3817_v15  ;;  %v1887_v16 = vsel %vm1877_vm11, %v1884_v48, %v1886_v57 }
 0x236   : > { %v1888_v23 = vsel %vm1876_vm9, %v1866_v41, %v1869_v2  ;;  %vm2045_vm1 = vcmp.eq.s32.totalorder %v6066_v62, 2  ;;  %v1889_v8 = vsel %vm1879_vm10, %v1875_v14, 1326507024  ;;  %v1830_v50 = vsel %vm6071_vm8, 0, %v1828_v61 }
 0x237   : > { %v6139_v12 = vmul.u32.u64.low %v6101_v52, %v1887_v16  ;;  %v6140_v28 = vmul.u32.u64.high %v6101_v52, %v1887_v16, %v6139_v12  ;;  %v2106_v3 = vadd.s32 %v6037_v29, %v6049_v45  ;;  %v3818_v1 = vadd.s32 4294967294, %v2118_v20 }
 0x238   : > { %v1890_v19 = vsel %vm1878_vm12, %v1872_v18, %v1889_v8  ;;  %v2136_v40 = vsub.s32 4, %v6086_v59  ;;  %v1883_v24 = vsel %vm1877_vm11, %v1880_v39, %v1882_v60  ;;  %v2259_v42 = vand.u32 2139095040, %v6064_v4  ;;  %v1706_v39 = vld [vmem:[#allocation2 + $0x50] sm:$0xff] }
 0x239   : > { %v1891_v36 = vsel %vm1877_vm11, %v1888_v23, %v1890_v19  ;;  %vm6157_vm2 = vcmp.le.f32.partialorder %v2050_v55, 0.7853982  ;;  %vm3819_vm3 = vcmp.lt.s32.totalorder %v3818_v1, 0  ;;  %v1902_v27 = vadd.s32 1, %v6140_v28 }
 0x23a   : > { %v4614_v7 = vpop.eup %4613  ;;  %v6162_v45 = vmul.u32.u64.low %v6101_v52, %v1891_v36  ;;  %v6163_v63 = vmul.u32.u64.high %v6101_v52, %v1891_v36, %v6162_v45  ;;  %v2121_v5 = vsel %vm3819_vm3, 0, %v3818_v1  ;;  %v2260_v31 = vshrl.u32 %v2259_v42, 23 }
 0x23b   : > { %v4616_v21 = vpop.eup %4615  ;;  %v2046_v22 = vxor.u32 2147483648, %v4614_v7  ;;  %v2122_v32 = vsub.s32 32, %v2121_v5  ;;  %v2123_v55 = vshll.u32 %v6096_v11, %v2121_v5  ;;  %v2126_v49 = vsub.s32 4294967266, %v2121_v5 }
 0x23c   : > { %v2043_v46 = vxor.u32 2147483648, %v4616_v21  ;;  %v1834_v43 = vand.u32 3, %v1830_v50  ;;  %v1899_v34 = vmul.u32 %v6101_v52, %v1883_v24  ;;  %v3824_v2 = vadd.s32 4294967169, %v2260_v31 }
 0x23d   : > { %v2047_v9 = vsel %vm2045_vm1, %v2046_v22, %v4616_v21  ;;  %v2124_v33 = vshrl.u32 %v2106_v3, %v2122_v32  ;;  %v2127_v0 = vadd.s32 127, %v2126_v49  ;;  %v2256_v6 = vand.u32 2147483647, %v6064_v4 }
 0x23e   : > { %v2044_v41 = vsel %vm2042_vm15, %v4614_v7, %v2043_v46  ;;  %v2137_v11 = vsel %vm2052_vm0, %v2136_v40, %v6086_v59  ;;  %vm1901_vm4 = vc.u32 %v6163_v63, %v6139_v12  ;;  %v2266_v38 = vadd.s32 1, %v3824_v2 }
 0x23f   : > { %v2048_v18 = vsel %vm2041_vm13, %v2044_v41, %v2047_v9  ;;  %v2125_v14 = vor.u32 %v2124_v33, %v2123_v55  ;;  %v2128_v62 = vshll.u32 %v2127_v0, 23  ;;  %v1903_v48 = vsel %vm1901_vm4, %v1902_v27, %v6140_v28 }
 0x240   : > { %v2049_v10 = vsel %vm2039_vm14, nan, %v2048_v18  ;;  %vm1836_vm5 = vcmp.eq.s32.totalorder %v1834_v43, 0  ;;  %vm1839_vm6 = vcmp.eq.s32.totalorder %v1834_v43, 2  ;;  %v1904_v37 = vadd.s32 %v1903_v48, %v1899_v34 }
 0x241   : > { %v3407_v52 = vmul.f32 %v2049_v10, %v2049_v10  ;;  %3391 = vst [vmem:[%s5141_s30 + $0x10] sm:$0xff] %v2049_v10  ;;  %vm2267_vm7 = vcmp.gt.s32.totalorder %v2266_v38, 0  ;;  %v4618_v17 = vpop.eup %4617  ;;  %v2129_v61 = vor.u32 4788187, %v2128_v62  ;;  %v2132_v30 = vcvt.s32.f32 %v2125_v14 }
 0x242   : > { %v2263_v59 = vand.u32 8388607, %v2256_v6  ;;  %v2268_v15 = vsel %vm2267_vm7, %v2266_v38, 0  ;;  %v4620_v60 = vpop.eup %4619  ;;  %v1840_v57 = vxor.u32 2147483648, %v4618_v17  ;;  %v2139_v20 = vsel %vm6157_vm2, 0, %v2137_v11 }
 0x243   : > { %3425 = vadd.xlane.f32.xlu1 %v3407_v52  ;;  %v1905_v16 = vadd.s32 536870912, %v1904_v37  ;;  %v2270_v23 = vand.u32 31, %v2268_v15  ;;  %vm1833_vm8 = vweird.f32 %v5891_v25  ;;  %vm1835_vm9 = vcmp.lt.s32.totalorder %v1834_v43, 2 }
 0x244   : > { %v1837_v8 = vxor.u32 2147483648, %v4620_v60  ;;  %v2130_v28 = vand.u32 2147483647, %v2129_v61  ;;  %v1841_v50 = vsel %vm1839_vm6, %v1840_v57, %v4620_v60  ;;  %v6193_v19 = vadd.f32 %v5885_v56, %v1706_v39 }
 0x245   : > { %v6190_v3 = vshrl.u32 %v1905_v16, 30  ;;  %v2271_v1 = vsub.s32 32, %v2270_v23  ;;  %v6196_v24 = vand.u32 3, %v2139_v20  ;;  %v2264_v36 = vor.u32 8388608, %v2263_v59 }
 0x246   : > { %v1838_v7 = vsel %vm1836_vm5, %v4618_v17, %v1837_v8  ;;  %v2133_v40 = vmul.f32 %v2132_v30, %v2130_v28  ;;  %v2273_v22 = vshll.u32 %v4869_v47, %v2270_v23  ;;  %v2276_v45 = vshll.u32 %v4870_v13, %v2270_v23 }
 0x247   : > { %v1842_v42 = vsel %vm1835_vm9, %v1838_v7, %v1841_v50  ;;  %v1907_v21 = vshll.u32 %v6190_v3, 30  ;;  %v2274_v27 = vshrl.u32 %v4870_v13, %v2271_v1  ;;  %v2277_v31 = vshrl.u32 %v4871_v51, %v2271_v1 }
 0x248   : > { %v1843_v46 = vsel %vm1833_vm8, nan, %v1842_v42  ;;  %v2134_v5 = vxor.u32 2147483648, %v2133_v40  ;;  %v2279_v55 = vshll.u32 %v4871_v51, %v2270_v23  ;;  %v2280_v49 = vshrl.u32 %v4872_v53, %v2271_v1 }
 0x249   : > { %v3405_v9 = vmul.f32 %v1843_v46, %v1843_v46  ;;  %3389 = vst [vmem:[%s5141_s30] sm:$0xff] %v1843_v46  ;;  %v6206_v32 = vsub.s32 %v1904_v37, %v1907_v21  ;;  %v2269_v43 = vshrl.u32 %v2268_v15, 5  ;;  %v2153_v25 = vand.u32 2147483647, %v6193_v19 }
 0x24a   : > { %v2135_v41 = vsel %vm2052_vm0, %v2134_v5, %v2133_v40  ;;  %v2156_v34 = vand.u32 2139095040, %v6193_v19  ;;  %v2275_v33 = vor.u32 %v2274_v27, %v2273_v22  ;;  %v2278_v0 = vor.u32 %v2277_v31, %v2276_v45 }
 0x24b   : > { %3421 = vadd.xlane.f32.xlu0 %v3405_v9  ;;  %v2138_v2 = vsel %vm6157_vm2, %v5898_v58, %v2135_v41  ;;  %v1910_v18 = vsub.s32 0, %v6206_v32  ;;  %v2282_v10 = vshll.u32 %v4872_v53, %v2270_v23  ;;  %v2283_v11 = vshrl.u32 %v4873_v26, %v2271_v1 }
 0x24c   : > { %4621 = vcosq.f32 %v2138_v2  ;;  %v2285_v38 = vshll.u32 %v4873_v26, %v2270_v23  ;;  %v2272_v14 = vshrl.u32 %v4869_v47, %v2271_v1  ;;  %v2281_v62 = vor.u32 %v2280_v49, %v2279_v55 }
 0x24d   : > { %4623 = vsinq.f32 %v2138_v2  ;;  %v3809_v52 = vmin.u32 %v1910_v18, %v6206_v32  ;;  %v2284_v48 = vor.u32 %v2283_v11, %v2282_v10  ;;  %v2286_v29 = vshrl.u32 %v4874_v54, %v2271_v1 }
 0x24e   : > { %vm2288_vm10 = vcmp.lt.s32.totalorder %v2269_v43, 1  ;;  %v2157_v37 = vshrl.u32 %v2156_v34, 23  ;;  %vm2290_vm11 = vcmp.lt.s32.totalorder %v2269_v43, 3  ;;  %vm2291_vm12 = vcmp.lt.s32.totalorder %v2269_v43, 4 }
 0x24f   : > { %v1912_v17 = vclz %v3809_v52  ;;  %v2304_v61 = vshll.u32 %v2264_v36, 8  ;;  %v2287_v30 = vor.u32 %v2286_v29, %v2285_v38  ;;  %vm2289_vm13 = vcmp.lt.s32.totalorder %v2269_v43, 2 }
 0x250   : > { %v2293_v59 = vsel %vm2291_vm12, %v2281_v62, 2102212464  ;;  %v2296_v15 = vsel %vm2288_vm10, %v2275_v33, %v2278_v0  ;;  %v2292_v60 = vsel %vm2288_vm10, %v2272_v14, %v2275_v33  ;;  %v2297_v57 = vsel %vm2291_vm12, %v2284_v48, 920167782 }
 0x251   : > { %v3810_v39 = vadd.s32 4294967294, %v1912_v17  ;;  %v2300_v20 = vsel %vm2288_vm10, %v2278_v0, %v2281_v62  ;;  %v2294_v16 = vsel %vm2290_vm11, %v2278_v0, %v2293_v59  ;;  %v2298_v23 = vsel %vm2290_vm11, %v2281_v62, %v2297_v57 }
 0x252   : > { %v2301_v8 = vsel %vm2291_vm12, %v2287_v30, 1326507024  ;;  %v3820_v28 = vadd.s32 4294967169, %v2157_v37  ;;  %v1900_v50 = vadd.s32 %v6139_v12, %v6163_v63  ;;  %v2299_v1 = vsel %vm2289_vm13, %v2296_v15, %v2298_v23 }
 0x253   : > { %vm3811_vm14 = vcmp.lt.s32.totalorder %v3810_v39, 0  ;;  %v2302_v7 = vsel %vm2290_vm11, %v2284_v48, %v2301_v8  ;;  %vm2142_vm15 = vweird.f32 %v5898_v58  ;;  %v2295_v12 = vsel %vm2289_vm13, %v2292_v60, %v2294_v16 }
 0x254   : > { %v1915_v40 = vsel %vm3811_vm14, 0, %v3810_v39  ;;  %v2303_v36 = vsel %vm2289_vm13, %v2300_v20, %v2302_v7  ;;  %v6232_v42 = vmul.u32.u64.low %v2304_v61, %v2299_v1  ;;  %v6233_v21 = vmul.u32.u64.high %v2304_v61, %v2299_v1, %v6232_v42 }
 0x255   : > { %v1916_v22 = vsub.s32 32, %v1915_v40  ;;  %v1917_v45 = vshll.u32 %v6206_v32, %v1915_v40  ;;  %v1920_v46 = vsub.s32 4294967266, %v1915_v40  ;;  %v1930_v63 = vsub.s32 4, %v6190_v3 }
 0x256   : > { %v6239_v5 = vmul.u32.u64.low %v2304_v61, %v2303_v36  ;;  %v6240_v27 = vmul.u32.u64.high %v2304_v61, %v2303_v36, %v6239_v5  ;;  %v2163_v31 = vadd.s32 1, %v3820_v28  ;;  %vm2144_vm0 = vcmp.lt.s32.totalorder %v6196_v24, 2 }
 0x257   : > { %vm1846_vm1 = vcmp.lt.s32.totalorder %v5983_v44, 0  ;;  %v1918_v9 = vshrl.u32 %v1900_v50, %v1916_v22  ;;  %v1921_v55 = vadd.s32 127, %v1920_v46  ;;  %vm2148_vm2 = vcmp.eq.s32.totalorder %v6196_v24, 2 }
 0x258   : > { %v2311_v49 = vmul.u32 %v2304_v61, %v2295_v12  ;;  %v2314_v32 = vadd.s32 1, %v6233_v21  ;;  %vm2164_vm3 = vcmp.gt.s32.totalorder %v2163_v31, 0  ;;  %v2160_v2 = vand.u32 8388607, %v2153_v25 }
 0x259   : > { %v4622_v41 = vpop.eup %4621  ;;  %v1919_v43 = vor.u32 %v1918_v9, %v1917_v45  ;;  %v1922_v34 = vshll.u32 %v1921_v55, 23  ;;  %v2165_v18 = vsel %vm2164_vm3, %v2163_v31, 0  ;;  %vm2145_vm4 = vcmp.eq.s32.totalorder %v6196_v24, 0 }
 0x25a   : > { %v4624_v33 = vpop.eup %4623  ;;  %v2149_v0 = vxor.u32 2147483648, %v4622_v41  ;;  %v1931_v10 = vsel %vm1846_vm1, %v1930_v63, %v6190_v3  ;;  %vm2313_vm5 = vc.u32 %v6240_v27, %v6232_v42  ;;  %vm6259_vm6 = vcmp.le.f32.partialorder %v1844_v35, 0.7853982 }
 0x25b   : > { %v2146_v11 = vxor.u32 2147483648, %v4624_v33  ;;  %v1923_v38 = vor.u32 4788187, %v1922_v34  ;;  %v1926_v52 = vcvt.s32.f32 %v1919_v43  ;;  %v2315_v14 = vsel %vm2313_vm5, %v2314_v32, %v6233_v21  ;;  %v1709_v32 = vld [vmem:[#allocation2 + $0x48] sm:$0xff] }
 0x25c   : > { %v2150_v62 = vsel %vm2148_vm2, %v2149_v0, %v4624_v33  ;;  %v2316_v29 = vadd.s32 %v2315_v14, %v2311_v49  ;;  %v2167_v3 = vand.u32 31, %v2165_v18  ;;  %v1933_v61 = vsel %vm6259_vm6, 0, %v1931_v10 }
 0x25d   : > { %v2147_v37 = vsel %vm2145_vm4, %v4622_v41, %v2146_v11  ;;  %v1924_v17 = vand.u32 2147483647, %v1923_v38  ;;  %v2161_v30 = vor.u32 8388608, %v2160_v2  ;;  %v2166_v39 = vshrl.u32 %v2165_v18, 5 }
 0x25e   : > { %v2151_v59 = vsel %vm2144_vm0, %v2147_v37, %v2150_v62  ;;  %v2317_v15 = vadd.s32 536870912, %v2316_v29  ;;  %v2168_v60 = vsub.s32 32, %v2167_v3  ;;  %v2170_v20 = vshll.u32 %v4869_v47, %v2167_v3 }
 0x25f   : > { %v2152_v35 = vsel %vm2142_vm15, nan, %v2151_v59  ;;  %v1927_v57 = vmul.f32 %v1926_v52, %v1924_v17  ;;  %v2173_v16 = vshll.u32 %v4870_v13, %v2167_v3  ;;  %v2176_v24 = vshll.u32 %v4871_v51, %v2167_v3  ;;  %v1708_v17 = vld [vmem:[#allocation2 + $0x8] sm:$0xff] }
 0x260   : > { %3392 = vst [vmem:[%s5141_s30 + $0x18] sm:$0xff] %v2152_v35  ;;  %v3408_v23 = vmul.f32 %v2152_v35, %v2152_v35  ;;  %v6272_v8 = vshrl.u32 %v2317_v15, 30  ;;  %v2171_v28 = vshrl.u32 %v4870_v13, %v2168_v60  ;;  %v2174_v1 = vshrl.u32 %v4871_v51, %v2168_v60 }
 0x261   : > { %v1928_v50 = vxor.u32 2147483648, %v1927_v57  ;;  %v2177_v7 = vshrl.u32 %v4872_v53, %v2168_v60  ;;  %v2179_v58 = vshll.u32 %v4872_v53, %v2167_v3  ;;  %v2180_v36 = vshrl.u32 %v4873_v26, %v2168_v60 }
 0x262   : > { %3427 = vadd.xlane.f32.xlu1 %v3408_v23  ;;  %v2319_v40 = vshll.u32 %v6272_v8, 30  ;;  %vm2185_vm7 = vcmp.lt.s32.totalorder %v2166_v39, 1  ;;  %v6281_v21 = vshll.u32 %v2161_v30, 8  ;;  %v2172_v45 = vor.u32 %v2171_v28, %v2170_v20  ;;  %v6333_v23 = vld [vmem:[%s5134_s23] ss:$0 sm:$0xff] }
 0x263   : > { %v1929_v22 = vsel %vm1846_vm1, %v1928_v50, %v1927_v57  ;;  %v2175_v46 = vor.u32 %v2174_v1, %v2173_v16  ;;  %v2182_v12 = vshll.u32 %v4873_v26, %v2167_v3  ;;  %v2169_v31 = vshrl.u32 %v4869_v47, %v2168_v60 }
 0x264   : > { %v1932_v63 = vsel %vm6259_vm6, %v5983_v44, %v1929_v22  ;;  %v6289_v5 = vsub.s32 %v2316_v29, %v2319_v40  ;;  %v2181_v9 = vor.u32 %v2180_v36, %v2179_v58  ;;  %v2178_v55 = vor.u32 %v2177_v7, %v2176_v24 }
 0x265   : > { %4625 = vcosq.f32 %v1932_v63  ;;  %v2183_v49 = vshrl.u32 %v4874_v54, %v2168_v60  ;;  %vm2188_vm8 = vcmp.lt.s32.totalorder %v2166_v39, 4  ;;  %vm2186_vm9 = vcmp.lt.s32.totalorder %v2166_v39, 2 }
 0x266   : > { %4627 = vsinq.f32 %v1932_v63  ;;  %v2322_v41 = vsub.s32 0, %v6289_v5  ;;  %vm2187_vm10 = vcmp.lt.s32.totalorder %v2166_v39, 3  ;;  %v2190_v34 = vsel %vm2188_vm8, %v2178_v55, 2102212464 }
 0x267   : > { %v2184_v43 = vor.u32 %v2183_v49, %v2182_v12  ;;  %v2193_v2 = vsel %vm2185_vm7, %v2172_v45, %v2175_v46  ;;  %v2194_v18 = vsel %vm2188_vm8, %v2181_v9, 920167782  ;;  %v6297_v33 = vand.u32 3, %v1933_v61 }
 0x268   : > { %v3825_v0 = vmin.u32 %v2322_v41, %v6289_v5  ;;  %v2189_v10 = vsel %vm2185_vm7, %v2169_v31, %v2172_v45  ;;  %v6302_v11 = vadd.f32 %v5885_v56, %v1709_v32  ;;  %v2191_v38 = vsel %vm2187_vm10, %v2175_v46, %v2190_v34 }
 0x269   : > { %v2195_v52 = vsel %vm2187_vm10, %v2178_v55, %v2194_v18  ;;  %v2197_v14 = vsel %vm2185_vm7, %v2175_v46, %v2178_v55  ;;  %v2198_v62 = vsel %vm2188_vm8, %v2184_v43, 1326507024  ;;  %v2342_v29 = vsub.s32 4, %v6272_v8 }
 0x26a   : > { %v2324_v48 = vclz %v3825_v0  ;;  %v2196_v3 = vsel %vm2186_vm9, %v2193_v2, %v2195_v52  ;;  %v2199_v37 = vsel %vm2187_vm10, %v2181_v9, %v2198_v62  ;;  %v2462_v59 = vand.u32 2147483647, %v6302_v11 }
 0x26b   : > { %v2200_v56 = vsel %vm2186_vm9, %v2197_v14, %v2199_v37  ;;  %v6313_v61 = vmul.u32.u64.low %v6281_v21, %v2196_v3  ;;  %v6314_v30 = vmul.u32.u64.high %v6281_v21, %v2196_v3, %v6313_v61  ;;  %v2192_v60 = vsel %vm2186_vm9, %v2189_v10, %v2191_v38 }
 0x26c   : > { %v3826_v15 = vadd.s32 4294967294, %v2324_v48  ;;  %v6320_v35 = vmul.u32.u64.low %v6281_v21, %v2200_v56  ;;  %v6321_v57 = vmul.u32.u64.high %v6281_v21, %v2200_v56, %v6320_v35  ;;  %vm1936_vm11 = vweird.f32 %v5983_v44 }
 0x26d   : > { %vm6326_vm12 = vcmp.le.f32.partialorder %v2256_v6, 0.7853982  ;;  %vm2258_vm13 = vcmp.lt.s32.totalorder %v6064_v4, 0  ;;  %v2465_v16 = vand.u32 2139095040, %v6302_v11  ;;  %v6336_v39 = vadd.f32 %v6333_v23, %v1708_v17 }
 0x26e   : > { %vm1938_vm14 = vcmp.lt.s32.totalorder %v6297_v33, 2  ;;  %v2312_v28 = vadd.s32 %v6232_v42, %v6240_v27  ;;  %vm3827_vm15 = vcmp.lt.s32.totalorder %v3826_v15, 0  ;;  %v2343_v6 = vsel %vm2258_vm13, %v2342_v29, %v6272_v8 }
 0x26f   : > { %v2327_v24 = vsel %vm3827_vm15, 0, %v3826_v15  ;;  %v2208_v50 = vmul.u32 %v6281_v21, %v2192_v60  ;;  %v2211_v1 = vadd.s32 1, %v6314_v30  ;;  %v2466_v7 = vshrl.u32 %v2465_v16, 23 }
 0x270   : > { %v2328_v58 = vsub.s32 32, %v2327_v24  ;;  %v2329_v40 = vshll.u32 %v6289_v5, %v2327_v24  ;;  %v2332_v36 = vsub.s32 4294967266, %v2327_v24  ;;  %v2469_v22 = vand.u32 8388607, %v2462_v59 }
 0x271   : > { %vm1939_vm0 = vcmp.eq.s32.totalorder %v6297_v33, 0  ;;  %vm2210_vm1 = vc.u32 %v6321_v57, %v6313_v61  ;;  %v3832_v42 = vadd.s32 4294967169, %v2466_v7  ;;  %v2362_v27 = vand.u32 2139095040, %v6336_v39 }
 0x272   : > { %v4626_v8 = vpop.eup %4625  ;;  %vm1942_vm2 = vcmp.eq.s32.totalorder %v6297_v33, 2  ;;  %v2330_v21 = vshrl.u32 %v2312_v28, %v2328_v58  ;;  %v2333_v45 = vadd.s32 127, %v2332_v36  ;;  %v2212_v46 = vsel %vm2210_vm1, %v2211_v1, %v6314_v30 }
 0x273   : > { %v4628_v12 = vpop.eup %4627  ;;  %v1943_v63 = vxor.u32 2147483648, %v4626_v8  ;;  %v2345_v5 = vsel %vm6326_vm12, 0, %v2343_v6  ;;  %v2213_v31 = vadd.s32 %v2212_v46, %v2208_v50  ;;  %v2472_v9 = vadd.s32 1, %v3832_v42 }
 0x274   : > { %v1940_v55 = vxor.u32 2147483648, %v4628_v12  ;;  %v2331_v49 = vor.u32 %v2330_v21, %v2329_v40  ;;  %v2334_v32 = vshll.u32 %v2333_v45, 23  ;;  %v2470_v41 = vor.u32 8388608, %v2469_v22 }
 0x275   : > { %v1944_v43 = vsel %vm1942_vm2, %v1943_v63, %v4628_v12  ;;  %v2214_v34 = vadd.s32 536870912, %v2213_v31  ;;  %vm2473_vm3 = vcmp.gt.s32.totalorder %v2472_v9, 0  ;;  %v2363_v2 = vshrl.u32 %v2362_v27, 23 }
 0x276   : > { %v1941_v18 = vsel %vm1939_vm0, %v4626_v8, %v1940_v55  ;;  %v2335_v0 = vor.u32 4788187, %v2334_v32  ;;  %v2338_v10 = vcvt.s32.f32 %v2331_v49  ;;  %v2474_v38 = vsel %vm2473_vm3, %v2472_v9, 0 }
 0x277   : > { %v1945_v52 = vsel %vm1938_vm14, %v1941_v18, %v1944_v43  ;;  %v6361_v14 = vshrl.u32 %v2214_v34, 30  ;;  %v2476_v62 = vand.u32 31, %v2474_v38  ;;  %v6365_v3 = vand.u32 3, %v2345_v5 }
 0x278   : > { %v1946_v48 = vsel %vm1936_vm11, nan, %v1945_v52  ;;  %v2336_v29 = vand.u32 2147483647, %v2335_v0  ;;  %v2359_v30 = vand.u32 2147483647, %v6336_v39  ;;  %v2209_v33 = vadd.s32 %v6313_v61, %v6321_v57 }
 0x279   : > { %3390 = vst [vmem:[%s5141_s30 + $0x8] sm:$0xff] %v1946_v48  ;;  %v3406_v37 = vmul.f32 %v1946_v48, %v1946_v48  ;;  %v2216_v17 = vshll.u32 %v6361_v14, 30  ;;  %v2477_v56 = vsub.s32 32, %v2476_v62  ;;  %v6372_v60 = vshll.u32 %v2470_v41, 8 }
 0x27a   : > { %v2339_v15 = vmul.f32 %v2338_v10, %v2336_v29  ;;  %v3828_v35 = vadd.s32 4294967169, %v2363_v2  ;;  %v2479_v16 = vshll.u32 %v4869_v47, %v2476_v62  ;;  %v2482_v6 = vshll.u32 %v4870_v13, %v2476_v62 }
 0x27b   : > { %3423 = vadd.xlane.f32.xlu0 %v3406_v37  ;;  %v6374_v44 = vsub.s32 %v2213_v31, %v2216_v17  ;;  %v2480_v28 = vshrl.u32 %v4870_v13, %v2477_v56  ;;  %v2483_v50 = vshrl.u32 %v4871_v51, %v2477_v56  ;;  %v2485_v1 = vshll.u32 %v4871_v51, %v2476_v62 }
 0x27c   : > { %v2340_v24 = vxor.u32 2147483648, %v2339_v15  ;;  %v2486_v7 = vshrl.u32 %v4872_v53, %v2477_v56  ;;  %v2475_v57 = vshrl.u32 %v2474_v38, 5  ;;  %v2488_v58 = vshll.u32 %v4872_v53, %v2476_v62 }
 0x27d   : > { %v2219_v61 = vsub.s32 0, %v6374_v44  ;;  %v6386_v40 = vand.u32 8388607, %v2359_v30  ;;  %v2478_v22 = vshrl.u32 %v4869_v47, %v2477_v56  ;;  %v2489_v42 = vshrl.u32 %v4873_v26, %v2477_v56 }
 0x27e   : > { %v2341_v36 = vsel %vm2258_vm13, %v2340_v24, %v2339_v15  ;;  %v2369_v27 = vadd.s32 1, %v3828_v35  ;;  %v2481_v45 = vor.u32 %v2480_v28, %v2479_v16  ;;  %v2484_v46 = vor.u32 %v2483_v50, %v2482_v6  ;;  %v1711_v15 = vld [vmem:[#allocation2 + $0x20] sm:$0xff] }
 0x27f   : > { %v2344_v8 = vsel %vm6326_vm12, %v6064_v4, %v2341_v36  ;;  %v3821_v21 = vmin.u32 %v2219_v61, %v6374_v44  ;;  %v2487_v12 = vor.u32 %v2486_v7, %v2485_v1  ;;  %v2490_v63 = vor.u32 %v2489_v42, %v2488_v58 }
 0x280   : > { %4629 = vcosq.f32 %v2344_v8  ;;  %v2491_v5 = vshll.u32 %v4873_v26, %v2476_v62  ;;  %v2492_v9 = vshrl.u32 %v4874_v54, %v2477_v56  ;;  %vm2494_vm4 = vcmp.lt.s32.totalorder %v2475_v57, 1 }
 0x281   : > { %4631 = vsinq.f32 %v2344_v8  ;;  %v2221_v31 = vclz %v3821_v21  ;;  %vm2495_vm5 = vcmp.lt.s32.totalorder %v2475_v57, 2  ;;  %vm2496_vm6 = vcmp.lt.s32.totalorder %v2475_v57, 3 }
 0x282   : > { %vm2497_vm7 = vcmp.lt.s32.totalorder %v2475_v57, 4  ;;  %v2498_v55 = vsel %vm2494_vm4, %v2478_v22, %v2481_v45  ;;  %v2493_v49 = vor.u32 %v2492_v9, %v2491_v5  ;;  %v2502_v41 = vsel %vm2494_vm4, %v2481_v45, %v2484_v46 }
 0x283   : > { %v3822_v20 = vadd.s32 4294967294, %v2221_v31  ;;  %v2499_v32 = vsel %vm2497_vm7, %v2487_v12, 2102212464  ;;  %v2503_v34 = vsel %vm2497_vm7, %v2490_v63, 920167782  ;;  %v2506_v2 = vsel %vm2494_vm4, %v2484_v46, %v2487_v12 }
 0x284   : > { %v2500_v43 = vsel %vm2496_vm6, %v2484_v46, %v2499_v32  ;;  %v2367_v18 = vor.u32 8388608, %v6386_v40  ;;  %v2504_v0 = vsel %vm2496_vm6, %v2487_v12, %v2503_v34  ;;  %v2507_v10 = vsel %vm2497_vm7, %v2493_v49, 1326507024 }
 0x285   : > { %vm3823_vm8 = vcmp.lt.s32.totalorder %v3822_v20, 0  ;;  %vm2370_vm9 = vcmp.gt.s32.totalorder %v2369_v27, 0  ;;  %v2501_v52 = vsel %vm2495_vm5, %v2498_v55, %v2500_v43  ;;  %v2505_v62 = vsel %vm2495_vm5, %v2502_v41, %v2504_v0 }
 0x286   : > { %v2224_v38 = vsel %vm3823_vm8, 0, %v3822_v20  ;;  %v2508_v48 = vsel %vm2496_vm6, %v2490_v63, %v2507_v10  ;;  %vm2348_vm10 = vweird.f32 %v6064_v4  ;;  %v2239_v1 = vsub.s32 4, %v6361_v14 }
 0x287   : > { %v2225_v29 = vsub.s32 32, %v2224_v38  ;;  %v2226_v37 = vshll.u32 %v6374_v44, %v2224_v38  ;;  %v2229_v17 = vsub.s32 4294967266, %v2224_v38  ;;  %v2509_v56 = vsel %vm2495_vm5, %v2506_v2, %v2508_v48 }
 0x288   : > { %v6408_v35 = vmul.u32.u64.low %v6372_v60, %v2509_v56  ;;  %v6409_v16 = vmul.u32.u64.high %v6372_v60, %v2509_v56, %v6408_v35  ;;  %v6412_v28 = vmul.u32.u64.low %v6372_v60, %v2505_v62  ;;  %v6413_v6 = vmul.u32.u64.high %v6372_v60, %v2505_v62, %v6412_v28 }
 0x289   : > { %v2227_v24 = vshrl.u32 %v2209_v33, %v2225_v29  ;;  %v2230_v50 = vadd.s32 127, %v2229_v17  ;;  %v2371_v44 = vsel %vm2370_vm9, %v2369_v27, 0  ;;  %vm2350_vm11 = vcmp.lt.s32.totalorder %v6365_v3, 2 }
 0x28a   : > { %vm2155_vm12 = vcmp.lt.s32.totalorder %v6193_v19, 0  ;;  %v2373_v7 = vand.u32 31, %v2371_v44  ;;  %v6421_v61 = vadd.f32 %v6333_v23, %v1711_v15  ;;  %vm2351_vm13 = vcmp.eq.s32.totalorder %v6365_v3, 0 }
 0x28b   : > { %vm6426_vm14 = vcmp.le.f32.partialorder %v2153_v25, 0.7853982  ;;  %v2228_v33 = vor.u32 %v2227_v24, %v2226_v37  ;;  %v2231_v58 = vshll.u32 %v2230_v50, 23  ;;  %v2517_v40 = vmul.u32 %v6372_v60, %v2501_v52 }
 0x28c   : > { %vm2354_vm15 = vcmp.eq.s32.totalorder %v6365_v3, 2  ;;  %vm2519_vm0 = vc.u32 %v6409_v16, %v6412_v28  ;;  %v2520_v36 = vadd.s32 1, %v6413_v6  ;;  %v2374_v22 = vsub.s32 32, %v2373_v7 }
 0x28d   : > { %v4630_v42 = vpop.eup %4629  ;;  %v2232_v27 = vor.u32 4788187, %v2231_v58  ;;  %v2235_v8 = vcvt.s32.f32 %v2228_v33  ;;  %v2240_v25 = vsel %vm2155_vm12, %v2239_v1, %v6361_v14  ;;  %v6438_v21 = vshll.u32 %v2367_v18, 8 }
 0x28e   : > { %v4632_v45 = vpop.eup %4631  ;;  %v2355_v46 = vxor.u32 2147483648, %v4630_v42  ;;  %v2521_v60 = vsel %vm2519_vm0, %v2520_v36, %v6413_v6  ;;  %v2372_v12 = vshrl.u32 %v2371_v44, 5  ;;  %v2376_v63 = vshll.u32 %v4869_v47, %v2373_v7 }
 0x28f   : > { %v2352_v5 = vxor.u32 2147483648, %v4632_v45  ;;  %v2233_v31 = vand.u32 2147483647, %v2232_v27  ;;  %v2522_v9 = vadd.s32 %v2521_v60, %v2517_v40  ;;  %v2379_v55 = vshll.u32 %v4870_v13, %v2373_v7 }
 0x290   : > { %v2356_v20 = vsel %vm2354_vm15, %v2355_v46, %v4632_v45  ;;  %v2377_v14 = vshrl.u32 %v4870_v13, %v2374_v22  ;;  %v2380_v49 = vshrl.u32 %v4871_v51, %v2374_v22  ;;  %v2382_v32 = vshll.u32 %v4871_v51, %v2373_v7 }
 0x291   : > { %v2353_v41 = vsel %vm2351_vm13, %v4630_v42, %v2352_v5  ;;  %v2236_v43 = vmul.f32 %v2235_v8, %v2233_v31  ;;  %v2523_v34 = vadd.s32 536870912, %v2522_v9  ;;  %v2383_v2 = vshrl.u32 %v4872_v53, %v2374_v22 }
 0x292   : > { %v2357_v18 = vsel %vm2350_vm11, %v2353_v41, %v2356_v20  ;;  %v2375_v0 = vshrl.u32 %v4869_v47, %v2374_v22  ;;  %v2385_v10 = vshll.u32 %v4872_v53, %v2373_v7  ;;  %v2386_v38 = vshrl.u32 %v4873_v26, %v2374_v22 }
 0x293   : > { %v2358_v52 = vsel %vm2348_vm10, nan, %v2357_v18  ;;  %v2237_v62 = vxor.u32 2147483648, %v2236_v43  ;;  %v6458_v48 = vshrl.u32 %v2523_v34, 30  ;;  %v2388_v29 = vshll.u32 %v4873_v26, %v2373_v7 }
 0x294   : > { %3394 = vst [vmem:[%s5141_s30 + $0x28] sm:$0xff] %v2358_v52  ;;  %v3410_v37 = vmul.f32 %v2358_v52, %v2358_v52  ;;  %v2378_v17 = vor.u32 %v2377_v14, %v2376_v63  ;;  %v2381_v56 = vor.u32 %v2380_v49, %v2379_v55  ;;  %v2389_v3 = vshrl.u32 %v4874_v54, %v2374_v22 }
 0x295   : > { %v2238_v15 = vsel %vm2155_vm12, %v2237_v62, %v2236_v43  ;;  %v2525_v35 = vshll.u32 %v6458_v48, 30  ;;  %v2384_v6 = vor.u32 %v2383_v2, %v2382_v32  ;;  %v2387_v24 = vor.u32 %v2386_v38, %v2385_v10 }
 0x296   : > { %3431 = vadd.xlane.f32.xlu1 %v3410_v37  ;;  %v2241_v4 = vsel %vm6426_vm14, %v6193_v19, %v2238_v15  ;;  %v2390_v50 = vor.u32 %v2389_v3, %v2388_v29  ;;  %vm2391_vm1 = vcmp.lt.s32.totalorder %v2372_v12, 1  ;;  %vm2394_vm2 = vcmp.lt.s32.totalorder %v2372_v12, 4 }
 0x297   : > { %v2242_v1 = vsel %vm6426_vm14, 0, %v2240_v25  ;;  %4633 = vcosq.f32 %v2241_v4  ;;  %v2526_v44 = vsub.s32 %v2522_v9, %v2525_v35  ;;  %vm2393_vm3 = vcmp.lt.s32.totalorder %v2372_v12, 3 }
 0x298   : > { %4635 = vsinq.f32 %v2241_v4  ;;  %vm2392_vm4 = vcmp.lt.s32.totalorder %v2372_v12, 2  ;;  %v2395_v7 = vsel %vm2391_vm1, %v2375_v0, %v2378_v17  ;;  %v2396_v33 = vsel %vm2394_vm2, %v2384_v6, 2102212464  ;;  %v1710_v4 = vld [vmem:[#allocation2 + $0x40] sm:$0xff] }
 0x299   : > { %v2528_v58 = vsub.s32 0, %v2526_v44  ;;  %v2397_v40 = vsel %vm2393_vm3, %v2381_v56, %v2396_v33  ;;  %v2399_v36 = vsel %vm2391_vm1, %v2378_v17, %v2381_v56  ;;  %v2400_v22 = vsel %vm2394_vm2, %v2387_v24, 920167782 }
 0x29a   : > { %v2401_v42 = vsel %vm2393_vm3, %v2384_v6, %v2400_v22  ;;  %v2403_v27 = vsel %vm2391_vm1, %v2381_v56, %v2384_v6  ;;  %v2404_v8 = vsel %vm2394_vm2, %v2390_v50, 1326507024  ;;  %v2671_v45 = vand.u32 2139095040, %v6421_v61 }
 0x29b   : > { %v3833_v57 = vmin.u32 %v2528_v58, %v2526_v44  ;;  %v2246_v25 = vand.u32 3, %v2242_v1  ;;  %v2398_v46 = vsel %vm2392_vm4, %v2395_v7, %v2397_v40  ;;  %v2402_v60 = vsel %vm2392_vm4, %v2399_v36, %v2401_v42 }
 0x29c   : > { %v2405_v63 = vsel %vm2393_vm3, %v2387_v24, %v2404_v8  ;;  %v6479_v9 = vmul.u32.u64.low %v6438_v21, %v2402_v60  ;;  %v6480_v55 = vmul.u32.u64.high %v6438_v21, %v2402_v60, %v6479_v9  ;;  %v2672_v49 = vshrl.u32 %v2671_v45, 23 }
 0x29d   : > { %v2530_v5 = vclz %v3833_v57  ;;  %v2406_v31 = vsel %vm2392_vm4, %v2403_v27, %v2405_v63  ;;  %vm2245_vm5 = vweird.f32 %v6193_v19  ;;  %vm6490_vm6 = vcmp.le.f32.partialorder %v2462_v59, 0.7853982 }
 0x29e   : > { %v6484_v20 = vmul.u32.u64.low %v6438_v21, %v2406_v31  ;;  %v6485_v14 = vmul.u32.u64.high %v6438_v21, %v2406_v31, %v6484_v20  ;;  %vm2464_vm7 = vcmp.lt.s32.totalorder %v6302_v11, 0  ;;  %v2548_v41 = vsub.s32 4, %v6458_v48 }
 0x29f   : > { %v3834_v12 = vadd.s32 4294967294, %v2530_v5  ;;  %v2414_v43 = vmul.u32 %v6438_v21, %v2398_v46  ;;  %v3840_v34 = vadd.s32 4294967169, %v2672_v49  ;;  %vm2248_vm8 = vcmp.eq.s32.totalorder %v2246_v25, 0 }
 0x2a0   : > { %v2518_v2 = vadd.s32 %v6412_v28, %v6409_v16  ;;  %v2417_v18 = vadd.s32 1, %v6480_v55  ;;  %vm2251_vm10 = vcmp.eq.s32.totalorder %v2246_v25, 2  ;;  %vm2416_vm11 = vc.u32 %v6485_v14, %v6479_v9 }
 0x2a1   : > { %vm3835_vm9 = vcmp.lt.s32.totalorder %v3834_v12, 0  ;;  %v2678_v0 = vadd.s32 1, %v3840_v34  ;;  %v6506_v29 = vsel %vm2464_vm7, %v2548_v41, %v6458_v48  ;;  %v2668_v28 = vand.u32 2147483647, %v6421_v61 }
 0x2a2   : > { %v2533_v59 = vsel %vm3835_vm9, 0, %v3834_v12  ;;  %v2418_v62 = vsel %vm2416_vm11, %v2417_v18, %v6480_v55  ;;  %vm2247_vm13 = vcmp.lt.s32.totalorder %v2246_v25, 2  ;;  %v6519_v27 = vadd.f32 %v6333_v23, %v1710_v4 }
 0x2a3   : > { %v2534_v10 = vsub.s32 32, %v2533_v59  ;;  %v2535_v38 = vshll.u32 %v2526_v44, %v2533_v59  ;;  %v2538_v52 = vsub.s32 4294967266, %v2533_v59  ;;  %v2419_v16 = vadd.s32 %v2418_v62, %v2414_v43 }
 0x2a4   : > { %v4634_v21 = vpop.eup %4633  ;;  %vm2679_vm12 = vcmp.gt.s32.totalorder %v2678_v0, 0  ;;  %v2551_v44 = vsel %vm6490_vm6, 0, %v6506_v29  ;;  %v2675_v58 = vand.u32 8388607, %v2668_v28  ;;  %v2415_v12 = vadd.s32 %v6479_v9, %v6485_v14 }
 0x2a5   : > { %v4636_v37 = vpop.eup %4635  ;;  %v2252_v17 = vxor.u32 2147483648, %v4634_v21  ;;  %v2536_v56 = vshrl.u32 %v2518_v2, %v2534_v10  ;;  %v2539_v3 = vadd.s32 127, %v2538_v52  ;;  %v2680_v15 = vsel %vm2679_vm12, %v2678_v0, 0 }
 0x2a6   : > { %v2249_v35 = vxor.u32 2147483648, %v4636_v37  ;;  %v2420_v6 = vadd.s32 536870912, %v2419_v16  ;;  %v2682_v24 = vand.u32 31, %v2680_v15  ;;  %v2676_v55 = vor.u32 8388608, %v2675_v58 }
 0x2a7   : > { %v2253_v50 = vsel %vm2251_vm10, %v2252_v17, %v4636_v37  ;;  %v2537_v1 = vor.u32 %v2536_v56, %v2535_v38  ;;  %v2540_v48 = vshll.u32 %v2539_v3, 23  ;;  %v2681_v41 = vshrl.u32 %v2680_v15, 5 }
 0x2a8   : > { %v2250_v7 = vsel %vm2248_vm8, %v4634_v21, %v2249_v35  ;;  %v6514_v33 = vshrl.u32 %v2420_v6, 30  ;;  %v2683_v40 = vsub.s32 32, %v2682_v24  ;;  %v2685_v57 = vshll.u32 %v4869_v47, %v2682_v24 }
 0x2a9   : > { %v2254_v36 = vsel %vm2247_vm13, %v2250_v7, %v2253_v50  ;;  %v2541_v22 = vor.u32 4788187, %v2540_v48  ;;  %v2544_v42 = vcvt.s32.f32 %v2537_v1  ;;  %v2688_v25 = vshll.u32 %v4870_v13, %v2682_v24 }
 0x2aa   : > { %v2255_v8 = vsel %vm2245_vm5, nan, %v2254_v36  ;;  %v2422_v45 = vshll.u32 %v6514_v33, 30  ;;  %v2686_v63 = vshrl.u32 %v4870_v13, %v2683_v40  ;;  %v2689_v5 = vshrl.u32 %v4871_v51, %v2683_v40 }
 0x2ab   : > { %3393 = vst [vmem:[%s5141_s30 + $0x20] sm:$0xff] %v2255_v8  ;;  %v3409_v46 = vmul.f32 %v2255_v8, %v2255_v8  ;;  %v2542_v60 = vand.u32 2147483647, %v2541_v22  ;;  %v2691_v20 = vshll.u32 %v4871_v51, %v2682_v24  ;;  %v2692_v19 = vshrl.u32 %v4872_v53, %v2683_v40 }
 0x2ac   : > { %v6529_v31 = vsub.s32 %v2419_v16, %v2422_v45  ;;  %v2684_v43 = vshrl.u32 %v4869_v47, %v2683_v40  ;;  %v2687_v2 = vor.u32 %v2686_v63, %v2685_v57  ;;  %v2690_v18 = vor.u32 %v2689_v5, %v2688_v25  ;;  %v1713_v63 = vld [vmem:[#allocation2 + $0x38] sm:$0xff] }
 0x2ad   : > { %3429 = vadd.xlane.f32.xlu0 %v3409_v46  ;;  %v2545_v49 = vmul.f32 %v2544_v42, %v2542_v60  ;;  %v2694_v59 = vshll.u32 %v4872_v53, %v2682_v24  ;;  %v2695_v10 = vshrl.u32 %v4873_v26, %v2683_v40  ;;  %v2697_v38 = vshll.u32 %v4873_v26, %v2682_v24 }
 0x2ae   : > { %v2425_v34 = vsub.s32 0, %v6529_v31  ;;  %v2698_v52 = vshrl.u32 %v4874_v54, %v2683_v40  ;;  %v2693_v21 = vor.u32 %v2692_v19, %v2691_v20  ;;  %v2716_v9 = vshll.u32 %v2676_v55, 8 }
 0x2af   : > { %v2546_v0 = vxor.u32 2147483648, %v2545_v49  ;;  %v2568_v14 = vand.u32 2139095040, %v6519_v27  ;;  %v2696_v37 = vor.u32 %v2695_v10, %v2694_v59  ;;  %vm2700_vm14 = vcmp.lt.s32.totalorder %v2681_v41, 1 }
 0x2b0   : > { %v3829_v62 = vmin.u32 %v2425_v34, %v6529_v31  ;;  %v2699_v17 = vor.u32 %v2698_v52, %v2697_v38  ;;  %vm2701_vm15 = vcmp.lt.s32.totalorder %v2681_v41, 2  ;;  %vm2702_vm0 = vcmp.lt.s32.totalorder %v2681_v41, 3 }
 0x2b1   : > { %v2547_v16 = vsel %vm2464_vm7, %v2546_v0, %v2545_v49  ;;  %vm2703_vm1 = vcmp.lt.s32.totalorder %v2681_v41, 4  ;;  %v2704_v15 = vsel %vm2700_vm14, %v2684_v43, %v2687_v2  ;;  %v2708_v35 = vsel %vm2700_vm14, %v2687_v2, %v2690_v18 }
 0x2b2   : > { %v2550_v56 = vsel %vm6490_vm6, %v6302_v11, %v2547_v16  ;;  %v2427_v3 = vclz %v3829_v62  ;;  %v2705_v24 = vsel %vm2703_vm1, %v2693_v21, 2102212464  ;;  %v2709_v4 = vsel %vm2703_vm1, %v2696_v37, 920167782 }
 0x2b3   : > { %4637 = vcosq.f32 %v2550_v56  ;;  %v2706_v50 = vsel %vm2702_vm0, %v2690_v18, %v2705_v24  ;;  %v2710_v1 = vsel %vm2702_vm0, %v2693_v21, %v2709_v4  ;;  %v2712_v48 = vsel %vm2700_vm14, %v2690_v18, %v2693_v21 }
 0x2b4   : > { %4639 = vsinq.f32 %v2550_v56  ;;  %v3830_v6 = vadd.s32 4294967294, %v2427_v3  ;;  %v2713_v7 = vsel %vm2703_vm1, %v2699_v17, 1326507024  ;;  %v2445_v58 = vsub.s32 4, %v6514_v33 }
 0x2b5   : > { %v2711_v40 = vsel %vm2701_vm15, %v2708_v35, %v2710_v1  ;;  %v2714_v36 = vsel %vm2702_vm0, %v2696_v37, %v2713_v7  ;;  %v2707_v60 = vsel %vm2701_vm15, %v2704_v15, %v2706_v50  ;;  %v2565_v20 = vand.u32 2147483647, %v6519_v27 }
 0x2b6   : > { %vm3831_vm2 = vcmp.lt.s32.totalorder %v3830_v6, 0  ;;  %v2715_v42 = vsel %vm2701_vm15, %v2712_v48, %v2714_v36  ;;  %v6554_v8 = vmul.u32.u64.low %v2716_v9, %v2711_v40  ;;  %v6555_v45 = vmul.u32.u64.high %v2716_v9, %v2711_v40, %v6554_v8 }
 0x2b7   : > { %v2430_v22 = vsel %vm3831_vm2, 0, %v3830_v6  ;;  %v6559_v5 = vmul.u32.u64.low %v2716_v9, %v2715_v42  ;;  %v6560_v55 = vmul.u32.u64.high %v2716_v9, %v2715_v42, %v6559_v5  ;;  %v2569_v19 = vshrl.u32 %v2568_v14, 23 }
 0x2b8   : > { %v2431_v57 = vsub.s32 32, %v2430_v22  ;;  %v2432_v25 = vshll.u32 %v6529_v31, %v2430_v22  ;;  %v2435_v46 = vsub.s32 4294967266, %v2430_v22  ;;  %v2555_v49 = vand.u32 3, %v2551_v44 }
 0x2b9   : > { %vm2361_vm3 = vcmp.lt.s32.totalorder %v6336_v39, 0  ;;  %v2723_v31 = vmul.u32 %v2716_v9, %v2707_v60  ;;  %v2726_v41 = vadd.s32 1, %v6555_v45  ;;  %v3836_v2 = vadd.s32 4294967169, %v2569_v19 }
 0x2ba   : > { %v2433_v43 = vshrl.u32 %v2415_v12, %v2431_v57  ;;  %v2436_v34 = vadd.s32 127, %v2435_v46  ;;  %v6570_v18 = vadd.f32 %v6333_v23, %v1713_v63  ;;  %vm2554_vm4 = vweird.f32 %v6302_v11 }
 0x2bb   : > { %v2446_v32 = vsel %vm2361_vm3, %v2445_v58, %v6514_v33  ;;  %vm6578_vm5 = vcmp.le.f32.partialorder %v2359_v30, 0.7853982  ;;  %vm2725_vm6 = vc.u32 %v6560_v55, %v6554_v8  ;;  %v2572_v44 = vand.u32 8388607, %v2565_v20 }
 0x2bc   : > { %v2434_v59 = vor.u32 %v2433_v43, %v2432_v25  ;;  %v2437_v0 = vshll.u32 %v2436_v34, 23  ;;  %v2575_v12 = vadd.s32 1, %v3836_v2  ;;  %vm2556_vm7 = vcmp.lt.s32.totalorder %v2555_v49, 2 }
 0x2bd   : > { %v2727_v52 = vsel %vm2725_vm6, %v2726_v41, %v6555_v45  ;;  %v2448_v33 = vsel %vm6578_vm5, 0, %v2446_v32  ;;  %v2877_v30 = vand.u32 2139095040, %v6570_v18  ;;  %vm2557_vm9 = vcmp.eq.s32.totalorder %v2555_v49, 0 }
 0x2be   : > { %v2438_v10 = vor.u32 4788187, %v2437_v0  ;;  %v2441_v38 = vcvt.s32.f32 %v2434_v59  ;;  %v2728_v62 = vadd.s32 %v2727_v52, %v2723_v31  ;;  %vm2576_vm8 = vcmp.gt.s32.totalorder %v2575_v12, 0 }
 0x2bf   : > { %vm2560_vm10 = vcmp.eq.s32.totalorder %v2555_v49, 2  ;;  %v2577_v14 = vsel %vm2576_vm8, %v2575_v12, 0  ;;  %v2573_v56 = vor.u32 8388608, %v2572_v44  ;;  %v6589_v6 = vand.u32 3, %v2448_v33 }
 0x2c0   : > { %v4638_v21 = vpop.eup %4637  ;;  %v2439_v9 = vand.u32 2147483647, %v2438_v10  ;;  %v2729_v17 = vadd.s32 536870912, %v2728_v62  ;;  %v2579_v3 = vand.u32 31, %v2577_v14  ;;  %v2874_v24 = vand.u32 2147483647, %v6570_v18 }
 0x2c1   : > { %v4640_v16 = vpop.eup %4639  ;;  %v2561_v37 = vxor.u32 2147483648, %v4638_v21  ;;  %v2878_v48 = vshrl.u32 %v2877_v30, 23  ;;  %v6596_v40 = vadd.s32 %v6554_v8, %v6560_v55  ;;  %v6602_v57 = vshll.u32 %v2573_v56, 8 }
 0x2c2   : > { %v2558_v15 = vxor.u32 2147483648, %v4640_v16  ;;  %v2442_v35 = vmul.f32 %v2441_v38, %v2439_v9  ;;  %v6592_v50 = vshrl.u32 %v2729_v17, 30  ;;  %v2580_v1 = vsub.s32 32, %v2579_v3 }
 0x2c3   : > { %v2562_v4 = vsel %vm2560_vm10, %v2561_v37, %v4640_v16  ;;  %v2582_v36 = vshll.u32 %v4869_v47, %v2579_v3  ;;  %v2585_v45 = vshll.u32 %v4870_v13, %v2579_v3  ;;  %v3848_v19 = vadd.s32 4294967169, %v2878_v48 }
 0x2c4   : > { %v2559_v7 = vsel %vm2557_vm9, %v4638_v21, %v2558_v15  ;;  %v2443_v58 = vxor.u32 2147483648, %v2442_v35  ;;  %v2731_v42 = vshll.u32 %v6592_v50, 30  ;;  %v2583_v60 = vshrl.u32 %v4870_v13, %v2580_v1 }
 0x2c5   : > { %v2563_v22 = vsel %vm2556_vm7, %v2559_v7, %v2562_v4  ;;  %v2586_v8 = vshrl.u32 %v4871_v51, %v2580_v1  ;;  %v2578_v49 = vshrl.u32 %v2577_v14, 5  ;;  %v2588_v43 = vshll.u32 %v4871_v51, %v2579_v3 }
 0x2c6   : > { %v2564_v25 = vsel %vm2554_vm4, nan, %v2563_v22  ;;  %v2444_v46 = vsel %vm2361_vm3, %v2443_v58, %v2442_v35  ;;  %v6614_v55 = vsub.s32 %v2728_v62, %v2731_v42  ;;  %v2584_v11 = vor.u32 %v2583_v60, %v2582_v36 }
 0x2c7   : > { %3396 = vst [vmem:[%s5141_s30 + $0x38] sm:$0xff] %v2564_v25  ;;  %v3412_v63 = vmul.f32 %v2564_v25, %v2564_v25  ;;  %v2447_v5 = vsel %vm6578_vm5, %v6336_v39, %v2444_v46  ;;  %v2587_v31 = vor.u32 %v2586_v8, %v2585_v45  ;;  %v2589_v41 = vshrl.u32 %v4872_v53, %v2580_v1 }
 0x2c8   : > { %4641 = vcosq.f32 %v2447_v5  ;;  %v2734_v34 = vsub.s32 0, %v6614_v55  ;;  %v2591_v2 = vshll.u32 %v4872_v53, %v2579_v3  ;;  %v2592_v59 = vshrl.u32 %v4873_v26, %v2580_v1 }
 0x2c9   : > { %3435 = vadd.xlane.f32.xlu1 %v3412_v63  ;;  %4643 = vsinq.f32 %v2447_v5  ;;  %v2594_v0 = vshll.u32 %v4873_v26, %v2579_v3  ;;  %v2595_v32 = vshrl.u32 %v4874_v54, %v2580_v1  ;;  %v2581_v44 = vshrl.u32 %v4869_v47, %v2580_v1 }
 0x2ca   : > { %v3841_v29 = vmin.u32 %v2734_v34, %v6614_v55  ;;  %v6627_v12 = vand.u32 8388607, %v2874_v24  ;;  %v2884_v10 = vadd.s32 1, %v3848_v19  ;;  %vm2670_vm11 = vcmp.lt.s32.totalorder %v6421_v61, 0 }
 0x2cb   : > { %v2590_v38 = vor.u32 %v2589_v41, %v2588_v43  ;;  %v2593_v52 = vor.u32 %v2592_v59, %v2591_v2  ;;  %v2596_v33 = vor.u32 %v2595_v32, %v2594_v0  ;;  %vm2597_vm12 = vcmp.lt.s32.totalorder %v2578_v49, 1 }
 0x2cc   : > { %v2736_v62 = vclz %v3841_v29  ;;  %vm2598_vm13 = vcmp.lt.s32.totalorder %v2578_v49, 2  ;;  %vm2599_vm14 = vcmp.lt.s32.totalorder %v2578_v49, 3  ;;  %vm2600_vm15 = vcmp.lt.s32.totalorder %v2578_v49, 4 }
 0x2cd   : > { %vm2454_vm0 = vcmp.eq.s32.totalorder %v6589_v6, 0  ;;  %v2754_v30 = vsub.s32 4, %v6592_v50  ;;  %v2602_v21 = vsel %vm2600_vm15, %v2590_v38, 2102212464  ;;  %v2605_v9 = vsel %vm2597_vm12, %v2584_v11, %v2587_v31 }
 0x2ce   : > { %v2606_v14 = vsel %vm2600_vm15, %v2593_v52, 920167782  ;;  %vm2453_vm1 = vcmp.lt.s32.totalorder %v6589_v6, 2  ;;  %v3842_v16 = vadd.s32 4294967294, %v2736_v62  ;;  %v2601_v37 = vsel %vm2597_vm12, %v2581_v44, %v2584_v11 }
 0x2cf   : > { %v2607_v17 = vsel %vm2599_vm14, %v2590_v38, %v2606_v14  ;;  %v2609_v56 = vsel %vm2597_vm12, %v2587_v31, %v2590_v38  ;;  %vm2451_vm2 = vweird.f32 %v6336_v39  ;;  %v2603_v3 = vsel %vm2599_vm14, %v2587_v31, %v2602_v21 }
 0x2d0   : > { %v2608_v15 = vsel %vm2598_vm13, %v2605_v9, %v2607_v17  ;;  %v2610_v35 = vsel %vm2600_vm15, %v2596_v33, 1326507024  ;;  %vm2885_vm3 = vcmp.gt.s32.totalorder %v2884_v10, 0  ;;  %vm3843_vm4 = vcmp.lt.s32.totalorder %v3842_v16, 0 }
 0x2d1   : > { %v2611_v4 = vsel %vm2599_vm14, %v2593_v52, %v2610_v35  ;;  %v6639_v1 = vmul.u32.u64.low %v6602_v57, %v2608_v15  ;;  %v6640_v48 = vmul.u32.u64.high %v6602_v57, %v2608_v15, %v6639_v1  ;;  %vm2457_vm5 = vcmp.eq.s32.totalorder %v6589_v6, 2 }
 0x2d2   : > { %v2739_v7 = vsel %vm3843_vm4, 0, %v3842_v16  ;;  %v2612_v58 = vsel %vm2598_vm13, %v2609_v56, %v2611_v4  ;;  %v2886_v36 = vsel %vm2885_vm3, %v2884_v10, 0  ;;  %v2604_v25 = vsel %vm2598_vm13, %v2601_v37, %v2603_v3 }
 0x2d3   : > { %v2740_v22 = vsub.s32 32, %v2739_v7  ;;  %v2741_v42 = vshll.u32 %v6614_v55, %v2739_v7  ;;  %v2744_v45 = vsub.s32 4294967266, %v2739_v7  ;;  %v2882_v8 = vor.u32 8388608, %v6627_v12 }
 0x2d4   : > { %v6648_v46 = vmul.u32.u64.low %v6602_v57, %v2612_v58  ;;  %v6649_v60 = vmul.u32.u64.high %v6602_v57, %v2612_v58, %v6648_v46  ;;  %v2888_v63 = vand.u32 31, %v2886_v36  ;;  %v6656_v43 = vsel %vm2670_vm11, %v2754_v30, %v6592_v50 }
 0x2d5   : > { %v4642_v5 = vpop.eup %4641  ;;  %v2742_v19 = vshrl.u32 %v6596_v40, %v2740_v22  ;;  %v2745_v11 = vadd.s32 127, %v2744_v45  ;;  %v2623_v55 = vadd.s32 1, %v6640_v48  ;;  %v2620_v31 = vmul.u32 %v6602_v57, %v2604_v25 }
 0x2d6   : > { %v4644_v49 = vpop.eup %4643  ;;  %v2458_v34 = vxor.u32 2147483648, %v4642_v5  ;;  %v6660_v41 = vshrl.u32 %v2886_v36, 5  ;;  %v2889_v2 = vsub.s32 32, %v2888_v63  ;;  %vm6664_vm6 = vcmp.le.f32.partialorder %v2668_v28, 0.7853982 }
 0x2d7   : > { %v2455_v59 = vxor.u32 2147483648, %v4644_v49  ;;  %v2743_v0 = vor.u32 %v2742_v19, %v2741_v42  ;;  %v2746_v32 = vshll.u32 %v2745_v11, 23  ;;  %v2891_v50 = vshll.u32 %v4869_v47, %v2888_v63  ;;  %v1712_v42 = vld [vmem:[#allocation2 + $0x10] sm:$0xff] }
 0x2d8   : > { %v2459_v29 = vsel %vm2457_vm5, %v2458_v34, %v4644_v49  ;;  %vm2622_vm7 = vc.u32 %v6649_v60, %v6639_v1  ;;  %v2894_v57 = vshll.u32 %v4870_v13, %v2888_v63  ;;  %v2897_v44 = vshll.u32 %v4871_v51, %v2888_v63 }
 0x2d9   : > { %v2456_v28 = vsel %vm2454_vm0, %v4642_v5, %v2455_v59  ;;  %v2747_v12 = vor.u32 4788187, %v2746_v32  ;;  %v2750_v10 = vcvt.s32.f32 %v2743_v0  ;;  %v2624_v38 = vsel %vm2622_vm7, %v2623_v55, %v6640_v48 }
 0x2da   : > { %v2460_v52 = vsel %vm2453_vm1, %v2456_v28, %v2459_v29  ;;  %v2625_v33 = vadd.s32 %v2624_v38, %v2620_v31  ;;  %v2892_v62 = vshrl.u32 %v4870_v13, %v2889_v2  ;;  %v2895_v30 = vshrl.u32 %v4871_v51, %v2889_v2  ;;  %v1715_v29 = vld [vmem:[#allocation2 + $0x70] sm:$0xff] }
 0x2db   : > { %v2461_v21 = vsel %vm2451_vm2, nan, %v2460_v52  ;;  %v2748_v9 = vand.u32 2147483647, %v2747_v12  ;;  %v2898_v14 = vshrl.u32 %v4872_v53, %v2889_v2  ;;  %v2900_v16 = vshll.u32 %v4872_v53, %v2888_v63 }
 0x2dc   : > { %3395 = vst [vmem:[%s5141_s30 + $0x30] sm:$0xff] %v2461_v21  ;;  %v3411_v37 = vmul.f32 %v2461_v21, %v2461_v21  ;;  %v2626_v17 = vadd.s32 536870912, %v2625_v33  ;;  %v2893_v56 = vor.u32 %v2892_v62, %v2891_v50  ;;  %v6687_v3 = vshll.u32 %v2882_v8, 8 }
 0x2dd   : > { %v2751_v6 = vmul.f32 %v2750_v10, %v2748_v9  ;;  %v2896_v15 = vor.u32 %v2895_v30, %v2894_v57  ;;  %v2901_v35 = vshrl.u32 %v4873_v26, %v2889_v2  ;;  %v2903_v4 = vshll.u32 %v4873_v26, %v2888_v63  ;;  %v1714_v10 = vld [vmem:[#allocation2 + $0x60] sm:$0xff] }
 0x2de   : > { %3433 = vadd.xlane.f32.xlu0 %v3411_v37  ;;  %v2627_v39 = vshrl.u32 %v2626_v17, 30  ;;  %v2890_v48 = vshrl.u32 %v4869_v47, %v2889_v2  ;;  %v2904_v7 = vshrl.u32 %v4874_v54, %v2889_v2  ;;  %vm2906_vm8 = vcmp.lt.s32.totalorder %v6660_v41, 1 }
 0x2df   : > { %v2752_v58 = vxor.u32 2147483648, %v2751_v6  ;;  %v2899_v36 = vor.u32 %v2898_v14, %v2897_v44  ;;  %v2902_v22 = vor.u32 %v2901_v35, %v2900_v16  ;;  %vm2909_vm9 = vcmp.lt.s32.totalorder %v6660_v41, 4  ;;  %v6750_v14 = vld [vmem:[%s5134_s23] ss:$0 sm:$0xff] }
 0x2e0   : > { %v2628_v45 = vshll.u32 %v2627_v39, 30  ;;  %v2905_v25 = vor.u32 %v2904_v7, %v2903_v4  ;;  %vm2907_vm10 = vcmp.lt.s32.totalorder %v6660_v41, 2  ;;  %vm2908_vm12 = vcmp.lt.s32.totalorder %v6660_v41, 3 }
 0x2e1   : > { %v2753_v46 = vsel %vm2670_vm11, %v2752_v58, %v2751_v6  ;;  %v2911_v8 = vsel %vm2909_vm9, %v2899_v36, 2102212464  ;;  %v2914_v63 = vsel %vm2906_vm8, %v2893_v56, %v2896_v15  ;;  %v2915_v5 = vsel %vm2909_vm9, %v2902_v22, 920167782 }
 0x2e2   : > { %v2756_v19 = vsel %vm6664_vm6, %v6421_v61, %v2753_v46  ;;  %v6708_v11 = vsub.s32 %v2625_v33, %v2628_v45  ;;  %v6711_v55 = vadd.f32 %v6333_v23, %v1712_v42  ;;  %v2757_v49 = vsel %vm6664_vm6, 0, %v6656_v43 }
 0x2e3   : > { %4645 = vcosq.f32 %v2756_v19  ;;  %v2910_v34 = vsel %vm2906_vm8, %v2890_v48, %v2893_v56  ;;  %v2916_v31 = vsel %vm2908_vm12, %v2899_v36, %v2915_v5  ;;  %v2912_v59 = vsel %vm2908_vm12, %v2896_v15, %v2911_v8 }
 0x2e4   : > { %4647 = vsinq.f32 %v2756_v19  ;;  %v2631_v2 = vsub.s32 0, %v6708_v11  ;;  %v2917_v23 = vsel %vm2907_vm10, %v2914_v63, %v2916_v31  ;;  %v2918_v40 = vsel %vm2906_vm8, %v2896_v15, %v2899_v36 }
 0x2e5   : > { %v2919_v43 = vsel %vm2909_vm9, %v2905_v25, 1326507024  ;;  %v6730_v0 = vmul.u32.u64.low %v6687_v3, %v2917_v23  ;;  %v6731_v32 = vmul.u32.u64.high %v6687_v3, %v2917_v23, %v6730_v0  ;;  %v6735_v57 = vand.u32 3, %v2757_v49 }
 0x2e6   : > { %v3837_v50 = vmin.u32 %v2631_v2, %v6708_v11  ;;  %v2920_v44 = vsel %vm2908_vm12, %v2902_v22, %v2919_v43  ;;  %v2771_v28 = vand.u32 2147483647, %v6711_v55  ;;  %v2774_v12 = vand.u32 2139095040, %v6711_v55 }
 0x2e7   : > { %v2651_v52 = vsub.s32 4, %v2627_v39  ;;  %v2913_v33 = vsel %vm2907_vm10, %v2910_v34, %v2912_v59  ;;  %v2921_v62 = vsel %vm2907_vm10, %v2918_v40, %v2920_v44  ;;  %v6753_v16 = vadd.f32 %v6750_v14, %v1715_v29 }
 0x2e8   : > { %v2633_v38 = vclz %v3837_v50  ;;  %v6746_v30 = vmul.u32.u64.low %v6687_v3, %v2921_v62  ;;  %v6747_v21 = vmul.u32.u64.high %v6687_v3, %v2921_v62, %v6746_v30  ;;  %v2775_v9 = vshrl.u32 %v2774_v12, 23 }
 0x2e9   : > { %vm2567_vm11 = vcmp.lt.s32.totalorder %v6519_v27, 0  ;;  %v2932_v17 = vadd.s32 1, %v6731_v32  ;;  %v6758_v56 = vadd.f32 %v6750_v14, %v1714_v10  ;;  %vm2760_vm13 = vweird.f32 %v6421_v61 }
 0x2ea   : > { %v3838_v37 = vadd.s32 4294967294, %v2633_v38  ;;  %vm6763_vm14 = vcmp.le.f32.partialorder %v2565_v20, 0.7853982  ;;  %v2929_v6 = vmul.u32 %v6687_v3, %v2913_v33  ;;  %v3844_v15 = vadd.s32 4294967169, %v2775_v9 }
 0x2eb   : > { %v2778_v35 = vand.u32 8388607, %v2771_v28  ;;  %vm2763_vm15 = vcmp.eq.s32.totalorder %v6735_v57, 0  ;;  %v2621_v4 = vadd.s32 %v6639_v1, %v6649_v60  ;;  %v2652_v48 = vsel %vm2567_vm11, %v2651_v52, %v2627_v39 }
 0x2ec   : > { %vm3839_vm0 = vcmp.lt.s32.totalorder %v3838_v37, 0  ;;  %vm2766_vm1 = vcmp.eq.s32.totalorder %v6735_v57, 2  ;;  %vm2931_vm2 = vc.u32 %v6747_v21, %v6730_v0  ;;  %v2781_v3 = vadd.s32 1, %v3844_v15 }
 0x2ed   : > { %v2636_v20 = vsel %vm3839_vm0, 0, %v3838_v37  ;;  %v2933_v22 = vsel %vm2931_vm2, %v2932_v17, %v6731_v32  ;;  %v2654_v1 = vsel %vm6763_vm14, 0, %v2652_v48  ;;  %v2779_v42 = vor.u32 8388608, %v2778_v35 }
 0x2ee   : > { %v2637_v7 = vsub.s32 32, %v2636_v20  ;;  %v2638_v58 = vshll.u32 %v6708_v11, %v2636_v20  ;;  %v2641_v36 = vsub.s32 4294967266, %v2636_v20  ;;  %v2934_v60 = vadd.s32 %v2933_v22, %v2929_v6 }
 0x2ef   : > { %vm2782_vm3 = vcmp.gt.s32.totalorder %v2781_v3, 0  ;;  %v3080_v8 = vand.u32 2147483647, %v6753_v16  ;;  %v3083_v11 = vand.u32 2139095040, %v6753_v16  ;;  %vm2762_vm4 = vcmp.lt.s32.totalorder %v6735_v57, 2 }
 0x2f0   : > { %v4646_v39 = vpop.eup %4645  ;;  %v2639_v45 = vshrl.u32 %v2621_v4, %v2637_v7  ;;  %v2642_v25 = vadd.s32 127, %v2641_v36  ;;  %v2783_v46 = vsel %vm2782_vm3, %v2781_v3, 0  ;;  %v2935_v19 = vadd.s32 536870912, %v2934_v60 }
 0x2f1   : > { %v4648_v63 = vpop.eup %4647  ;;  %v2767_v5 = vxor.u32 2147483648, %v4646_v39  ;;  %v2785_v49 = vand.u32 31, %v2783_v46  ;;  %v6787_v23 = vand.u32 3, %v2654_v1  ;;  %v6793_v44 = vshll.u32 %v2779_v42, 8 }
 0x2f2   : > { %v2764_v34 = vxor.u32 2147483648, %v4648_v63  ;;  %v2640_v31 = vor.u32 %v2639_v45, %v2638_v58  ;;  %v2643_v2 = vshll.u32 %v2642_v25, 23  ;;  %v6789_v40 = vshrl.u32 %v2935_v19, 30 }
 0x2f3   : > { %v2768_v59 = vsel %vm2766_vm1, %v2767_v5, %v4648_v63  ;;  %v2786_v43 = vsub.s32 32, %v2785_v49  ;;  %v3084_v38 = vshrl.u32 %v3083_v11, 23  ;;  %v6798_v52 = vand.u32 8388607, %v3080_v8 }
 0x2f4   : > { %v2765_v32 = vsel %vm2763_vm15, %v4646_v39, %v2764_v34  ;;  %v2644_v50 = vor.u32 4788187, %v2643_v2  ;;  %v2647_v29 = vcvt.s32.f32 %v2640_v31  ;;  %v2937_v10 = vshll.u32 %v6789_v40, 30 }
 0x2f5   : > { %v2769_v12 = vsel %vm2762_vm4, %v2765_v32, %v2768_v59  ;;  %v2788_v30 = vshll.u32 %v4869_v47, %v2785_v49  ;;  %v2791_v57 = vshll.u32 %v4870_v13, %v2785_v49  ;;  %v2789_v17 = vshrl.u32 %v4870_v13, %v2786_v43 }
 0x2f6   : > { %v2770_v33 = vsel %vm2760_vm13, nan, %v2769_v12  ;;  %v2645_v62 = vand.u32 2147483647, %v2644_v50  ;;  %v6805_v37 = vsub.s32 %v2934_v60, %v2937_v10  ;;  %v2792_v6 = vshrl.u32 %v4871_v51, %v2786_v43 }
 0x2f7   : > { %3398 = vst [vmem:[%s5141_s30 + $0x48] sm:$0xff] %v2770_v33  ;;  %v3414_v9 = vmul.f32 %v2770_v33, %v2770_v33  ;;  %v2930_v35 = vadd.s32 %v6730_v0, %v6747_v21  ;;  %v2784_v4 = vshrl.u32 %v2783_v46, 5  ;;  %v2794_v61 = vshll.u32 %v4871_v51, %v2785_v49 }
 0x2f8   : > { %v2648_v15 = vmul.f32 %v2647_v29, %v2645_v62  ;;  %v2940_v48 = vsub.s32 0, %v6805_v37  ;;  %v2787_v20 = vshrl.u32 %v4869_v47, %v2786_v43  ;;  %v2795_v3 = vshrl.u32 %v4872_v53, %v2786_v43 }
 0x2f9   : > { %3439 = vadd.xlane.f32.xlu1 %v3414_v9  ;;  %v2797_v7 = vshll.u32 %v4872_v53, %v2785_v49  ;;  %v2798_v36 = vshrl.u32 %v4873_v26, %v2786_v43  ;;  %v2800_v22 = vshll.u32 %v4873_v26, %v2785_v49  ;;  %v2801_v1 = vshrl.u32 %v4874_v54, %v2786_v43 }
 0x2fa   : > { %v2649_v58 = vxor.u32 2147483648, %v2648_v15  ;;  %v3849_v0 = vmin.u32 %v2940_v48, %v6805_v37  ;;  %v2790_v21 = vor.u32 %v2789_v17, %v2788_v30  ;;  %v2793_v60 = vor.u32 %v2792_v6, %v2791_v57 }
 0x2fb   : > { %v3856_v42 = vadd.s32 4294967169, %v3084_v38  ;;  %v2796_v45 = vor.u32 %v2795_v3, %v2794_v61  ;;  %v2799_v25 = vor.u32 %v2798_v36, %v2797_v7  ;;  %v2802_v46 = vor.u32 %v2801_v1, %v2800_v22 }
 0x2fc   : > { %v2650_v39 = vsel %vm2567_vm11, %v2649_v58, %v2648_v15  ;;  %vm2876_vm5 = vcmp.lt.s32.totalorder %v6570_v18, 0  ;;  %v2942_v5 = vclz %v3849_v0  ;;  %vm2803_vm6 = vcmp.lt.s32.totalorder %v2784_v4, 1 }
 0x2fd   : > { %v2653_v63 = vsel %vm6763_vm14, %v6519_v27, %v2650_v39  ;;  %vm2804_vm7 = vcmp.lt.s32.totalorder %v2784_v4, 2  ;;  %vm2805_vm8 = vcmp.lt.s32.totalorder %v2784_v4, 3  ;;  %vm2806_vm9 = vcmp.lt.s32.totalorder %v2784_v4, 4 }
 0x2fe   : > { %4649 = vcosq.f32 %v2653_v63  ;;  %v2807_v19 = vsel %vm2803_vm6, %v2787_v20, %v2790_v21  ;;  %v3850_v49 = vadd.s32 4294967294, %v2942_v5  ;;  %v2808_v11 = vsel %vm2806_vm9, %v2796_v45, 2102212464 }
 0x2ff   : > { %4651 = vsinq.f32 %v2653_v63  ;;  %v2811_v34 = vsel %vm2803_vm6, %v2790_v21, %v2793_v60  ;;  %v2809_v31 = vsel %vm2805_vm8, %v2793_v60, %v2808_v11  ;;  %v2812_v2 = vsel %vm2806_vm9, %v2799_v25, 920167782 }
 0x300   : > { %v2815_v59 = vsel %vm2803_vm6, %v2793_v60, %v2796_v45  ;;  %v2816_v43 = vsel %vm2806_vm9, %v2802_v46, 1326507024  ;;  %vm3851_vm10 = vcmp.lt.s32.totalorder %v3850_v49, 0  ;;  %v2960_v41 = vsub.s32 4, %v6789_v40 }
 0x301   : > { %v2813_v32 = vsel %vm2805_vm8, %v2796_v45, %v2812_v2  ;;  %v2817_v50 = vsel %vm2805_vm8, %v2799_v25, %v2816_v43  ;;  %v2945_v29 = vsel %vm3851_vm10, 0, %v3850_v49  ;;  %v2810_v12 = vsel %vm2804_vm7, %v2807_v19, %v2809_v31 }
 0x302   : > { %v2814_v10 = vsel %vm2804_vm7, %v2811_v34, %v2813_v32  ;;  %v2818_v38 = vsel %vm2804_vm7, %v2815_v59, %v2817_v50  ;;  %v2946_v33 = vsub.s32 32, %v2945_v29  ;;  %v2947_v62 = vshll.u32 %v6805_v37, %v2945_v29 }
 0x303   : > { %v2950_v30 = vsub.s32 4294967266, %v2945_v29  ;;  %v3090_v57 = vadd.s32 1, %v3856_v42  ;;  %v6832_v9 = vmul.u32.u64.low %v6793_v44, %v2818_v38  ;;  %v6833_v17 = vmul.u32.u64.high %v6793_v44, %v2818_v38, %v6832_v9 }
 0x304   : > { %v6836_v6 = vmul.u32.u64.low %v6793_v44, %v2814_v10  ;;  %v6837_v15 = vmul.u32.u64.high %v6793_v44, %v2814_v10, %v6836_v6  ;;  %vm6842_vm12 = vcmp.le.f32.partialorder %v2874_v24, 0.7853982  ;;  %v2948_v4 = vshrl.u32 %v2930_v35, %v2946_v33 }
 0x305   : > { %v2951_v48 = vadd.s32 127, %v2950_v30  ;;  %vm3091_vm11 = vcmp.gt.s32.totalorder %v3090_v57, 0  ;;  %vm2657_vm13 = vweird.f32 %v6519_v27  ;;  %vm2659_vm14 = vcmp.lt.s32.totalorder %v6787_v23, 2 }
 0x306   : > { %v6851_v37 = vsel %vm2876_vm5, %v2960_v41, %v6789_v40  ;;  %v3088_v20 = vor.u32 8388608, %v6798_v52  ;;  %v3092_v3 = vsel %vm3091_vm11, %v3090_v57, 0  ;;  %v2949_v7 = vor.u32 %v2948_v4, %v2947_v62 }
 0x307   : > { %v2952_v24 = vshll.u32 %v2951_v48, 23  ;;  %v2826_v58 = vmul.u32 %v6793_v44, %v2810_v12  ;;  %v3094_v36 = vand.u32 31, %v3092_v3  ;;  %vm2660_vm15 = vcmp.eq.s32.totalorder %v6787_v23, 0 }
 0x308   : > { %vm2663_vm0 = vcmp.eq.s32.totalorder %v6787_v23, 2  ;;  %vm2828_vm1 = vc.u32 %v6833_v17, %v6836_v6  ;;  %v2829_v35 = vadd.s32 1, %v6837_v15  ;;  %v2956_v40 = vcvt.s32.f32 %v2949_v7 }
 0x309   : > { %v2953_v22 = vor.u32 4788187, %v2952_v24  ;;  %v2963_v52 = vsel %vm6842_vm12, 0, %v6851_v37  ;;  %v3095_v1 = vsub.s32 32, %v3094_v36  ;;  %v6864_v44 = vshrl.u32 %v3092_v3, 5 }
 0x30a   : > { %v2830_v0 = vsel %vm2828_vm1, %v2829_v35, %v6837_v15  ;;  %v6866_v21 = vshll.u32 %v3088_v20, 8  ;;  %v2980_v60 = vand.u32 2139095040, %v6758_v56  ;;  %v3097_v25 = vshll.u32 %v4869_v47, %v3094_v36 }
 0x30b   : > { %v4650_v42 = vpop.eup %4649  ;;  %v2954_v39 = vand.u32 2147483647, %v2953_v22  ;;  %v2831_v45 = vadd.s32 %v2830_v0, %v2826_v58  ;;  %v3100_v46 = vshll.u32 %v4870_v13, %v3094_v36  ;;  %v3098_v19 = vshrl.u32 %v4870_v13, %v3095_v1 }
 0x30c   : > { %v4652_v63 = vpop.eup %4651  ;;  %v2664_v5 = vxor.u32 2147483648, %v4650_v42  ;;  %v3101_v49 = vshrl.u32 %v4871_v51, %v3095_v1  ;;  %v3103_v11 = vshll.u32 %v4871_v51, %v3094_v36  ;;  %v3104_v59 = vshrl.u32 %v4872_v53, %v3095_v1 }
 0x30d   : > { %v2661_v34 = vxor.u32 2147483648, %v4652_v63  ;;  %v2957_v31 = vmul.f32 %v2956_v40, %v2954_v39  ;;  %v2832_v2 = vadd.s32 536870912, %v2831_v45  ;;  %v3096_v41 = vshrl.u32 %v4869_v47, %v3095_v1 }
 0x30e   : > { %v2665_v43 = vsel %vm2663_vm0, %v2664_v5, %v4652_v63  ;;  %v3106_v32 = vshll.u32 %v4872_v53, %v3094_v36  ;;  %v3107_v50 = vshrl.u32 %v4873_v26, %v3095_v1  ;;  %v3109_v38 = vshll.u32 %v4873_v26, %v3094_v36 }
 0x30f   : > { %v2662_v29 = vsel %vm2660_vm15, %v4650_v42, %v2661_v34  ;;  %v2958_v12 = vxor.u32 2147483648, %v2957_v31  ;;  %v6882_v10 = vshrl.u32 %v2832_v2, 30  ;;  %v3099_v62 = vor.u32 %v3098_v19, %v3097_v25 }
 0x310   : > { %v2666_v33 = vsel %vm2659_vm14, %v2662_v29, %v2665_v43  ;;  %v3102_v30 = vor.u32 %v3101_v49, %v3100_v46  ;;  %v3110_v57 = vshrl.u32 %v4874_v54, %v3095_v1  ;;  %v3105_v48 = vor.u32 %v3104_v59, %v3103_v11 }
 0x311   : > { %v2667_v9 = vsel %vm2657_vm13, nan, %v2666_v33  ;;  %v2959_v15 = vsel %vm2876_vm5, %v2958_v12, %v2957_v31  ;;  %v2834_v4 = vshll.u32 %v6882_v10, 30  ;;  %v3108_v20 = vor.u32 %v3107_v50, %v3106_v32 }
 0x312   : > { %3397 = vst [vmem:[%s5141_s30 + $0x40] sm:$0xff] %v2667_v9  ;;  %v3413_v37 = vmul.f32 %v2667_v9, %v2667_v9  ;;  %v2962_v23 = vsel %vm6842_vm12, %v6570_v18, %v2959_v15  ;;  %v3111_v3 = vor.u32 %v3110_v57, %v3109_v38  ;;  %vm3112_vm2 = vcmp.lt.s32.totalorder %v6864_v44, 1 }
 0x313   : > { %4653 = vcosq.f32 %v2962_v23  ;;  %v2835_v7 = vsub.s32 %v2831_v45, %v2834_v4  ;;  %vm3115_vm3 = vcmp.lt.s32.totalorder %v6864_v44, 4  ;;  %vm3114_vm4 = vcmp.lt.s32.totalorder %v6864_v44, 3 }
 0x314   : > { %3437 = vadd.xlane.f32.xlu0 %v3413_v37  ;;  %4655 = vsinq.f32 %v2962_v23  ;;  %v3117_v27 = vsel %vm3115_vm3, %v3105_v48, 2102212464  ;;  %v2981_v24 = vshrl.u32 %v2980_v60, 23  ;;  %vm3113_vm5 = vcmp.lt.s32.totalorder %v6864_v44, 2 }
 0x315   : > { %v2837_v58 = vsub.s32 0, %v2835_v7  ;;  %v3116_v36 = vsel %vm3112_vm2, %v3096_v41, %v3099_v62  ;;  %v3118_v61 = vsel %vm3114_vm4, %v3102_v30, %v3117_v27  ;;  %v3120_v35 = vsel %vm3112_vm2, %v3099_v62, %v3102_v30 }
 0x316   : > { %v3121_v22 = vsel %vm3115_vm3, %v3108_v20, 920167782  ;;  %v3124_v40 = vsel %vm3112_vm2, %v3102_v30, %v3105_v48  ;;  %v3125_v1 = vsel %vm3115_vm3, %v3111_v3, 1326507024  ;;  %v2967_v42 = vand.u32 3, %v2963_v52 }
 0x317   : > { %v3845_v0 = vmin.u32 %v2837_v58, %v2835_v7  ;;  %v3122_v39 = vsel %vm3114_vm4, %v3105_v48, %v3121_v22  ;;  %v3126_v45 = vsel %vm3114_vm4, %v3108_v20, %v3125_v1  ;;  %v3852_v25 = vadd.s32 4294967169, %v2981_v24 }
 0x318   : > { %v3119_v63 = vsel %vm3113_vm5, %v3116_v36, %v3118_v61  ;;  %v3123_v5 = vsel %vm3113_vm5, %v3120_v35, %v3122_v39  ;;  %v3127_v19 = vsel %vm3113_vm5, %v3124_v40, %v3126_v45  ;;  %vm2966_vm6 = vweird.f32 %v6570_v18  ;;  %v6935_v40 = vpop.xlane.xlu0 %3421 }
 0x319   : > { %v2839_v46 = vclz %v3845_v0  ;;  %v6902_v60 = vmul.u32.u64.low %v6866_v21, %v3127_v19  ;;  %v6903_v49 = vmul.u32.u64.high %v6866_v21, %v3127_v19, %v6902_v60  ;;  %v2987_v31 = vadd.s32 1, %v3852_v25 }
 0x31a   : > { %v6906_v44 = vmul.u32.u64.low %v6866_v21, %v3123_v5  ;;  %v6907_v11 = vmul.u32.u64.high %v6866_v21, %v3123_v5, %v6906_v44  ;;  %v2977_v52 = vand.u32 2147483647, %v6758_v56  ;;  %v2827_v2 = vadd.s32 %v6836_v6, %v6833_v17 }
 0x31b   : > { %v3846_v34 = vadd.s32 4294967294, %v2839_v46  ;;  %v3135_v59 = vmul.u32 %v6866_v21, %v3119_v63  ;;  %vm2988_vm8 = vcmp.gt.s32.totalorder %v2987_v31, 0  ;;  %vm2969_vm9 = vcmp.eq.s32.totalorder %v2967_v42, 0 }
 0x31c   : > { %vm3137_vm10 = vc.u32 %v6903_v49, %v6906_v44  ;;  %v3138_v41 = vadd.s32 1, %v6907_v11  ;;  %v2989_v12 = vsel %vm2988_vm8, %v2987_v31, 0  ;;  %vm2972_vm12 = vcmp.eq.s32.totalorder %v2967_v42, 2 }
 0x31d   : > { %vm3847_vm7 = vcmp.lt.s32.totalorder %v3846_v34, 0  ;;  %v2984_v17 = vand.u32 8388607, %v2977_v52  ;;  %v2991_v6 = vand.u32 31, %v2989_v12  ;;  %vm2968_vm11 = vcmp.lt.s32.totalorder %v2967_v42, 2 }
 0x31e   : > { %v2842_v43 = vsel %vm3847_vm7, 0, %v3846_v34  ;;  %v3139_v33 = vsel %vm3137_vm10, %v3138_v41, %v6907_v11  ;;  %vm2773_vm13 = vcmp.lt.s32.totalorder %v6711_v55, 0  ;;  %vm6924_vm14 = vcmp.le.f32.partialorder %v2771_v28, 0.7853982  ;;  %v6933_v28 = vpop.xlane.xlu1 %3425  ;;  %v6954_v41 = vpop.xlane.xlu0 %3423 }
 0x31f   : > { %v2843_v32 = vsub.s32 32, %v2842_v43  ;;  %v2844_v50 = vshll.u32 %v2835_v7, %v2842_v43  ;;  %v2847_v29 = vsub.s32 4294967266, %v2842_v43  ;;  %v3140_v9 = vadd.s32 %v3139_v33, %v3135_v59  ;;  %v1717_v59 = vld [vmem:[#allocation2 + $0x28] sm:$0xff] }
 0x320   : > { %v4654_v38 = vpop.eup %4653  ;;  %v2992_v4 = vsub.s32 32, %v2991_v6  ;;  %v2857_v27 = vsub.s32 4, %v6882_v10  ;;  %v2985_v24 = vor.u32 8388608, %v2984_v17  ;;  %v2994_v58 = vshll.u32 %v4869_v47, %v2991_v6 }
 0x321   : > { %v4656_v21 = vpop.eup %4655  ;;  %v2973_v62 = vxor.u32 2147483648, %v4654_v38  ;;  %v2845_v30 = vshrl.u32 %v2827_v2, %v2843_v32  ;;  %v2848_v57 = vadd.s32 127, %v2847_v29  ;;  %v3141_v3 = vadd.s32 536870912, %v3140_v9 }
 0x322   : > { %v2970_v15 = vxor.u32 2147483648, %v4656_v21  ;;  %v2995_v0 = vshrl.u32 %v4870_v13, %v2992_v4  ;;  %v2997_v42 = vshll.u32 %v4870_v13, %v2991_v6  ;;  %v2998_v39 = vshrl.u32 %v4871_v51, %v2992_v4  ;;  %v6952_v43 = vpop.xlane.xlu1 %3427 }
 0x323   : > { %v2974_v48 = vsel %vm2972_vm12, %v2973_v62, %v4656_v21  ;;  %v2846_v23 = vor.u32 %v2845_v30, %v2844_v50  ;;  %v2849_v20 = vshll.u32 %v2848_v57, 23  ;;  %v6931_v22 = vshrl.u32 %v3141_v3, 30 }
 0x324   : > { %v2971_v7 = vsel %vm2969_vm9, %v4654_v38, %v2970_v15  ;;  %v2990_v63 = vshrl.u32 %v2989_v12, 5  ;;  %v3000_v5 = vshll.u32 %v4871_v51, %v2991_v6  ;;  %v3001_v19 = vshrl.u32 %v4872_v53, %v2992_v4 }
 0x325   : > { %v2975_v36 = vsel %vm2968_vm11, %v2971_v7, %v2974_v48  ;;  %v2850_v61 = vor.u32 4788187, %v2849_v20  ;;  %v2853_v35 = vcvt.s32.f32 %v2846_v23  ;;  %v3143_v46 = vshll.u32 %v6931_v22, 30 }
 0x326   : > { %v2976_v1 = vsel %vm2966_vm6, nan, %v2975_v36  ;;  %v3003_v60 = vshll.u32 %v4872_v53, %v2991_v6  ;;  %v3004_v18 = vshrl.u32 %v4873_v26, %v2992_v4  ;;  %v3006_v31 = vshll.u32 %v4873_v26, %v2991_v6 }
 0x327   : > { %3400 = vst [vmem:[%s5141_s30 + $0x58] sm:$0xff] %v2976_v1  ;;  %v3416_v45 = vmul.f32 %v2976_v1, %v2976_v1  ;;  %v2851_v25 = vand.u32 2147483647, %v2850_v61  ;;  %v6948_v34 = vsub.s32 %v3140_v9, %v3143_v46  ;;  %v3007_v2 = vshrl.u32 %v4874_v54, %v2992_v4  ;;  %v6967_v9 = vpop.xlane.xlu1 %3431 }
 0x328   : > { %v2858_v32 = vsel %vm2773_vm13, %v2857_v27, %v6882_v10  ;;  %v2993_v50 = vshrl.u32 %v4869_v47, %v2992_v4  ;;  %v2996_v29 = vor.u32 %v2995_v0, %v2994_v58  ;;  %v2999_v12 = vor.u32 %v2998_v39, %v2997_v42 }
 0x329   : > { %3443 = vadd.xlane.f32.xlu1 %v3416_v45  ;;  %v2854_v11 = vmul.f32 %v2853_v35, %v2851_v25  ;;  %v3146_v33 = vsub.s32 0, %v6948_v34  ;;  %v3005_v17 = vor.u32 %v3004_v18, %v3003_v60  ;;  %vm3009_vm15 = vcmp.lt.s32.totalorder %v2990_v63, 1 }
 0x32a   : > { %v3002_v6 = vor.u32 %v3001_v19, %v3000_v5  ;;  %vm3012_vm0 = vcmp.lt.s32.totalorder %v2990_v63, 4  ;;  %v3025_v21 = vshll.u32 %v2985_v24, 8  ;;  %v6962_v62 = vadd.f32 %v6750_v14, %v1717_v59 }
 0x32b   : > { %v2855_v38 = vxor.u32 2147483648, %v2854_v11  ;;  %v3857_v10 = vmin.u32 %v3146_v33, %v6948_v34  ;;  %v3008_v57 = vor.u32 %v3007_v2, %v3006_v31  ;;  %vm3011_vm1 = vcmp.lt.s32.totalorder %v2990_v63, 3 }
 0x32c   : > { %vm3010_vm2 = vcmp.lt.s32.totalorder %v2990_v63, 2  ;;  %v3014_v4 = vsel %vm3012_vm0, %v3002_v6, 2102212464  ;;  %v3017_v48 = vsel %vm3009_vm15, %v2996_v29, %v2999_v12  ;;  %v3013_v20 = vsel %vm3009_vm15, %v2993_v50, %v2996_v29 }
 0x32d   : > { %v2856_v30 = vsel %vm2773_vm13, %v2855_v38, %v2854_v11  ;;  %v3148_v23 = vclz %v3857_v10  ;;  %v3018_v3 = vsel %vm3012_vm0, %v3005_v17, 920167782  ;;  %v3015_v7 = vsel %vm3011_vm1, %v2999_v12, %v3014_v4 }
 0x32e   : > { %v2859_v15 = vsel %vm6924_vm14, %v6711_v55, %v2856_v30  ;;  %v3019_v27 = vsel %vm3011_vm1, %v3002_v6, %v3018_v3  ;;  %v3021_v24 = vsel %vm3009_vm15, %v2999_v12, %v3002_v6  ;;  %v2860_v58 = vsel %vm6924_vm14, 0, %v2858_v32  ;;  %v1716_v12 = vld [vmem:[#allocation2 + $0x78] sm:$0xff] }
 0x32f   : > { %4657 = vcosq.f32 %v2859_v15  ;;  %v3858_v36 = vadd.s32 4294967294, %v3148_v23  ;;  %v3020_v61 = vsel %vm3010_vm2, %v3017_v48, %v3019_v27  ;;  %v3022_v35 = vsel %vm3012_vm0, %v3008_v57, 1326507024 }
 0x330   : > { %4659 = vsinq.f32 %v2859_v15  ;;  %v3136_v1 = vadd.s32 %v6906_v44, %v6903_v49  ;;  %v3023_v0 = vsel %vm3011_vm1, %v3005_v17, %v3022_v35  ;;  %v3016_v45 = vsel %vm3010_vm2, %v3013_v20, %v3015_v7 }
 0x331   : > { %v6986_v42 = vmul.u32.u64.low %v3025_v21, %v3020_v61  ;;  %v6987_v39 = vmul.u32.u64.high %v3025_v21, %v3020_v61, %v6986_v42  ;;  %vm3859_vm3 = vcmp.lt.s32.totalorder %v3858_v36, 0  ;;  %v3024_v25 = vsel %vm3010_vm2, %v3021_v24, %v3023_v0 }
 0x332   : > { %v3289_v37 = vand.u32 2139095040, %v6962_v62  ;;  %v3151_v46 = vsel %vm3859_vm3, 0, %v3858_v36  ;;  %v3166_v5 = vsub.s32 4, %v6931_v22  ;;  %v3032_v31 = vmul.u32 %v3025_v21, %v3016_v45 }
 0x333   : > { %v6993_v19 = vmul.u32.u64.low %v3025_v21, %v3024_v25  ;;  %v6994_v60 = vmul.u32.u64.high %v3025_v21, %v3024_v25, %v6993_v19  ;;  %v3152_v18 = vsub.s32 32, %v3151_v46  ;;  %v3153_v49 = vshll.u32 %v6948_v34, %v3151_v46 }
 0x334   : > { %v3156_v44 = vsub.s32 4294967266, %v3151_v46  ;;  %v3290_v11 = vshrl.u32 %v3289_v37, 23  ;;  %v3035_v2 = vadd.s32 1, %v6987_v39  ;;  %v3286_v59 = vand.u32 2147483647, %v6962_v62 }
 0x335   : > { %vm3082_vm4 = vcmp.lt.s32.totalorder %v6753_v16, 0  ;;  %v3154_v32 = vshrl.u32 %v3136_v1, %v3152_v18  ;;  %vm2863_vm5 = vweird.f32 %v6711_v55  ;;  %v2864_v38 = vand.u32 3, %v2860_v58 }
 0x336   : > { %v6999_v63 = vpop.xlane.xlu0 %3429  ;;  %v3157_v50 = vadd.s32 127, %v3156_v44  ;;  %v3864_v29 = vadd.s32 4294967169, %v3290_v11  ;;  %v3167_v34 = vsel %vm3082_vm4, %v3166_v5, %v6931_v22  ;;  %vm3034_vm6 = vc.u32 %v6994_v60, %v6986_v42 }
 0x337   : > { %v3155_v33 = vor.u32 %v3154_v32, %v3153_v49  ;;  %v3036_v6 = vsel %vm3034_vm6, %v3035_v2, %v6987_v39  ;;  %vm7010_vm7 = vcmp.le.f32.partialorder %v3080_v8, 0.7853982  ;;  %v3293_v57 = vand.u32 8388607, %v3286_v59 }
 0x338   : > { %v3158_v17 = vshll.u32 %v3157_v50, 23  ;;  %v3296_v21 = vadd.s32 1, %v3864_v29  ;;  %v3037_v10 = vadd.s32 %v3036_v6, %v3032_v31  ;;  %v7017_v15 = vadd.f32 %v6750_v14, %v1716_v12 }
 0x339   : > { %v3162_v4 = vcvt.s32.f32 %v3155_v33  ;;  %v3169_v48 = vsel %vm7010_vm7, 0, %v3167_v34  ;;  %vm2865_vm9 = vcmp.lt.s32.totalorder %v2864_v38, 2  ;;  %vm2869_vm10 = vcmp.eq.s32.totalorder %v2864_v38, 2 }
 0x33a   : > { %v3159_v22 = vor.u32 4788187, %v3158_v17  ;;  %vm3297_vm8 = vcmp.gt.s32.totalorder %v3296_v21, 0  ;;  %v3038_v8 = vadd.s32 536870912, %v3037_v10  ;;  %vm2866_vm12 = vcmp.eq.s32.totalorder %v2864_v38, 0 }
 0x33b   : > { %v3298_v20 = vsel %vm3297_vm8, %v3296_v21, 0  ;;  %v7021_v36 = vand.u32 3, %v3169_v48  ;;  %v3294_v61 = vor.u32 8388608, %v3293_v57  ;;  %v3186_v39 = vand.u32 2139095040, %v7017_v15 }
 0x33c   : > { %v4658_v23 = vpop.eup %4657  ;;  %v3160_v27 = vand.u32 2147483647, %v3159_v22  ;;  %v3300_v24 = vand.u32 31, %v3298_v20  ;;  %v7023_v14 = vshrl.u32 %v3038_v8, 30  ;;  %v7027_v25 = vadd.s32 %v6986_v42, %v6994_v60 }
 0x33d   : > { %v4660_v3 = vpop.eup %4659  ;;  %v2870_v7 = vxor.u32 2147483648, %v4658_v23  ;;  %v3183_v46 = vand.u32 2147483647, %v7017_v15  ;;  %v7043_v32 = vshll.u32 %v3294_v61, 8  ;;  %v3187_v50 = vshrl.u32 %v3186_v39, 23 }
 0x33e   : > { %v2867_v58 = vxor.u32 2147483648, %v4660_v3  ;;  %v3163_v1 = vmul.f32 %v3162_v4, %v3160_v27  ;;  %v3301_v0 = vsub.s32 32, %v3300_v24  ;;  %v3040_v37 = vshll.u32 %v7023_v14, 30 }
 0x33f   : > { %v2871_v35 = vsel %vm2869_vm10, %v2870_v7, %v4660_v3  ;;  %v3303_v18 = vshll.u32 %v4869_v47, %v3300_v24  ;;  %v3306_v49 = vshll.u32 %v4870_v13, %v3300_v24  ;;  %v3299_v12 = vshrl.u32 %v3298_v20, 5 }
 0x340   : > { %v2868_v45 = vsel %vm2866_vm12, %v4658_v23, %v2867_v58  ;;  %v3164_v19 = vxor.u32 2147483648, %v3163_v1  ;;  %v7036_v11 = vsub.s32 %v3037_v10, %v3040_v37  ;;  %v3304_v31 = vshrl.u32 %v4870_v13, %v3301_v0 }
 0x341   : > { %v2872_v5 = vsel %vm2865_vm9, %v2868_v45, %v2871_v35  ;;  %v3307_v42 = vshrl.u32 %v4871_v51, %v3301_v0  ;;  %v3302_v38 = vshrl.u32 %v4869_v47, %v3301_v0  ;;  %v3309_v34 = vshll.u32 %v4871_v51, %v3300_v24 }
 0x342   : > { %v2873_v44 = vsel %vm2863_vm5, nan, %v2872_v5  ;;  %v3165_v2 = vsel %vm3082_vm4, %v3164_v19, %v3163_v1  ;;  %v3043_v55 = vsub.s32 0, %v7036_v11  ;;  %v3310_v33 = vshrl.u32 %v4872_v53, %v3301_v0 }
 0x343   : > { %3399 = vst [vmem:[%s5141_s30 + $0x50] sm:$0xff] %v2873_v44  ;;  %v3415_v60 = vmul.f32 %v2873_v44, %v2873_v44  ;;  %v3168_v29 = vsel %vm7010_vm7, %v6753_v16, %v3165_v2  ;;  %v3312_v17 = vshll.u32 %v4872_v53, %v3300_v24  ;;  %v3305_v21 = vor.u32 %v3304_v31, %v3303_v18 }
 0x344   : > { %4661 = vcosq.f32 %v3168_v29  ;;  %v3853_v6 = vmin.u32 %v3043_v55, %v7036_v11  ;;  %v3308_v10 = vor.u32 %v3307_v42, %v3306_v49  ;;  %v3311_v30 = vor.u32 %v3310_v33, %v3309_v34 }
 0x345   : > { %3441 = vadd.xlane.f32.xlu0 %v3415_v60  ;;  %4663 = vsinq.f32 %v3168_v29  ;;  %v3313_v57 = vshrl.u32 %v4873_v26, %v3301_v0  ;;  %v3315_v22 = vshll.u32 %v4873_v26, %v3300_v24  ;;  %v3860_v4 = vadd.s32 4294967169, %v3187_v50 }
 0x346   : > { %v3045_v48 = vclz %v3853_v6  ;;  %v3316_v23 = vshrl.u32 %v4874_v54, %v3301_v0  ;;  %vm3318_vm11 = vcmp.lt.s32.totalorder %v3299_v12, 1  ;;  %vm3319_vm13 = vcmp.lt.s32.totalorder %v3299_v12, 2 }
 0x347   : > { %v3314_v8 = vor.u32 %v3313_v57, %v3312_v17  ;;  %vm3320_vm14 = vcmp.lt.s32.totalorder %v3299_v12, 3  ;;  %vm3321_vm15 = vcmp.lt.s32.totalorder %v3299_v12, 4  ;;  %v3322_v20 = vsel %vm3318_vm11, %v3302_v38, %v3305_v21 }
 0x348   : > { %v3854_v3 = vadd.s32 4294967294, %v3045_v48  ;;  %v3317_v7 = vor.u32 %v3316_v23, %v3315_v22  ;;  %v3323_v27 = vsel %vm3321_vm15, %v3311_v30, 2102212464  ;;  %v3326_v58 = vsel %vm3318_vm11, %v3305_v21, %v3308_v10 }
 0x349   : > { %v3324_v61 = vsel %vm3320_vm14, %v3308_v10, %v3323_v27  ;;  %v3327_v35 = vsel %vm3321_vm15, %v3314_v8, 920167782  ;;  %v3330_v1 = vsel %vm3318_vm11, %v3308_v10, %v3311_v30  ;;  %v3190_v24 = vand.u32 8388607, %v3183_v46 }
 0x34a   : > { %vm3855_vm0 = vcmp.lt.s32.totalorder %v3854_v3, 0  ;;  %v3328_v0 = vsel %vm3320_vm14, %v3311_v30, %v3327_v35  ;;  %v3331_v39 = vsel %vm3321_vm15, %v3317_v7, 1326507024  ;;  %v3193_v45 = vadd.s32 1, %v3860_v4 }
 0x34b   : > { %v3048_v37 = vsel %vm3855_vm0, 0, %v3854_v3  ;;  %v3325_v5 = vsel %vm3319_vm13, %v3322_v20, %v3324_v61  ;;  %v3329_v19 = vsel %vm3319_vm13, %v3326_v58, %v3328_v0  ;;  %v3332_v18 = vsel %vm3320_vm14, %v3314_v8, %v3331_v39 }
 0x34c   : > { %v3049_v49 = vsub.s32 32, %v3048_v37  ;;  %v3050_v44 = vshll.u32 %v7036_v11, %v3048_v37  ;;  %v3053_v31 = vsub.s32 4294967266, %v3048_v37  ;;  %v3333_v42 = vsel %vm3319_vm13, %v3330_v1, %v3332_v18 }
 0x34d   : > { %v7067_v60 = vmul.u32.u64.low %v7043_v32, %v3333_v42  ;;  %v7068_v2 = vmul.u32.u64.high %v7043_v32, %v3333_v42, %v7067_v60  ;;  %v7071_v50 = vmul.u32.u64.low %v7043_v32, %v3329_v19  ;;  %v7072_v29 = vmul.u32.u64.high %v7043_v32, %v3329_v19, %v7071_v50 }
 0x34e   : > { %vm3172_vm1 = vweird.f32 %v6753_v16  ;;  %v3051_v55 = vshrl.u32 %v7027_v25, %v3049_v49  ;;  %v3054_v38 = vadd.s32 127, %v3053_v31  ;;  %vm3194_vm2 = vcmp.gt.s32.totalorder %v3193_v45, 0 }
 0x34f   : > { %vm3174_vm3 = vcmp.lt.s32.totalorder %v7021_v36, 2  ;;  %vm3178_vm4 = vcmp.eq.s32.totalorder %v7021_v36, 2  ;;  %vm2979_vm5 = vcmp.lt.s32.totalorder %v6758_v56, 0  ;;  %v3191_v11 = vor.u32 8388608, %v3190_v24 }
 0x350   : > { %v3195_v12 = vsel %vm3194_vm2, %v3193_v45, 0  ;;  %vm7082_vm6 = vcmp.le.f32.partialorder %v2977_v52, 0.7853982  ;;  %v3052_v17 = vor.u32 %v3051_v55, %v3050_v44  ;;  %v3055_v6 = vshll.u32 %v3054_v38, 23 }
 0x351   : > { %v4662_v34 = vpop.eup %4661  ;;  %v3341_v25 = vmul.u32 %v7043_v32, %v3325_v5  ;;  %v3197_v21 = vand.u32 31, %v3195_v12  ;;  %vm3175_vm7 = vcmp.eq.s32.totalorder %v7021_v36, 0  ;;  %vm3343_vm8 = vc.u32 %v7068_v2, %v7071_v50 }
 0x352   : > { %v7087_v10 = vpop.xlane.xlu1 %3435  ;;  %v4664_v30 = vpop.eup %4663  ;;  %v3179_v57 = vxor.u32 2147483648, %v4662_v34  ;;  %v3344_v22 = vadd.s32 1, %v7072_v29  ;;  %v3056_v4 = vor.u32 4788187, %v3055_v6  ;;  %v3059_v48 = vcvt.s32.f32 %v3052_v17 }
 0x353   : > { %v3176_v52 = vxor.u32 2147483648, %v4664_v30  ;;  %v3198_v23 = vsub.s32 32, %v3197_v21  ;;  %v3200_v20 = vshll.u32 %v4869_v47, %v3197_v21  ;;  %v7097_v3 = vshll.u32 %v3191_v11, 8 }
 0x354   : > { %v3180_v8 = vsel %vm3178_vm4, %v3179_v57, %v4664_v30  ;;  %v3345_v32 = vsel %vm3343_vm8, %v3344_v22, %v7072_v29  ;;  %v3057_v27 = vand.u32 2147483647, %v3056_v4  ;;  %v3203_v61 = vshll.u32 %v4870_v13, %v3197_v21 }
 0x355   : > { %v3177_v7 = vsel %vm3175_vm7, %v4662_v34, %v3176_v52  ;;  %v3346_v58 = vadd.s32 %v3345_v32, %v3341_v25  ;;  %v3201_v1 = vshrl.u32 %v4870_v13, %v3198_v23  ;;  %v3204_v24 = vshrl.u32 %v4871_v51, %v3198_v23 }
 0x356   : > { %v3181_v35 = vsel %vm3174_vm3, %v3177_v7, %v3180_v8  ;;  %v3206_v0 = vshll.u32 %v4871_v51, %v3197_v21  ;;  %v3060_v45 = vmul.f32 %v3059_v48, %v3057_v27  ;;  %v3207_v5 = vshrl.u32 %v4872_v53, %v3198_v23 }
 0x357   : > { %v3182_v39 = vsel %vm3172_vm1, nan, %v3181_v35  ;;  %v3347_v37 = vadd.s32 536870912, %v3346_v58  ;;  %v3063_v18 = vsub.s32 4, %v7023_v14  ;;  %v3196_v49 = vshrl.u32 %v3195_v12, 5 }
 0x358   : > { %3402 = vst [vmem:[%s5141_s30 + $0x68] sm:$0xff] %v3182_v39  ;;  %v3418_v19 = vmul.f32 %v3182_v39, %v3182_v39  ;;  %v3209_v36 = vshll.u32 %v4872_v53, %v3197_v21  ;;  %v3061_v44 = vxor.u32 2147483648, %v3060_v45  ;;  %v3199_v31 = vshrl.u32 %v4869_v47, %v3198_v23 }
 0x359   : > { %v7111_v13 = vshrl.u32 %v3347_v37, 30  ;;  %v3210_v51 = vshrl.u32 %v4873_v26, %v3198_v23  ;;  %v3202_v16 = vor.u32 %v3201_v1, %v3200_v20  ;;  %v3205_v42 = vor.u32 %v3204_v24, %v3203_v61 }
 0x35a   : > { %3447 = vadd.xlane.f32.xlu1 %v3418_v19  ;;  %v3212_v60 = vshll.u32 %v4873_v26, %v3197_v21  ;;  %v3213_v29 = vshrl.u32 %v4874_v54, %v3198_v23  ;;  %v3062_v55 = vsel %vm2979_vm5, %v3061_v44, %v3060_v45  ;;  %v3208_v53 = vor.u32 %v3207_v5, %v3206_v0 }
 0x35b   : > { %v3349_v38 = vshll.u32 %v7111_v13, 30  ;;  %v3211_v11 = vor.u32 %v3210_v51, %v3209_v36  ;;  %v3065_v47 = vsel %vm7082_vm6, %v6758_v56, %v3062_v55  ;;  %vm3215_vm9 = vcmp.lt.s32.totalorder %v3196_v49, 1 }
 0x35c   : > { %v3214_v12 = vor.u32 %v3213_v29, %v3212_v60  ;;  %vm3218_vm10 = vcmp.lt.s32.totalorder %v3196_v49, 4  ;;  %v3064_v26 = vsel %vm2979_vm5, %v3063_v18, %v7023_v14  ;;  %4665 = vcosq.f32 %v3065_v47 }
 0x35d   : > { %v3350_v54 = vsub.s32 %v3346_v58, %v3349_v38  ;;  %vm3217_vm12 = vcmp.lt.s32.totalorder %v3196_v49, 3  ;;  %4667 = vsinq.f32 %v3065_v47  ;;  %vm3216_vm11 = vcmp.lt.s32.totalorder %v3196_v49, 2 }
 0x35e   : > { %v3219_v34 = vsel %vm3215_vm9, %v3199_v31, %v3202_v16  ;;  %v3220_v17 = vsel %vm3218_vm10, %v3208_v53, 2102212464  ;;  %v3223_v21 = vsel %vm3215_vm9, %v3202_v16, %v3205_v42  ;;  %v3224_v30 = vsel %vm3218_vm10, %v3211_v11, 920167782 }
 0x35f   : > { %v3352_v6 = vsub.s32 0, %v3350_v54  ;;  %v3221_v25 = vsel %vm3217_vm12, %v3205_v42, %v3220_v17  ;;  %v3225_v57 = vsel %vm3217_vm12, %v3208_v53, %v3224_v30  ;;  %v3227_v22 = vsel %vm3215_vm9, %v3205_v42, %v3208_v53 }
 0x360   : > { %v3228_v52 = vsel %vm3218_vm10, %v3214_v12, 1326507024  ;;  %v3066_v14 = vsel %vm7082_vm6, 0, %v3064_v26  ;;  %v3222_v48 = vsel %vm3216_vm11, %v3219_v34, %v3221_v25  ;;  %v3226_v23 = vsel %vm3216_vm11, %v3223_v21, %v3225_v57 }
 0x361   : > { %v3865_v4 = vmin.u32 %v3352_v6, %v3350_v54  ;;  %v3229_v8 = vsel %vm3217_vm12, %v3211_v11, %v3228_v52  ;;  %v7135_v7 = vmul.u32.u64.low %v7097_v3, %v3226_v23  ;;  %v7136_v27 = vmul.u32.u64.high %v7097_v3, %v3226_v23, %v7135_v7 }
 0x362   : > { %v3230_v20 = vsel %vm3216_vm11, %v3227_v22, %v3229_v8  ;;  %v3070_v33 = vand.u32 3, %v3066_v14  ;;  %v3238_v1 = vmul.u32 %v7097_v3, %v3222_v48  ;;  %v3342_v0 = vadd.s32 %v7071_v50, %v7068_v2 }
 0x363   : > { %v3354_v32 = vclz %v3865_v4  ;;  %v7139_v58 = vmul.u32.u64.low %v7097_v3, %v3230_v20  ;;  %v7140_v61 = vmul.u32.u64.high %v7097_v3, %v3230_v20, %v7139_v58  ;;  %v3241_v39 = vadd.s32 1, %v7136_v27 }
 0x364   : > { %vm3075_vm15 = vcmp.eq.s32.totalorder %v3070_v33, 2  ;;  %vm3072_vm0 = vcmp.eq.s32.totalorder %v3070_v33, 0  ;;  %vm3071_vm1 = vcmp.lt.s32.totalorder %v3070_v33, 2  ;;  %vm3069_vm2 = vweird.f32 %v6758_v56 }
 0x365   : > { %v3866_v35 = vadd.s32 4294967294, %v3354_v32  ;;  %vm3240_vm14 = vc.u32 %v7140_v61, %v7135_v7  ;;  %vm3288_vm3 = vcmp.lt.s32.totalorder %v6962_v62, 0  ;;  %vm7158_vm4 = vcmp.le.f32.partialorder %v3286_v59, 0.7853982 }
 0x366   : > { %v3242_v18 = vsel %vm3240_vm14, %v3241_v39, %v7136_v27  ;;  %v3372_v57 = vsub.s32 4, %v7111_v13  ;;  %v3239_v59 = vadd.s32 %v7135_v7, %v7140_v61  ;;  %vm3378_vm9 = vweird.f32 %v6962_v62 }
 0x367   : > { %v7143_v24 = vpop.xlane.xlu0 %3433  ;;  %vm3867_vm13 = vcmp.lt.s32.totalorder %v3866_v35, 0  ;;  %v3243_v36 = vadd.s32 %v3242_v18, %v3238_v1  ;;  %vm3185_vm10 = vcmp.lt.s32.totalorder %v7017_v15, 0  ;;  %vm3184_vm12 = vcmp.le.f32.partialorder %v3183_v46, 0.7853982 }
 0x368   : > { %v3357_v45 = vsel %vm3867_vm13, 0, %v3866_v35  ;;  %v3373_v14 = vsel %vm3288_vm3, %v3372_v57, %v7111_v13 }
 0x369   : > { %v3358_v37 = vsub.s32 32, %v3357_v45  ;;  %v3359_v5 = vshll.u32 %v3350_v54, %v3357_v45  ;;  %v3362_v19 = vsub.s32 4294967266, %v3357_v45  ;;  %v4666_v49 = vpop.eup %4665  ;;  %v3244_v51 = vadd.s32 536870912, %v3243_v36 }
 0x36a   : > { %v4668_v3 = vpop.eup %4667  ;;  %v3076_v44 = vxor.u32 2147483648, %v4666_v49  ;;  %v3375_v20 = vsel %vm7158_vm4, 0, %v3373_v14 }
 0x36b   : > { %v3360_v31 = vshrl.u32 %v3342_v0, %v3358_v37  ;;  %v3363_v2 = vadd.s32 127, %v3362_v19  ;;  %v3073_v50 = vxor.u32 2147483648, %v4668_v3  ;;  %v7151_v55 = vshrl.u32 %v3244_v51, 30 }
 0x36c   : > { %v3077_v16 = vsel %vm3075_vm15, %v3076_v44, %v4668_v3  ;;  %v3379_v33 = vand.u32 3, %v3375_v20  ;;  %vm3275_vm15 = vweird.f32 %v7017_v15 }
 0x36d   : > { %v3361_v42 = vor.u32 %v3360_v31, %v3359_v5  ;;  %v3364_v60 = vshll.u32 %v3363_v2, 23  ;;  %v3074_v29 = vsel %vm3072_vm0, %v4666_v49, %v3073_v50  ;;  %v3246_v12 = vshll.u32 %v7151_v55, 30 }
 0x36e   : > { %v3078_v38 = vsel %vm3071_vm1, %v3074_v29, %v3077_v16  ;;  %vm3384_vm6 = vcmp.eq.s32.totalorder %v3379_v33, 2  ;;  %vm3381_vm7 = vcmp.eq.s32.totalorder %v3379_v33, 0  ;;  %vm3380_vm8 = vcmp.lt.s32.totalorder %v3379_v33, 2 }
 0x36f   : > { %v3365_v53 = vor.u32 4788187, %v3364_v60  ;;  %v3368_v11 = vcvt.s32.f32 %v3361_v42  ;;  %v3079_v47 = vsel %vm3069_vm2, nan, %v3078_v38  ;;  %v3247_v34 = vsub.s32 %v3243_v36, %v3246_v12 }
 0x370   : > { %3401 = vst [vmem:[%s5141_s30 + $0x60] sm:$0xff] %v3079_v47  ;;  %v3417_v26 = vmul.f32 %v3079_v47, %v3079_v47  ;;  %v3269_v50 = vsub.s32 4, %v7151_v55 }
 0x371   : > { %v3366_v54 = vand.u32 2147483647, %v3365_v53  ;;  %v3249_v56 = vsub.s32 0, %v3247_v34 }
 0x372   : > { %3445 = vadd.xlane.f32.xlu0 %v3417_v26 }
 0x373   : > { %v3369_v17 = vmul.f32 %v3368_v11, %v3366_v54  ;;  %v3861_v21 = vmin.u32 %v3249_v56, %v3247_v34 }
 0x375   : > { %v3370_v25 = vxor.u32 2147483648, %v3369_v17  ;;  %v3251_v52 = vclz %v3861_v21 }
 0x377   : > { %v3371_v30 = vsel %vm3288_vm3, %v3370_v25, %v3369_v17  ;;  %v3862_v4 = vadd.s32 4294967294, %v3251_v52 }
 0x378   : > { %v3374_v22 = vsel %vm7158_vm4, %v6962_v62, %v3371_v30  ;;  %v3270_v62 = vsel %vm3185_vm10, %v3269_v50, %v7151_v55 }
 0x379   : > { %4669 = vcosq.f32 %v3374_v22  ;;  %vm3863_vm5 = vcmp.lt.s32.totalorder %v3862_v4, 0  ;;  %v3272_v16 = vsel %vm3184_vm12, 0, %v3270_v62 }
 0x37a   : > { %4671 = vsinq.f32 %v3374_v22  ;;  %v3254_v48 = vsel %vm3863_vm5, 0, %v3862_v4  ;;  %v3276_v42 = vand.u32 3, %v3272_v16 }
 0x37b   : > { %v3255_v23 = vsub.s32 32, %v3254_v48  ;;  %v3256_v8 = vshll.u32 %v3247_v34, %v3254_v48  ;;  %v3259_v32 = vsub.s32 4294967266, %v3254_v48 }
 0x37c   : > { %vm3281_vm11 = vcmp.eq.s32.totalorder %v3276_v42, 2  ;;  %vm3278_vm13 = vcmp.eq.s32.totalorder %v3276_v42, 0  ;;  %vm3277_vm14 = vcmp.lt.s32.totalorder %v3276_v42, 2 }
 0x37d   : > { %v3257_v27 = vshrl.u32 %v3239_v59, %v3255_v23  ;;  %v3260_v58 = vadd.s32 127, %v3259_v32 }
 0x37f   : > { %v3258_v1 = vor.u32 %v3257_v27, %v3256_v8  ;;  %v3261_v0 = vshll.u32 %v3260_v58, 23 }
 0x381   : > { %v3262_v39 = vor.u32 4788187, %v3261_v0  ;;  %v3265_v45 = vcvt.s32.f32 %v3258_v1 }
 0x382   : > { %v7170_v35 = vpop.xlane.xlu1 %3439 }
 0x383   : > { %v3263_v7 = vand.u32 2147483647, %v3262_v39 }
 0x385   : > { %v3266_v19 = vmul.f32 %v3265_v45, %v3263_v7 }
 0x386   : > { %v4670_v13 = vpop.eup %4669 }
 0x387   : > { %v4672_v61 = vpop.eup %4671  ;;  %v3385_v37 = vxor.u32 2147483648, %v4670_v13  ;;  %v3267_v36 = vxor.u32 2147483648, %v3266_v19 }
 0x388   : > { %v3382_v5 = vxor.u32 2147483648, %v4672_v61 }
 0x389   : > { %v3386_v18 = vsel %vm3384_vm6, %v3385_v37, %v4672_v61  ;;  %v3268_v31 = vsel %vm3185_vm10, %v3267_v36, %v3266_v19 }
 0x38a   : > { %v3383_v49 = vsel %vm3381_vm7, %v4670_v13, %v3382_v5  ;;  %v3271_v51 = vsel %vm3184_vm12, %v7017_v15, %v3268_v31 }
 0x38b   : > { %v3387_v3 = vsel %vm3380_vm8, %v3383_v49, %v3386_v18  ;;  %4673 = vcosq.f32 %v3271_v51 }
 0x38c   : > { %v3388_v44 = vsel %vm3378_vm9, nan, %v3387_v3  ;;  %4675 = vsinq.f32 %v3271_v51 }
 0x38d   : > { %3404 = vst [vmem:[%s5141_s30 + $0x78] sm:$0xff] %v3388_v44  ;;  %v3420_v2 = vmul.f32 %v3388_v44, %v3388_v44 }
 0x38f   : > { %3451 = vadd.xlane.f32.xlu1 %v3420_v2 }
 0x398   : > { %v4674_v60 = vpop.eup %4673 }
 0x399   : > { %v4676_v46 = vpop.eup %4675  ;;  %v3282_v29 = vxor.u32 2147483648, %v4674_v60 }
 0x39a   : > { %v3279_v53 = vxor.u32 2147483648, %v4676_v46 }
 0x39b   : > { %v3283_v11 = vsel %vm3281_vm11, %v3282_v29, %v4676_v46 }
 0x39c   : > { %v3280_v47 = vsel %vm3278_vm13, %v4674_v60, %v3279_v53 }
 0x39d   : > { %v3438_v38 = vpop.xlane.xlu0 %3437  ;;  %v3284_v12 = vsel %vm3277_vm14, %v3280_v47, %v3283_v11 }
 0x39e   : > { %v3285_v26 = vsel %vm3275_vm15, nan, %v3284_v12 }
 0x39f   : > { %3403 = vst [vmem:[%s5141_s30 + $0x70] sm:$0xff] %v3285_v26  ;;  %v3419_v54 = vmul.f32 %v3285_v26, %v3285_v26 }
 0x3a1   : > { %3449 = vadd.xlane.f32.xlu0 %v3419_v54 }
 0x3b2   : > { %v3444_v55 = vpop.xlane.xlu1 %3443 }
 0x3ce   : > { %v3442_v34 = vpop.xlane.xlu0 %3441 }
 0x3e3   : > { %v7182_v17 = vpop.xlane.xlu1 %3447 }
 0x3fb   : > { %v3446_v56 = vpop.xlane.xlu0 %3445 }
 0x418   : > { %v7184_v6 = vpop.xlane.xlu1 %3451 }
 0x426   : > { %3456 = sbr.rel (%p3868_p4) target bundleno = 1076 (0x434), region = 52 }
 0x42a   : > { %v3450_v25 = vpop.xlane.xlu0 %3449 }
 0x42b   : > { %vm3457_vm0 = vcmask 7168  }
 0x42c   : > { %3458 = vst.msk [vmem:[%s5139_s3] sm:$0xff] %vm3457_vm0, %v6935_v40  ;;  %3459 = vst.msk [vmem:[%s5139_s3 + $0x8] sm:$0xff] %vm3457_vm0, %v6954_v41 }
 0x42d   : > { %3460 = vst.msk [vmem:[%s5139_s3 + $0x10] sm:$0xff] %vm3457_vm0, %v6933_v28  ;;  %3461 = vst.msk [vmem:[%s5139_s3 + $0x18] sm:$0xff] %vm3457_vm0, %v6952_v43 }
 0x42e   : > { %3462 = vst.msk [vmem:[%s5139_s3 + $0x20] sm:$0xff] %vm3457_vm0, %v6999_v63  ;;  %3463 = vst.msk [vmem:[%s5139_s3 + $0x28] sm:$0xff] %vm3457_vm0, %v6967_v9 }
 0x42f   : > { %3464 = vst.msk [vmem:[%s5139_s3 + $0x30] sm:$0xff] %vm3457_vm0, %v7143_v24  ;;  %3465 = vst.msk [vmem:[%s5139_s3 + $0x38] sm:$0xff] %vm3457_vm0, %v7087_v10 }
 0x430   : > { %3466 = vst.msk [vmem:[%s5139_s3 + $0x40] sm:$0xff] %vm3457_vm0, %v3438_v38  ;;  %3467 = vst.msk [vmem:[%s5139_s3 + $0x48] sm:$0xff] %vm3457_vm0, %v7170_v35 }
 0x431   : > { %3468 = vst.msk [vmem:[%s5139_s3 + $0x50] sm:$0xff] %vm3457_vm0, %v3442_v34  ;;  %3469 = vst.msk [vmem:[%s5139_s3 + $0x58] sm:$0xff] %vm3457_vm0, %v3444_v55 }
 0x432   : > { %3470 = vst.msk [vmem:[%s5139_s3 + $0x60] sm:$0xff] %vm3457_vm0, %v3446_v56  ;;  %3471 = vst.msk [vmem:[%s5139_s3 + $0x68] sm:$0xff] %vm3457_vm0, %v7182_v17 }
 0x433   : > { %3472 = vst.msk [vmem:[%s5139_s3 + $0x70] sm:$0xff] %vm3457_vm0, %v3450_v25  ;;  %3473 = vst.msk [vmem:[%s5139_s3 + $0x78] sm:$0xff] %vm3457_vm0, %v7184_v6 }
 0x434 PF: > { %p3869_p11 = scmp.le.s32.totalorder %s4841_s24, 0 }
 0x436   : > { %3477 = sbr.rel (%p3869_p11) target bundleno = 1094 (0x446), region = 56 }
 0x43b   : > { %v3478_v15 = vld [vmem:[%s5139_s3] sm:$0xff]  ;;  %vm3510_vm1 = vcmask 7168   ;;  %v3479_v21 = vld [vmem:[%s5139_s3 + $0x8] sm:$0xff]  ;;  %v3480_v30 = vld [vmem:[%s5139_s3 + $0x10] sm:$0xff] }
 0x43c   : > { %v3494_v57 = vadd.f32 %v3478_v15, %v6935_v40  ;;  %v3495_v22 = vadd.f32 %v3479_v21, %v6954_v41  ;;  %v3496_v52 = vadd.f32 %v3480_v30, %v6933_v28  ;;  %v3481_v4 = vld [vmem:[%s5139_s3 + $0x18] sm:$0xff]  ;;  %v3482_v14 = vld [vmem:[%s5139_s3 + $0x20] sm:$0xff]  ;;  %v3483_v59 = vld [vmem:[%s5139_s3 + $0x28] sm:$0xff] }
 0x43d   : > { %v3497_v48 = vadd.f32 %v3481_v4, %v6952_v43  ;;  %v3498_v23 = vadd.f32 %v3482_v14, %v6999_v63  ;;  %v3499_v8 = vadd.f32 %v3483_v59, %v6967_v9  ;;  %v3484_v40 = vld [vmem:[%s5139_s3 + $0x30] sm:$0xff]  ;;  %v3485_v32 = vld [vmem:[%s5139_s3 + $0x38] sm:$0xff]  ;;  %v3486_v41 = vld [vmem:[%s5139_s3 + $0x40] sm:$0xff] }
 0x43e   : > { %3511 = vst.msk [vmem:[%s5139_s3] sm:$0xff] %vm3510_vm1, %v3494_v57  ;;  %3512 = vst.msk [vmem:[%s5139_s3 + $0x8] sm:$0xff] %vm3510_vm1, %v3495_v22  ;;  %v3500_v28 = vadd.f32 %v3484_v40, %v7143_v24  ;;  %v3501_v43 = vadd.f32 %v3485_v32, %v7087_v10  ;;  %v3502_v9 = vadd.f32 %v3486_v41, %v3438_v38  ;;  %v3487_v63 = vld [vmem:[%s5139_s3 + $0x48] sm:$0xff]  ;;  %v3488_v20 = vld [vmem:[%s5139_s3 + $0x50] sm:$0xff] }
 0x43f   : > { %3513 = vst.msk [vmem:[%s5139_s3 + $0x10] sm:$0xff] %vm3510_vm1, %v3496_v52  ;;  %v3489_v27 = vld [vmem:[%s5139_s3 + $0x58] sm:$0xff]  ;;  %3514 = vst.msk [vmem:[%s5139_s3 + $0x18] sm:$0xff] %vm3510_vm1, %v3497_v48  ;;  %v3503_v24 = vadd.f32 %v3487_v63, %v7170_v35  ;;  %v3504_v58 = vadd.f32 %v3488_v20, %v3442_v34  ;;  %v3490_v33 = vld [vmem:[%s5139_s3 + $0x60] sm:$0xff] }
 0x440   : > { %3515 = vst.msk [vmem:[%s5139_s3 + $0x20] sm:$0xff] %vm3510_vm1, %v3498_v23  ;;  %3516 = vst.msk [vmem:[%s5139_s3 + $0x28] sm:$0xff] %vm3510_vm1, %v3499_v8  ;;  %v3505_v10 = vadd.f32 %v3489_v27, %v3444_v55  ;;  %v3491_v1 = vld [vmem:[%s5139_s3 + $0x68] sm:$0xff]  ;;  %v3492_v0 = vld [vmem:[%s5139_s3 + $0x70] sm:$0xff]  ;;  %v3506_v39 = vadd.f32 %v3490_v33, %v3446_v56 }
 0x441   : > { %3517 = vst.msk [vmem:[%s5139_s3 + $0x30] sm:$0xff] %vm3510_vm1, %v3500_v28  ;;  %3518 = vst.msk [vmem:[%s5139_s3 + $0x38] sm:$0xff] %vm3510_vm1, %v3501_v43  ;;  %v3507_v45 = vadd.f32 %v3491_v1, %v7182_v17  ;;  %v3508_v13 = vadd.f32 %v3492_v0, %v3450_v25  ;;  %v3493_v35 = vld [vmem:[%s5139_s3 + $0x78] sm:$0xff] }
 0x442   : > { %3519 = vst.msk [vmem:[%s5139_s3 + $0x40] sm:$0xff] %vm3510_vm1, %v3502_v9  ;;  %3520 = vst.msk [vmem:[%s5139_s3 + $0x48] sm:$0xff] %vm3510_vm1, %v3503_v24  ;;  %v3509_v7 = vadd.f32 %v3493_v35, %v7184_v6 }
 0x443   : > { %3521 = vst.msk [vmem:[%s5139_s3 + $0x50] sm:$0xff] %vm3510_vm1, %v3504_v58  ;;  %3522 = vst.msk [vmem:[%s5139_s3 + $0x58] sm:$0xff] %vm3510_vm1, %v3505_v10 }
 0x444   : > { %3523 = vst.msk [vmem:[%s5139_s3 + $0x60] sm:$0xff] %vm3510_vm1, %v3506_v39  ;;  %3524 = vst.msk [vmem:[%s5139_s3 + $0x68] sm:$0xff] %vm3510_vm1, %v3507_v45 }
 0x445   : > { %3525 = vst.msk [vmem:[%s5139_s3 + $0x70] sm:$0xff] %vm3510_vm1, %v3508_v13  ;;  %3526 = vst.msk [vmem:[%s5139_s3 + $0x78] sm:$0xff] %vm3510_vm1, %v3509_v7 }
 0x446 PF: > { %s7561_s13 = sld [smem:[#allocation17_spill]] }
 0x44c   : > { %p7562_p9 = scmp.ne.s32.totalorder %s7561_s13, 0 }
 0x44d   : > { %s7563_s8 = sld [smem:[#allocation11_spill]] (%p7562_p9)  ;;  %v3602_v61 = vld [vmem:[%s5141_s30] sm:$0xff] (%p7562_p9)  ;;  %v3604_v37 = vld [vmem:[%s5141_s30 + $0x8] sm:$0xff] (%p7562_p9)  ;;  %v3606_v5 = vld [vmem:[%s5141_s30 + $0x10] sm:$0xff] (%p7562_p9) }
 0x44e   : > { %3538 = sbr.rel (!%p7562_p9) target bundleno = 1119 (0x45f), region = 60  ;;  %v3608_v19 = vld [vmem:[%s5141_s30 + $0x18] sm:$0xff] (%p7562_p9)  ;;  %v3610_v18 = vld [vmem:[%s5141_s30 + $0x20] sm:$0xff] (%p7562_p9)  ;;  %v3612_v49 = vld [vmem:[%s5141_s30 + $0x28] sm:$0xff] (%p7562_p9)  ;;  %s7564_s5 = sld [smem:[#allocation37_spill]] (%p7562_p9) }
 0x44f   : > { %v3614_v36 = vld [vmem:[%s5141_s30 + $0x30] sm:$0xff] (%p7562_p9)  ;;  %v3616_v3 = vld [vmem:[%s5141_s30 + $0x38] sm:$0xff] (%p7562_p9)  ;;  %v3618_v44 = vld [vmem:[%s5141_s30 + $0x40] sm:$0xff] (%p7562_p9) }
 0x450   : > { %v3620_v31 = vld [vmem:[%s5141_s30 + $0x48] sm:$0xff] (%p7562_p9)  ;;  %v3622_v2 = vld [vmem:[%s5141_s30 + $0x50] sm:$0xff] (%p7562_p9)  ;;  %v3624_v50 = vld [vmem:[%s5141_s30 + $0x58] sm:$0xff] (%p7562_p9) }
 0x451   : > { %v3626_v51 = vld [vmem:[%s5141_s30 + $0x60] sm:$0xff] (%p7562_p9)  ;;  %v3628_v62 = vld [vmem:[%s5141_s30 + $0x68] sm:$0xff] (%p7562_p9)  ;;  %v3630_v16 = vld [vmem:[%s5141_s30 + $0x70] sm:$0xff] (%p7562_p9) }
 0x452   : > { %v3632_v42 = vld [vmem:[%s5141_s30 + $0x78] sm:$0xff] (%p7562_p9) }
 0x453   : > { %s3878_s20 = sshll.u32 %s7563_s8, 5 }
 0x454   : > { %s3541_s25 = sadd.s32 %s4841_s24, %s3878_s20 }
 0x455   : > { %s3873_s11 = sshll.u32 %s3541_s25, 3 }
 0x456   : > { %s3543_s7 = scalar_lea.vmem %s7564_s5, %s3873_s11 }
 0x457   : > { %3603 = vst [vmem:[%s3543_s7] sm:$0xff] %v3602_v61  ;;  %3605 = vst [vmem:[%s3543_s7 + $0x10] sm:$0xff] %v3604_v37 }
 0x458   : > { %3607 = vst [vmem:[%s3543_s7 + $0x20] sm:$0xff] %v3606_v5  ;;  %3609 = vst [vmem:[%s3543_s7 + $0x30] sm:$0xff] %v3608_v19 }
 0x459   : > { %3611 = vst [vmem:[%s3543_s7 + $0x40] sm:$0xff] %v3610_v18  ;;  %3613 = vst [vmem:[%s3543_s7 + $0x50] sm:$0xff] %v3612_v49 }
 0x45a   : > { %3615 = vst [vmem:[%s3543_s7 + $0x60] sm:$0xff] %v3614_v36  ;;  %3617 = vst [vmem:[%s3543_s7 + $0x70] sm:$0xff] %v3616_v3 }
 0x45b   : > { %3619 = vst [vmem:[%s3543_s7 + $0x80] sm:$0xff] %v3618_v44  ;;  %3621 = vst [vmem:[%s3543_s7 + $0x90] sm:$0xff] %v3620_v31 }
 0x45c   : > { %3623 = vst [vmem:[%s3543_s7 + $0xa0] sm:$0xff] %v3622_v2  ;;  %3625 = vst [vmem:[%s3543_s7 + $0xb0] sm:$0xff] %v3624_v50 }
 0x45d   : > { %3627 = vst [vmem:[%s3543_s7 + $0xc0] sm:$0xff] %v3626_v51  ;;  %3629 = vst [vmem:[%s3543_s7 + $0xd0] sm:$0xff] %v3628_v62 }
 0x45e   : > { %3631 = vst [vmem:[%s3543_s7 + $0xe0] sm:$0xff] %v3630_v16  ;;  %3633 = vst [vmem:[%s3543_s7 + $0xf0] sm:$0xff] %v3632_v42 }
 0x45f PF: > { %s21_s29 = sadd.s32 1, %s4861_s29   ;;  %s7566_s14 = sld [smem:[#allocation16_spill]] }
 0x460   : > { %p7314_p13 = scmp.ge.s32.totalorder %s21_s29, 10   ;;  %s7567_s25 = sld [smem:[#allocation12_spill]] }
 0x461   : > { %s7568_s12 = sld [smem:[#allocation13_spill]]  ;;  %s7572_s15 = smov %s4809_s16 }
 0x462   : > { %s7569_s6 = sld [smem:[#allocation14_spill]]  ;;  %s7573_s16 = smov %s5087_s4 }
 0x463   : > { %s7570_s28 = sld [smem:[#allocation15_spill]]  ;;  %s7574_s17 = smov %s4817_s18 }
 0x464   : > { %s7575_s18 = smov %s4821_s19  ;;  %s7577_s20 = smov %s4829_s21 }
 0x465   : > { %s7576_s19 = smov %s7566_s14  ;;  %s7578_s21 = smov %s4833_s22 }
 0x466   : > { %s7579_s22 = smov %s5084_s0  ;;  %s7580_s23 = smov %s4849_s26 }
 0x467   : > { %s7581_s24 = smov %s4853_s27  ;;  %s7582_s26 = smov %s7568_s12 }
 0x468   : > { %s7583_s27 = smov %s7569_s6  ;;  %20 = sbr.rel (!%p7314_p13) target bundleno = 16 (0x10), region = 154 }
 0x46d   :  { %3661 = vsyncpa [#allocation4], 1 }
 0x46e   :  { %3663 = vsyncpa [#allocation4 + $0x1], 1 }
 0x46f   :  { %3664 = vsyncpa [#allocation6], 1 }
 0x470   :  { %3666 = vsyncpa [#allocation6 + $0x1], 1 }

</bundles_post_ra>
